<compile_context>
chip_gen: v6e
topology: v6e:2x2x1
jax: 0.10.0
libtpu: 0.0.40
codegen_flags: <defaults>
</compile_context>

<pallas_src>
import functools
import math

import jax
import jax.numpy as jnp
from jax.experimental import pallas as pl
from jax.experimental.pallas import tpu as pltpu

# F.local_response_norm(x, size=5, k=2.0) with PyTorch default alpha/beta.
LRN_SIZE = 5
LRN_ALPHA = 1e-4
LRN_BETA = 0.75
LRN_K = 2.0

LANES = 128                       # vreg lane width: conv channels padded to this
VMEM_LIMIT = 32 * 1024 * 1024     # safe on v5e/v6e/v7x scoped-VMEM budgets


def _round_up(x, m):
    return ((x + m - 1) // m) * m


def _pick_tile(dim, candidates):
    for c in candidates:
        if dim % c == 0:
            return c
    return dim                    # full dim (always legal as a block size)


def _pair(v):
    return (v, v) if isinstance(v, int) else (int(v[0]), int(v[1]))


# ----------------------------------------------------------------------------
# LRN epilogue (runs inside the conv kernel, on the lane/channel dim)
# ----------------------------------------------------------------------------
def _lrn_channels_last(y):
    """PyTorch F.local_response_norm(size=5, k=2.0) over the lane (channel) dim.

    Requires >= LRN_SIZE//2 zero-padded channels at the top of the lane dim so the
    circular pltpu.roll only wraps zeros across the boundary -> no edge masks needed.
    The rolls run on the XLU slot, so the LRN epilogue is essentially free.
    """
    c = y.shape[-1]
    sq = y * y
    s = sq
    for shift in (1, 2):
        s = s + pltpu.roll(sq, shift, 1)        # neighbour c - shift
        s = s + pltpu.roll(sq, c - shift, 1)    # neighbour c + shift
    den = LRN_K + (LRN_ALPHA / LRN_SIZE) * s
    return y * jnp.exp(-LRN_BETA * jnp.log(den))


# ----------------------------------------------------------------------------
# Conv kernel: implicit GEMM, one output row per grid step, reduce over kh taps
# ----------------------------------------------------------------------------
def _conv_row_kernel(x_ref, w_ref, b_ref, o_ref, acc_ref, *, kh, kw, stride_w,
                     wo, use_lrn):
    dh = pl.program_id(3)

    @pl.when(dh == 0)
    def _():
        acc_ref[...] = jnp.zeros_like(acc_ref)

    acc = acc_ref[...]
    for dw in range(kw):                              # static unroll over kw taps
        if stride_w == 1:
            xin = x_ref[pl.ds(dw, wo), :]             # (Wo, Cin) window of the row
        else:
            xin = x_ref[pl.ds(dw, wo, stride_w), :]   # strided window
        acc = acc + jnp.dot(xin, w_ref[dw], preferred_element_type=jnp.float32)
    acc_ref[...] = acc

    @pl.when(dh == kh - 1)
    def _():
        y = acc_ref[...] + b_ref[...]                 # bias
        y = jnp.maximum(y, 0.0)                       # ConvBlock ReLU
        if use_lrn:
            y = _lrn_channels_last(y)
        o_ref[...] = y.astype(o_ref.dtype)


def conv2d_relu_lrn(x, w, b, *, stride, padding, use_lrn):
    """AlexConv: Conv2d(bias=True) + ReLU (+ LRN).

    x: NHWC (channel-padded), w: (KH, KW, Cin_pad, Cout_pad), b: (Cout_pad,).
    """
    n, h, wd, cinp = x.shape
    kh, kw, cinp_w, coutp = w.shape
    assert cinp == cinp_w
    sh, sw = _pair(stride)
    ph, pw = _pair(padding)
    xp = jnp.pad(x, ((0, 0), (ph, ph), (pw, pw), (0, 0)))
    hp, wp = h + 2 * ph, wd + 2 * pw
    ho = (hp - kh) // sh + 1
    wo = (wp - kw) // sw + 1
    # LRN needs the whole (padded) channel dim resident in one tile.
    tco = coutp if use_lrn else _pick_tile(coutp, (256, 128))
    grid = (n, ho, coutp // tco, kh)
    kernel = functools.partial(_conv_row_kernel, kh=kh, kw=kw, stride_w=sw,
                               wo=wo, use_lrn=use_lrn)
    return pl.pallas_call(
        kernel,
        out_shape=jax.ShapeDtypeStruct((n, ho, wo, coutp), jnp.float32),
        grid_spec=pltpu.PrefetchScalarGridSpec(
            num_scalar_prefetch=0,
            grid=grid,
            in_specs=[
                # one padded input row per step; the index_map does the im2col shift
                pl.BlockSpec((None, None, wp, cinp),
                             lambda ni, oi, ci, di: (ni, oi * sh + di, 0, 0)),
                pl.BlockSpec((None, kw, cinp, tco),
                             lambda ni, oi, ci, di: (di, 0, 0, ci)),
                pl.BlockSpec((1, tco), lambda ni, oi, ci, di: (0, ci)),
            ],
            out_specs=pl.BlockSpec((None, None, wo, tco),
                                   lambda ni, oi, ci, di: (ni, oi, 0, ci)),
            scratch_shapes=[pltpu.VMEM((wo, tco), jnp.float32)],
        ),
        compiler_params=pltpu.CompilerParams(
            dimension_semantics=("parallel", "parallel", "parallel", "arbitrary"),
            vmem_limit_bytes=VMEM_LIMIT),
    )(xp, w, b.reshape(1, coutp))


# ----------------------------------------------------------------------------
# MaxPool(3, 2, ceil_mode=True): gridded row-per-step kernel (no 9x HBM stack)
# ----------------------------------------------------------------------------
def _maxpool_row_kernel(x_ref, o_ref, acc_ref, *, wo):
    dh = pl.program_id(2)

    @pl.when(dh == 0)
    def _():
        acc_ref[...] = jnp.full_like(acc_ref, -jnp.inf)

    m = x_ref[pl.ds(0, wo, 2), :]                     # stride-2 horizontal taps
    for dw in (1, 2):
        m = jnp.maximum(m, x_ref[pl.ds(dw, wo, 2), :])
    acc_ref[...] = jnp.maximum(acc_ref[...], m)       # reduce over the 3 rows

    @pl.when(dh == pl.num_programs(2) - 1)
    def _():
        o_ref[...] = acc_ref[...].astype(o_ref.dtype)


def maxpool2d_k3s2_ceil(x):
    """nn.MaxPool2d(kernel_size=3, stride=2, padding=0, ceil_mode=True); x NHWC."""
    n, h, w, c = x.shape
    ho = -(-(h - 3) // 2) + 1
    wo = -(-(w - 3) // 2) + 1
    hp = (ho - 1) * 2 + 3
    wp = (wo - 1) * 2 + 3
    neg = float(jnp.finfo(jnp.float32).min)           # f32 activations: safe pad value
    xp = jnp.pad(x, ((0, 0), (0, hp - h), (0, wp - w), (0, 0)),
                 constant_values=neg)
    grid = (n, ho, 3)
    return pl.pallas_call(
        functools.partial(_maxpool_row_kernel, wo=wo),
        out_shape=jax.ShapeDtypeStruct((n, ho, wo, c), x.dtype),
        grid_spec=pltpu.PrefetchScalarGridSpec(
            num_scalar_prefetch=0,
            grid=grid,
            in_specs=[pl.BlockSpec((None, None, wp, c),
                                   lambda ni, oi, di: (ni, 2 * oi + di, 0, 0))],
            out_specs=pl.BlockSpec((None, None, wo, c),
                                   lambda ni, oi, di: (ni, oi, 0, 0)),
            scratch_shapes=[pltpu.VMEM((wo, c), jnp.float32)],
        ),
        compiler_params=pltpu.CompilerParams(
            dimension_semantics=("parallel", "parallel", "arbitrary"),
            vmem_limit_bytes=VMEM_LIMIT),
    )(xp)


# ----------------------------------------------------------------------------
# Tiled FC matmul: y = act(x @ w + b), (M, N, K) grid, f32 accumulation
# ----------------------------------------------------------------------------
def _matmul_bias_act_kernel(x_ref, w_ref, b_ref, o_ref, acc_ref, *, relu):
    k = pl.program_id(2)

    @pl.when(k == 0)
    def _():
        acc_ref[...] = jnp.zeros_like(acc_ref)

    xv = x_ref[...]
    wv = w_ref[...]
    if wv.dtype != xv.dtype:                          # bf16 weight streaming
        xv = xv.astype(wv.dtype)
    acc_ref[...] += jnp.dot(xv, wv, preferred_element_type=jnp.float32)

    @pl.when(k == pl.num_programs(2) - 1)
    def _():
        y = acc_ref[...] + b_ref[...]
        if relu:
            y = jnp.maximum(y, 0.0)
        o_ref[...] = y.astype(o_ref.dtype)


def matmul_bias_act(x, w, b, *, relu=False):
    """y = act(x @ w + b).  x:(M,K) f32, w:(K,N) f32/bf16, b:(N,) f32."""
    M, K = x.shape
    K2, N = w.shape
    assert K == K2
    tm = _pick_tile(M, (256, 512, 128, 64, 32, 16, 8))
    tk = _pick_tile(K, (512, 256, 128))
    tn = _pick_tile(N, (512, 256, 128))
    grid = (M // tm, N // tn, K // tk)
    return pl.pallas_call(
        functools.partial(_matmul_bias_act_kernel, relu=relu),
        out_shape=jax.ShapeDtypeStruct((M, N), jnp.float32),
        grid_spec=pltpu.PrefetchScalarGridSpec(
            num_scalar_prefetch=0,
            grid=grid,
            in_specs=[
                pl.BlockSpec((tm, tk), lambda i, j, k: (i, k)),
                pl.BlockSpec((tk, tn), lambda i, j, k: (k, j)),
                pl.BlockSpec((1, tn), lambda i, j, k: (0, j)),
            ],
            out_specs=pl.BlockSpec((tm, tn), lambda i, j, k: (i, j)),
            scratch_shapes=[pltpu.VMEM((tm, tn), jnp.float32)],
        ),
        compiler_params=pltpu.CompilerParams(
            dimension_semantics=("parallel", "parallel", "arbitrary"),
            vmem_limit_bytes=VMEM_LIMIT),
    )(x, w, b.reshape(1, N))


# ----------------------------------------------------------------------------
# Parameter init (deterministic, mirrors the PyTorch module's init scheme)
# ----------------------------------------------------------------------------
def _uniform(key, shape, bound):
    return jax.random.uniform(key, shape, jnp.float32, -bound, bound)


def init_alexnet_params(key, channels, kernel_sizes, in_channels, num_classes,
                        use_lrn, mid_channels=4096):
    params = {"convs": [], "fcs": []}
    cin_real = in_channels
    cin_pad = _round_up(in_channels, 8)               # contraction-dim alignment
    for i, stage in enumerate(channels):
        lrn_i = use_lrn and i in (0, 1)
        for j, cout_real in enumerate(stage):
            k = kernel_sizes[i][j]
            key, wk = jax.random.split(key)
            fan_in = cin_real * k * k
            bound = math.sqrt(6.0 / fan_in)           # init.kaiming_uniform_ (a=0)
            w_real = _uniform(wk, (k, k, cin_real, cout_real), bound)
            # lane-dense Cout; LRN layers get >=2 extra zero channels (mask-free roll)
            cout_pad = _round_up(cout_real + (2 if lrn_i else 0), LANES)
            w = jnp.zeros((k, k, cin_pad, cout_pad), jnp.float32)
            w = w.at[:, :, :cin_real, :cout_real].set(w_real)
            b = jnp.zeros((cout_pad,), jnp.float32)   # init.constant_(bias, 0)
            params["convs"].append({"w": w, "b": b})
            cin_real, cin_pad = cout_real, cout_pad
    dims = [cin_real * 6 * 6, mid_channels, mid_channels, num_classes]
    for d_in, d_out in zip(dims[:-1], dims[1:]):
        key, wk, bk = jax.random.split(key, 3)
        wb = math.sqrt(1.0 / d_in)                    # PyTorch nn.Linear default
        w = _uniform(wk, (d_in, d_out), wb).astype(jnp.bfloat16)  # bf16 streaming
        b = _uniform(bk, (d_out,), wb)
        params["fcs"].append({"w": w, "b": b})
    return params


# ----------------------------------------------------------------------------
# Full forward pass
# ----------------------------------------------------------------------------
def alexnet_forward(params, x_nchw, *, channels, kernel_sizes, strides, paddings,
                    use_lrn, in_channels):
    del kernel_sizes  # conv geometry comes from the (padded) weight shapes
    n = x_nchw.shape[0]
    x = jnp.transpose(x_nchw, (0, 2, 3, 1))           # NCHW -> NHWC
    cin_pad0 = _round_up(in_channels, 8)
    if cin_pad0 > in_channels:
        x = jnp.pad(x, ((0, 0), (0, 0), (0, 0), (0, cin_pad0 - in_channels)))
    ci = 0
    c_real = in_channels
    for i, stage in enumerate(channels):
        lrn_i = use_lrn and i in (0, 1)
        for j, cout in enumerate(stage):
            p = params["convs"][ci]
            ci += 1
            x = conv2d_relu_lrn(x, p["w"], p["b"], stride=strides[i][j],
                                padding=paddings[i][j], use_lrn=lrn_i)
            c_real = cout
        x = maxpool2d_k3s2_ceil(x)                    # pool{i+1}
    # drop the zero channel padding, then flatten exactly like torch's
    # x.view(N, -1) on an NCHW tensor (C, H, W order)
    x = x[..., :c_real]
    x = jnp.transpose(x, (0, 3, 1, 2)).reshape(n, -1)
    # AlexOutputBlock: AlexDense -> AlexDense -> Linear
    # TODO(synk): nn.Dropout(p=0.5) is an eval-mode identity here (no RNG masking).
    p = params["fcs"][0]
    x = matmul_bias_act(x, p["w"], p["b"], relu=True)
    p = params["fcs"][1]
    x = matmul_bias_act(x, p["w"], p["b"], relu=True)
    p = params["fcs"][2]
    x = matmul_bias_act(x, p["w"], p["b"], relu=False)
    return x


if __name__ == "__main__":
    # Small AlexNet config (same structure: 3 stages, LRN on stages 1&2,
    # MaxPool(3,2,ceil) after each stage, 6x6 final feature map, FC head 4096).
    channels = [[8], [16], [16, 16, 16]]
    kernel_sizes = [[3], [3], [3, 3, 3]]
    strides = [[1], [1], [1, 1, 1]]
    paddings = [[1], [1], [1, 1, 1]]
    use_lrn = True
    in_channels = 3
    in_size = (54, 54)    # -> 54 -> 27 -> 13 -> 6 spatial, matching the hard-coded *6*6
    num_classes = 10
    batch = 2

    key = jax.random.PRNGKey(0)
    pkey, xkey = jax.random.split(key)
    params = init_alexnet_params(pkey, channels, kernel_sizes, in_channels,
                                 num_classes, use_lrn)
    x = jax.random.normal(xkey, (batch, in_channels, *in_size), jnp.float32)

    fwd = jax.jit(functools.partial(
        alexnet_forward, channels=channels, kernel_sizes=kernel_sizes,
        strides=strides, paddings=paddings, use_lrn=use_lrn,
        in_channels=in_channels))
    out = fwd(params, x)
    jax.block_until_ready(out)
    assert out.shape == (batch, num_classes)
    assert bool(jnp.all(jnp.isfinite(out)))
    print("KERNEL_OK")
</pallas_src>

<mosaic_0001>
module attributes {stable_mosaic.version = 11 : i64} {
  func.func @_conv_row_kernel(%arg0: i32, %arg1: i32, %arg2: i32, %arg3: i32, %arg4: memref<1x1x56x8xf32, #tpu.memory_space<vmem>>, %arg5: memref<1x3x8x128xf32, #tpu.memory_space<vmem>>, %arg6: memref<1x128xf32, #tpu.memory_space<vmem>>, %arg7: memref<1x1x54x128xf32, #tpu.memory_space<vmem>>, %arg8: memref<54x128xf32, #tpu.memory_space<vmem>>) attributes {dimension_semantics = [#tpu.dimension_semantics<parallel>, #tpu.dimension_semantics<parallel>, #tpu.dimension_semantics<parallel>, #tpu.dimension_semantics<arbitrary>], iteration_bounds = array<i64: 2, 54, 1, 3>, scalar_prefetch = 0 : i64, scratch_operands = 1 : i64, tpu.core_type = #tpu.core_type<tc>, window_params = [{transform_indices = @transform_0, window_bounds = array<i64: 1, 1, 56, 8>}, {transform_indices = @transform_1, window_bounds = array<i64: 1, 3, 8, 128>}, {transform_indices = @transform_2, window_bounds = array<i64: 1, 128>}, {transform_indices = @transform_3, window_bounds = array<i64: 1, 1, 54, 128>}]} {
    %c0_i32 = arith.constant 0 : i32
    %0 = arith.cmpi eq, %arg3, %c0_i32 : i32
    %1 = arith.extui %0 : i1 to i32
    %c0_i32_0 = arith.constant 0 : i32
    %2 = arith.cmpi ne, %1, %c0_i32_0 : i32
    scf.if %2 {
      %cst_29 = arith.constant 0.000000e+00 : f32
      %26 = vector.broadcast %cst_29 : f32 to vector<54x128xf32>
      %c0_30 = arith.constant 0 : index
      %c0_31 = arith.constant 0 : index
      %27 = vector.load %arg8[%c0_30, %c0_31] : memref<54x128xf32, #tpu.memory_space<vmem>>, vector<54x128xf32>
      tpu.vector_store %arg8[%c0_30, %c0_31], %26 {strides = array<i32>} : memref<54x128xf32, #tpu.memory_space<vmem>>, vector<54x128xf32>,
    } else {
    }
    %c0 = arith.constant 0 : index
    %c0_1 = arith.constant 0 : index
    %3 = vector.load %arg8[%c0, %c0_1] : memref<54x128xf32, #tpu.memory_space<vmem>>, vector<54x128xf32>
    %c0_2 = arith.constant 0 : index
    %c0_3 = arith.constant 0 : index
    %c0_4 = arith.constant 0 : index
    %c0_5 = arith.constant 0 : index
    %4 = vector.load %arg4[%c0_2, %c0_3, %c0_4, %c0_5] : memref<1x1x56x8xf32, #tpu.memory_space<vmem>>, vector<1x1x54x8xf32>
    %5 = vector.shape_cast %4 : vector<1x1x54x8xf32> to vector<54x8xf32>
    %c0_6 = arith.constant 0 : index
    %c0_7 = arith.constant 0 : index
    %c0_8 = arith.constant 0 : index
    %c0_9 = arith.constant 0 : index
    %6 = vector.load %arg5[%c0_6, %c0_7, %c0_8, %c0_9] : memref<1x3x8x128xf32, #tpu.memory_space<vmem>>, vector<1x1x8x128xf32>
    %7 = vector.shape_cast %6 : vector<1x1x8x128xf32> to vector<8x128xf32>
    %cst = arith.constant dense<0.000000e+00> : vector<54x128xf32>
    %8 = tpu.matmul %5, %7, %cst {dimension_numbers = #tpu.dot_dimension_numbers<[1], [0], [0], [1], [0, 0, 1, 1], [], []>} : vector<54x8xf32>, vector<8x128xf32>, vector<54x128xf32> -> vector<54x128xf32>
    %9 = arith.addf %3, %8 : vector<54x128xf32>
    %c0_10 = arith.constant 0 : index
    %c0_11 = arith.constant 0 : index
    %c1 = arith.constant 1 : index
    %c0_12 = arith.constant 0 : index
    %10 = vector.load %arg4[%c0_10, %c0_11, %c1, %c0_12] : memref<1x1x56x8xf32, #tpu.memory_space<vmem>>, vector<1x1x54x8xf32>
    %11 = vector.shape_cast %10 : vector<1x1x54x8xf32> to vector<54x8xf32>
    %c0_13 = arith.constant 0 : index
    %c1_14 = arith.constant 1 : index
    %c0_15 = arith.constant 0 : index
    %c0_16 = arith.constant 0 : index
    %12 = vector.load %arg5[%c0_13, %c1_14, %c0_15, %c0_16] : memref<1x3x8x128xf32, #tpu.memory_space<vmem>>, vector<1x1x8x128xf32>
    %13 = vector.shape_cast %12 : vector<1x1x8x128xf32> to vector<8x128xf32>
    %cst_17 = arith.constant dense<0.000000e+00> : vector<54x128xf32>
    %14 = tpu.matmul %11, %13, %cst_17 {dimension_numbers = #tpu.dot_dimension_numbers<[1], [0], [0], [1], [0, 0, 1, 1], [], []>} : vector<54x8xf32>, vector<8x128xf32>, vector<54x128xf32> -> vector<54x128xf32>
    %15 = arith.addf %9, %14 : vector<54x128xf32>
    %c0_18 = arith.constant 0 : index
    %c0_19 = arith.constant 0 : index
    %c2 = arith.constant 2 : index
    %c0_20 = arith.constant 0 : index
    %16 = vector.load %arg4[%c0_18, %c0_19, %c2, %c0_20] : memref<1x1x56x8xf32, #tpu.memory_space<vmem>>, vector<1x1x54x8xf32>
    %17 = vector.shape_cast %16 : vector<1x1x54x8xf32> to vector<54x8xf32>
    %c0_21 = arith.constant 0 : index
    %c2_22 = arith.constant 2 : index
    %c0_23 = arith.constant 0 : index
    %c0_24 = arith.constant 0 : index
    %18 = vector.load %arg5[%c0_21, %c2_22, %c0_23, %c0_24] : memref<1x3x8x128xf32, #tpu.memory_space<vmem>>, vector<1x1x8x128xf32>
    %19 = vector.shape_cast %18 : vector<1x1x8x128xf32> to vector<8x128xf32>
    %cst_25 = arith.constant dense<0.000000e+00> : vector<54x128xf32>
    %20 = tpu.matmul %17, %19, %cst_25 {dimension_numbers = #tpu.dot_dimension_numbers<[1], [0], [0], [1], [0, 0, 1, 1], [], []>} : vector<54x8xf32>, vector<8x128xf32>, vector<54x128xf32> -> vector<54x128xf32>
    %21 = arith.addf %15, %20 : vector<54x128xf32>
    %c0_26 = arith.constant 0 : index
    %c0_27 = arith.constant 0 : index
    %22 = vector.load %arg8[%c0_26, %c0_27] : memref<54x128xf32, #tpu.memory_space<vmem>>, vector<54x128xf32>
    tpu.vector_store %arg8[%c0_26, %c0_27], %21 {strides = array<i32>} : memref<54x128xf32, #tpu.memory_space<vmem>>, vector<54x128xf32>,
    %c2_i32 = arith.constant 2 : i32
    %23 = arith.cmpi eq, %arg3, %c2_i32 : i32
    %24 = arith.extui %23 : i1 to i32
    %c0_i32_28 = arith.constant 0 : i32
    %25 = arith.cmpi ne, %24, %c0_i32_28 : i32
    scf.if %25 {
      %c0_29 = arith.constant 0 : index
      %c0_30 = arith.constant 0 : index
      %26 = vector.load %arg8[%c0_29, %c0_30] : memref<54x128xf32, #tpu.memory_space<vmem>>, vector<54x128xf32>
      %c0_31 = arith.constant 0 : index
      %c0_32 = arith.constant 0 : index
      %27 = vector.load %arg6[%c0_31, %c0_32] : memref<1x128xf32, #tpu.memory_space<vmem>>, vector<1x128xf32>
      %28 = vector.broadcast %27 : vector<1x128xf32> to vector<54x128xf32>
      %29 = arith.addf %26, %28 : vector<54x128xf32>
      %cst_33 = arith.constant 0.000000e+00 : f32
      %30 = vector.broadcast %cst_33 : f32 to vector<54x128xf32>
      %31 = arith.maximumf %29, %30 : vector<54x128xf32>
      %32 = arith.mulf %31, %31 : vector<54x128xf32>
      %c1_i32 = arith.constant 1 : i32
      %33 = tpu.dynamic_rotate %32 by %c1_i32 dim 1 : vector<54x128xf32>, i32 -> vector<54x128xf32>
      %34 = arith.addf %32, %33 : vector<54x128xf32>
      %c127_i32 = arith.constant 127 : i32
      %35 = tpu.dynamic_rotate %32 by %c127_i32 dim 1 : vector<54x128xf32>, i32 -> vector<54x128xf32>
      %36 = arith.addf %34, %35 : vector<54x128xf32>
      %c2_i32_34 = arith.constant 2 : i32
      %37 = tpu.dynamic_rotate %32 by %c2_i32_34 dim 1 : vector<54x128xf32>, i32 -> vector<54x128xf32>
      %38 = arith.addf %36, %37 : vector<54x128xf32>
      %c126_i32 = arith.constant 126 : i32
      %39 = tpu.dynamic_rotate %32 by %c126_i32 dim 1 : vector<54x128xf32>, i32 -> vector<54x128xf32>
      %40 = arith.addf %38, %39 : vector<54x128xf32>
      %cst_35 = arith.constant 2.000000e-05 : f32
      %41 = vector.broadcast %cst_35 : f32 to vector<54x128xf32>
      %42 = arith.mulf %41, %40 : vector<54x128xf32>
      %cst_36 = arith.constant 2.000000e+00 : f32
      %43 = vector.broadcast %cst_36 : f32 to vector<54x128xf32>
      %44 = arith.addf %43, %42 : vector<54x128xf32>
      %45 = math.log %44 : vector<54x128xf32>
      %cst_37 = arith.constant -7.500000e-01 : f32
      %46 = vector.broadcast %cst_37 : f32 to vector<54x128xf32>
      %47 = arith.mulf %46, %45 : vector<54x128xf32>
      %48 = math.exp %47 : vector<54x128xf32>
      %49 = arith.mulf %31, %48 : vector<54x128xf32>
      %c0_38 = arith.constant 0 : index
      %c0_39 = arith.constant 0 : index
      %c0_40 = arith.constant 0 : index
      %c0_41 = arith.constant 0 : index
      %50 = vector.load %arg7[%c0_38, %c0_39, %c0_40, %c0_41] : memref<1x1x54x128xf32, #tpu.memory_space<vmem>>, vector<1x1x54x128xf32>
      %51 = vector.shape_cast %50 : vector<1x1x54x128xf32> to vector<54x128xf32>
      %52 = vector.shape_cast %49 : vector<54x128xf32> to vector<1x1x54x128xf32>
      tpu.vector_store %arg7[%c0_38, %c0_39, %c0_40, %c0_41], %52 {strides = array<i32>} : memref<1x1x54x128xf32, #tpu.memory_space<vmem>>, vector<1x1x54x128xf32>,
    } else {
    }
    return
  }
  func.func @transform_0(%arg0: i32, %arg1: i32, %arg2: i32, %arg3: i32) -> (i32, i32, i32, i32) {
    %c1_i32 = arith.constant 1 : i32
    %0 = arith.muli %arg1, %c1_i32 : i32
    %1 = arith.addi %0, %arg3 : i32
    %c0_i32 = arith.constant 0 : i32
    %c0_i32_0 = arith.constant 0 : i32
    %c0_i32_1 = arith.constant 0 : i32
    return %arg0, %1, %c0_i32, %c0_i32_0 : i32, i32, i32, i32
  }
  func.func @transform_1(%arg0: i32, %arg1: i32, %arg2: i32, %arg3: i32) -> (i32, i32, i32, i32) {
    %c0_i32 = arith.constant 0 : i32
    %c0_i32_0 = arith.constant 0 : i32
    %c0_i32_1 = arith.constant 0 : i32
    return %arg3, %c0_i32, %c0_i32_0, %arg2 : i32, i32, i32, i32
  }
  func.func @transform_2(%arg0: i32, %arg1: i32, %arg2: i32, %arg3: i32) -> (i32, i32) {
    %c0_i32 = arith.constant 0 : i32
    %c0_i32_0 = arith.constant 0 : i32
    return %c0_i32, %arg2 : i32, i32
  }
  func.func @transform_3(%arg0: i32, %arg1: i32, %arg2: i32, %arg3: i32) -> (i32, i32, i32, i32) {
    %c0_i32 = arith.constant 0 : i32
    %c0_i32_0 = arith.constant 0 : i32
    return %arg0, %arg1, %c0_i32, %arg2 : i32, i32, i32, i32
  }
}

module attributes {stable_mosaic.version = 11 : i64} {
  func.func @_maxpool_row_kernel(%arg0: i32, %arg1: i32, %arg2: i32, %arg3: memref<1x1x55x128xf32, #tpu.memory_space<vmem>>, %arg4: memref<1x1x27x128xf32, #tpu.memory_space<vmem>>, %arg5: memref<27x128xf32, #tpu.memory_space<vmem>>) attributes {dimension_semantics = [#tpu.dimension_semantics<parallel>, #tpu.dimension_semantics<parallel>, #tpu.dimension_semantics<arbitrary>], iteration_bounds = array<i64: 2, 27, 3>, scalar_prefetch = 0 : i64, scratch_operands = 1 : i64, tpu.core_type = #tpu.core_type<tc>, window_params = [{transform_indices = @transform_0, window_bounds = array<i64: 1, 1, 55, 128>}, {transform_indices = @transform_1, window_bounds = array<i64: 1, 1, 27, 128>}]} {
    %c0_i32 = arith.constant 0 : i32
    %0 = arith.cmpi eq, %arg2, %c0_i32 : i32
    %1 = arith.extui %0 : i1 to i32
    %c0_i32_0 = arith.constant 0 : i32
    %2 = arith.cmpi ne, %1, %c0_i32_0 : i32
    scf.if %2 {
      %cst = arith.constant 0xFF800000 : f32
      %17 = vector.broadcast %cst : f32 to vector<27x128xf32>
      %c0_15 = arith.constant 0 : index
      %c0_16 = arith.constant 0 : index
      %18 = vector.load %arg5[%c0_15, %c0_16] : memref<27x128xf32, #tpu.memory_space<vmem>>, vector<27x128xf32>
      tpu.vector_store %arg5[%c0_15, %c0_16], %17 {strides = array<i32>} : memref<27x128xf32, #tpu.memory_space<vmem>>, vector<27x128xf32>,
    } else {
    }
    %c0 = arith.constant 0 : index
    %c0_1 = arith.constant 0 : index
    %c0_2 = arith.constant 0 : index
    %c0_3 = arith.constant 0 : index
    %3 = tpu.strided_load %arg3[%c0, %c0_1, %c0_2, %c0_3] {strides = array<i32: 1, 1, 2, 1>} : memref<1x1x55x128xf32, #tpu.memory_space<vmem>>, vector<1x1x27x128xf32>
    %4 = vector.shape_cast %3 : vector<1x1x27x128xf32> to vector<27x128xf32>
    %c0_4 = arith.constant 0 : index
    %c0_5 = arith.constant 0 : index
    %c1 = arith.constant 1 : index
    %c0_6 = arith.constant 0 : index
    %5 = tpu.strided_load %arg3[%c0_4, %c0_5, %c1, %c0_6] {strides = array<i32: 1, 1, 2, 1>} : memref<1x1x55x128xf32, #tpu.memory_space<vmem>>, vector<1x1x27x128xf32>
    %6 = vector.shape_cast %5 : vector<1x1x27x128xf32> to vector<27x128xf32>
    %7 = arith.maximumf %4, %6 : vector<27x128xf32>
    %c0_7 = arith.constant 0 : index
    %c0_8 = arith.constant 0 : index
    %c2 = arith.constant 2 : index
    %c0_9 = arith.constant 0 : index
    %8 = tpu.strided_load %arg3[%c0_7, %c0_8, %c2, %c0_9] {strides = array<i32: 1, 1, 2, 1>} : memref<1x1x55x128xf32, #tpu.memory_space<vmem>>, vector<1x1x27x128xf32>
    %9 = vector.shape_cast %8 : vector<1x1x27x128xf32> to vector<27x128xf32>
    %10 = arith.maximumf %7, %9 : vector<27x128xf32>
    %c0_10 = arith.constant 0 : index
    %c0_11 = arith.constant 0 : index
    %11 = vector.load %arg5[%c0_10, %c0_11] : memref<27x128xf32, #tpu.memory_space<vmem>>, vector<27x128xf32>
    %12 = arith.maximumf %11, %10 : vector<27x128xf32>
    %c0_12 = arith.constant 0 : index
    %c0_13 = arith.constant 0 : index
    %13 = vector.load %arg5[%c0_12, %c0_13] : memref<27x128xf32, #tpu.memory_space<vmem>>, vector<27x128xf32>
    tpu.vector_store %arg5[%c0_12, %c0_13], %12 {strides = array<i32>} : memref<27x128xf32, #tpu.memory_space<vmem>>, vector<27x128xf32>,
    %c2_i32 = arith.constant 2 : i32
    %14 = arith.cmpi eq, %arg2, %c2_i32 : i32
    %15 = arith.extui %14 : i1 to i32
    %c0_i32_14 = arith.constant 0 : i32
    %16 = arith.cmpi ne, %15, %c0_i32_14 : i32
    scf.if %16 {
      %c0_15 = arith.constant 0 : index
      %c0_16 = arith.constant 0 : index
      %17 = vector.load %arg5[%c0_15, %c0_16] : memref<27x128xf32, #tpu.memory_space<vmem>>, vector<27x128xf32>
      %c0_17 = arith.constant 0 : index
      %c0_18 = arith.constant 0 : index
      %c0_19 = arith.constant 0 : index
      %c0_20 = arith.constant 0 : index
      %18 = vector.load %arg4[%c0_17, %c0_18, %c0_19, %c0_20] : memref<1x1x27x128xf32, #tpu.memory_space<vmem>>, vector<1x1x27x128xf32>
      %19 = vector.shape_cast %18 : vector<1x1x27x128xf32> to vector<27x128xf32>
      %20 = vector.shape_cast %17 : vector<27x128xf32> to vector<1x1x27x128xf32>
      tpu.vector_store %arg4[%c0_17, %c0_18, %c0_19, %c0_20], %20 {strides = array<i32>} : memref<1x1x27x128xf32, #tpu.memory_space<vmem>>, vector<1x1x27x128xf32>,
    } else {
    }
    return
  }
  func.func @transform_0(%arg0: i32, %arg1: i32, %arg2: i32) -> (i32, i32, i32, i32) {
    %c2_i32 = arith.constant 2 : i32
    %0 = arith.muli %c2_i32, %arg1 : i32
    %1 = arith.addi %0, %arg2 : i32
    %c0_i32 = arith.constant 0 : i32
    %c0_i32_0 = arith.constant 0 : i32
    %c0_i32_1 = arith.constant 0 : i32
    return %arg0, %1, %c0_i32, %c0_i32_0 : i32, i32, i32, i32
  }
  func.func @transform_1(%arg0: i32, %arg1: i32, %arg2: i32) -> (i32, i32, i32, i32) {
    %c0_i32 = arith.constant 0 : i32
    %c0_i32_0 = arith.constant 0 : i32
    %c0_i32_1 = arith.constant 0 : i32
    return %arg0, %arg1, %c0_i32, %c0_i32_0 : i32, i32, i32, i32
  }
}

module attributes {stable_mosaic.version = 11 : i64} {
  func.func @_conv_row_kernel(%arg0: i32, %arg1: i32, %arg2: i32, %arg3: i32, %arg4: memref<1x1x29x128xf32, #tpu.memory_space<vmem>>, %arg5: memref<1x3x128x128xf32, #tpu.memory_space<vmem>>, %arg6: memref<1x128xf32, #tpu.memory_space<vmem>>, %arg7: memref<1x1x27x128xf32, #tpu.memory_space<vmem>>, %arg8: memref<27x128xf32, #tpu.memory_space<vmem>>) attributes {dimension_semantics = [#tpu.dimension_semantics<parallel>, #tpu.dimension_semantics<parallel>, #tpu.dimension_semantics<parallel>, #tpu.dimension_semantics<arbitrary>], iteration_bounds = array<i64: 2, 27, 1, 3>, scalar_prefetch = 0 : i64, scratch_operands = 1 : i64, tpu.core_type = #tpu.core_type<tc>, window_params = [{transform_indices = @transform_0, window_bounds = array<i64: 1, 1, 29, 128>}, {transform_indices = @transform_1, window_bounds = array<i64: 1, 3, 128, 128>}, {transform_indices = @transform_2, window_bounds = array<i64: 1, 128>}, {transform_indices = @transform_3, window_bounds = array<i64: 1, 1, 27, 128>}]} {
    %c0_i32 = arith.constant 0 : i32
    %0 = arith.cmpi eq, %arg3, %c0_i32 : i32
    %1 = arith.extui %0 : i1 to i32
    %c0_i32_0 = arith.constant 0 : i32
    %2 = arith.cmpi ne, %1, %c0_i32_0 : i32
    scf.if %2 {
      %cst_29 = arith.constant 0.000000e+00 : f32
      %26 = vector.broadcast %cst_29 : f32 to vector<27x128xf32>
      %c0_30 = arith.constant 0 : index
      %c0_31 = arith.constant 0 : index
      %27 = vector.load %arg8[%c0_30, %c0_31] : memref<27x128xf32, #tpu.memory_space<vmem>>, vector<27x128xf32>
      tpu.vector_store %arg8[%c0_30, %c0_31], %26 {strides = array<i32>} : memref<27x128xf32, #tpu.memory_space<vmem>>, vector<27x128xf32>,
    } else {
    }
    %c0 = arith.constant 0 : index
    %c0_1 = arith.constant 0 : index
    %3 = vector.load %arg8[%c0, %c0_1] : memref<27x128xf32, #tpu.memory_space<vmem>>, vector<27x128xf32>
    %c0_2 = arith.constant 0 : index
    %c0_3 = arith.constant 0 : index
    %c0_4 = arith.constant 0 : index
    %c0_5 = arith.constant 0 : index
    %4 = vector.load %arg4[%c0_2, %c0_3, %c0_4, %c0_5] : memref<1x1x29x128xf32, #tpu.memory_space<vmem>>, vector<1x1x27x128xf32>
    %5 = vector.shape_cast %4 : vector<1x1x27x128xf32> to vector<27x128xf32>
    %c0_6 = arith.constant 0 : index
    %c0_7 = arith.constant 0 : index
    %c0_8 = arith.constant 0 : index
    %c0_9 = arith.constant 0 : index
    %6 = vector.load %arg5[%c0_6, %c0_7, %c0_8, %c0_9] : memref<1x3x128x128xf32, #tpu.memory_space<vmem>>, vector<1x1x128x128xf32>
    %7 = vector.shape_cast %6 : vector<1x1x128x128xf32> to vector<128x128xf32>
    %cst = arith.constant dense<0.000000e+00> : vector<27x128xf32>
    %8 = tpu.matmul %5, %7, %cst {dimension_numbers = #tpu.dot_dimension_numbers<[1], [0], [0], [1], [0, 0, 1, 1], [], []>} : vector<27x128xf32>, vector<128x128xf32>, vector<27x128xf32> -> vector<27x128xf32>
    %9 = arith.addf %3, %8 : vector<27x128xf32>
    %c0_10 = arith.constant 0 : index
    %c0_11 = arith.constant 0 : index
    %c1 = arith.constant 1 : index
    %c0_12 = arith.constant 0 : index
    %10 = vector.load %arg4[%c0_10, %c0_11, %c1, %c0_12] : memref<1x1x29x128xf32, #tpu.memory_space<vmem>>, vector<1x1x27x128xf32>
    %11 = vector.shape_cast %10 : vector<1x1x27x128xf32> to vector<27x128xf32>
    %c0_13 = arith.constant 0 : index
    %c1_14 = arith.constant 1 : index
    %c0_15 = arith.constant 0 : index
    %c0_16 = arith.constant 0 : index
    %12 = vector.load %arg5[%c0_13, %c1_14, %c0_15, %c0_16] : memref<1x3x128x128xf32, #tpu.memory_space<vmem>>, vector<1x1x128x128xf32>
    %13 = vector.shape_cast %12 : vector<1x1x128x128xf32> to vector<128x128xf32>
    %cst_17 = arith.constant dense<0.000000e+00> : vector<27x128xf32>
    %14 = tpu.matmul %11, %13, %cst_17 {dimension_numbers = #tpu.dot_dimension_numbers<[1], [0], [0], [1], [0, 0, 1, 1], [], []>} : vector<27x128xf32>, vector<128x128xf32>, vector<27x128xf32> -> vector<27x128xf32>
    %15 = arith.addf %9, %14 : vector<27x128xf32>
    %c0_18 = arith.constant 0 : index
    %c0_19 = arith.constant 0 : index
    %c2 = arith.constant 2 : index
    %c0_20 = arith.constant 0 : index
    %16 = vector.load %arg4[%c0_18, %c0_19, %c2, %c0_20] : memref<1x1x29x128xf32, #tpu.memory_space<vmem>>, vector<1x1x27x128xf32>
    %17 = vector.shape_cast %16 : vector<1x1x27x128xf32> to vector<27x128xf32>
    %c0_21 = arith.constant 0 : index
    %c2_22 = arith.constant 2 : index
    %c0_23 = arith.constant 0 : index
    %c0_24 = arith.constant 0 : index
    %18 = vector.load %arg5[%c0_21, %c2_22, %c0_23, %c0_24] : memref<1x3x128x128xf32, #tpu.memory_space<vmem>>, vector<1x1x128x128xf32>
    %19 = vector.shape_cast %18 : vector<1x1x128x128xf32> to vector<128x128xf32>
    %cst_25 = arith.constant dense<0.000000e+00> : vector<27x128xf32>
    %20 = tpu.matmul %17, %19, %cst_25 {dimension_numbers = #tpu.dot_dimension_numbers<[1], [0], [0], [1], [0, 0, 1, 1], [], []>} : vector<27x128xf32>, vector<128x128xf32>, vector<27x128xf32> -> vector<27x128xf32>
    %21 = arith.addf %15, %20 : vector<27x128xf32>
    %c0_26 = arith.constant 0 : index
    %c0_27 = arith.constant 0 : index
    %22 = vector.load %arg8[%c0_26, %c0_27] : memref<27x128xf32, #tpu.memory_space<vmem>>, vector<27x128xf32>
    tpu.vector_store %arg8[%c0_26, %c0_27], %21 {strides = array<i32>} : memref<27x128xf32, #tpu.memory_space<vmem>>, vector<27x128xf32>,
    %c2_i32 = arith.constant 2 : i32
    %23 = arith.cmpi eq, %arg3, %c2_i32 : i32
    %24 = arith.extui %23 : i1 to i32
    %c0_i32_28 = arith.constant 0 : i32
    %25 = arith.cmpi ne, %24, %c0_i32_28 : i32
    scf.if %25 {
      %c0_29 = arith.constant 0 : index
      %c0_30 = arith.constant 0 : index
      %26 = vector.load %arg8[%c0_29, %c0_30] : memref<27x128xf32, #tpu.memory_space<vmem>>, vector<27x128xf32>
      %c0_31 = arith.constant 0 : index
      %c0_32 = arith.constant 0 : index
      %27 = vector.load %arg6[%c0_31, %c0_32] : memref<1x128xf32, #tpu.memory_space<vmem>>, vector<1x128xf32>
      %28 = vector.broadcast %27 : vector<1x128xf32> to vector<27x128xf32>
      %29 = arith.addf %26, %28 : vector<27x128xf32>
      %cst_33 = arith.constant 0.000000e+00 : f32
      %30 = vector.broadcast %cst_33 : f32 to vector<27x128xf32>
      %31 = arith.maximumf %29, %30 : vector<27x128xf32>
      %32 = arith.mulf %31, %31 : vector<27x128xf32>
      %c1_i32 = arith.constant 1 : i32
      %33 = tpu.dynamic_rotate %32 by %c1_i32 dim 1 : vector<27x128xf32>, i32 -> vector<27x128xf32>
      %34 = arith.addf %32, %33 : vector<27x128xf32>
      %c127_i32 = arith.constant 127 : i32
      %35 = tpu.dynamic_rotate %32 by %c127_i32 dim 1 : vector<27x128xf32>, i32 -> vector<27x128xf32>
      %36 = arith.addf %34, %35 : vector<27x128xf32>
      %c2_i32_34 = arith.constant 2 : i32
      %37 = tpu.dynamic_rotate %32 by %c2_i32_34 dim 1 : vector<27x128xf32>, i32 -> vector<27x128xf32>
      %38 = arith.addf %36, %37 : vector<27x128xf32>
      %c126_i32 = arith.constant 126 : i32
      %39 = tpu.dynamic_rotate %32 by %c126_i32 dim 1 : vector<27x128xf32>, i32 -> vector<27x128xf32>
      %40 = arith.addf %38, %39 : vector<27x128xf32>
      %cst_35 = arith.constant 2.000000e-05 : f32
      %41 = vector.broadcast %cst_35 : f32 to vector<27x128xf32>
      %42 = arith.mulf %41, %40 : vector<27x128xf32>
      %cst_36 = arith.constant 2.000000e+00 : f32
      %43 = vector.broadcast %cst_36 : f32 to vector<27x128xf32>
      %44 = arith.addf %43, %42 : vector<27x128xf32>
      %45 = math.log %44 : vector<27x128xf32>
      %cst_37 = arith.constant -7.500000e-01 : f32
      %46 = vector.broadcast %cst_37 : f32 to vector<27x128xf32>
      %47 = arith.mulf %46, %45 : vector<27x128xf32>
      %48 = math.exp %47 : vector<27x128xf32>
      %49 = arith.mulf %31, %48 : vector<27x128xf32>
      %c0_38 = arith.constant 0 : index
      %c0_39 = arith.constant 0 : index
      %c0_40 = arith.constant 0 : index
      %c0_41 = arith.constant 0 : index
      %50 = vector.load %arg7[%c0_38, %c0_39, %c0_40, %c0_41] : memref<1x1x27x128xf32, #tpu.memory_space<vmem>>, vector<1x1x27x128xf32>
      %51 = vector.shape_cast %50 : vector<1x1x27x128xf32> to vector<27x128xf32>
      %52 = vector.shape_cast %49 : vector<27x128xf32> to vector<1x1x27x128xf32>
      tpu.vector_store %arg7[%c0_38, %c0_39, %c0_40, %c0_41], %52 {strides = array<i32>} : memref<1x1x27x128xf32, #tpu.memory_space<vmem>>, vector<1x1x27x128xf32>,
    } else {
    }
    return
  }
  func.func @transform_0(%arg0: i32, %arg1: i32, %arg2: i32, %arg3: i32) -> (i32, i32, i32, i32) {
    %c1_i32 = arith.constant 1 : i32
    %0 = arith.muli %arg1, %c1_i32 : i32
    %1 = arith.addi %0, %arg3 : i32
    %c0_i32 = arith.constant 0 : i32
    %c0_i32_0 = arith.constant 0 : i32
    %c0_i32_1 = arith.constant 0 : i32
    return %arg0, %1, %c0_i32, %c0_i32_0 : i32, i32, i32, i32
  }
  func.func @transform_1(%arg0: i32, %arg1: i32, %arg2: i32, %arg3: i32) -> (i32, i32, i32, i32) {
    %c0_i32 = arith.constant 0 : i32
    %c0_i32_0 = arith.constant 0 : i32
    %c0_i32_1 = arith.constant 0 : i32
    return %arg3, %c0_i32, %c0_i32_0, %arg2 : i32, i32, i32, i32
  }
  func.func @transform_2(%arg0: i32, %arg1: i32, %arg2: i32, %arg3: i32) -> (i32, i32) {
    %c0_i32 = arith.constant 0 : i32
    %c0_i32_0 = arith.constant 0 : i32
    return %c0_i32, %arg2 : i32, i32
  }
  func.func @transform_3(%arg0: i32, %arg1: i32, %arg2: i32, %arg3: i32) -> (i32, i32, i32, i32) {
    %c0_i32 = arith.constant 0 : i32
    %c0_i32_0 = arith.constant 0 : i32
    return %arg0, %arg1, %c0_i32, %arg2 : i32, i32, i32, i32
  }
}

module attributes {stable_mosaic.version = 11 : i64} {
  func.func @_maxpool_row_kernel(%arg0: i32, %arg1: i32, %arg2: i32, %arg3: memref<1x1x27x128xf32, #tpu.memory_space<vmem>>, %arg4: memref<1x1x13x128xf32, #tpu.memory_space<vmem>>, %arg5: memref<13x128xf32, #tpu.memory_space<vmem>>) attributes {dimension_semantics = [#tpu.dimension_semantics<parallel>, #tpu.dimension_semantics<parallel>, #tpu.dimension_semantics<arbitrary>], iteration_bounds = array<i64: 2, 13, 3>, scalar_prefetch = 0 : i64, scratch_operands = 1 : i64, tpu.core_type = #tpu.core_type<tc>, window_params = [{transform_indices = @transform_0, window_bounds = array<i64: 1, 1, 27, 128>}, {transform_indices = @transform_1, window_bounds = array<i64: 1, 1, 13, 128>}]} {
    %c0_i32 = arith.constant 0 : i32
    %0 = arith.cmpi eq, %arg2, %c0_i32 : i32
    %1 = arith.extui %0 : i1 to i32
    %c0_i32_0 = arith.constant 0 : i32
    %2 = arith.cmpi ne, %1, %c0_i32_0 : i32
    scf.if %2 {
      %cst = arith.constant 0xFF800000 : f32
      %17 = vector.broadcast %cst : f32 to vector<13x128xf32>
      %c0_15 = arith.constant 0 : index
      %c0_16 = arith.constant 0 : index
      %18 = vector.load %arg5[%c0_15, %c0_16] : memref<13x128xf32, #tpu.memory_space<vmem>>, vector<13x128xf32>
      tpu.vector_store %arg5[%c0_15, %c0_16], %17 {strides = array<i32>} : memref<13x128xf32, #tpu.memory_space<vmem>>, vector<13x128xf32>,
    } else {
    }
    %c0 = arith.constant 0 : index
    %c0_1 = arith.constant 0 : index
    %c0_2 = arith.constant 0 : index
    %c0_3 = arith.constant 0 : index
    %3 = tpu.strided_load %arg3[%c0, %c0_1, %c0_2, %c0_3] {strides = array<i32: 1, 1, 2, 1>} : memref<1x1x27x128xf32, #tpu.memory_space<vmem>>, vector<1x1x13x128xf32>
    %4 = vector.shape_cast %3 : vector<1x1x13x128xf32> to vector<13x128xf32>
    %c0_4 = arith.constant 0 : index
    %c0_5 = arith.constant 0 : index
    %c1 = arith.constant 1 : index
    %c0_6 = arith.constant 0 : index
    %5 = tpu.strided_load %arg3[%c0_4, %c0_5, %c1, %c0_6] {strides = array<i32: 1, 1, 2, 1>} : memref<1x1x27x128xf32, #tpu.memory_space<vmem>>, vector<1x1x13x128xf32>
    %6 = vector.shape_cast %5 : vector<1x1x13x128xf32> to vector<13x128xf32>
    %7 = arith.maximumf %4, %6 : vector<13x128xf32>
    %c0_7 = arith.constant 0 : index
    %c0_8 = arith.constant 0 : index
    %c2 = arith.constant 2 : index
    %c0_9 = arith.constant 0 : index
    %8 = tpu.strided_load %arg3[%c0_7, %c0_8, %c2, %c0_9] {strides = array<i32: 1, 1, 2, 1>} : memref<1x1x27x128xf32, #tpu.memory_space<vmem>>, vector<1x1x13x128xf32>
    %9 = vector.shape_cast %8 : vector<1x1x13x128xf32> to vector<13x128xf32>
    %10 = arith.maximumf %7, %9 : vector<13x128xf32>
    %c0_10 = arith.constant 0 : index
    %c0_11 = arith.constant 0 : index
    %11 = vector.load %arg5[%c0_10, %c0_11] : memref<13x128xf32, #tpu.memory_space<vmem>>, vector<13x128xf32>
    %12 = arith.maximumf %11, %10 : vector<13x128xf32>
    %c0_12 = arith.constant 0 : index
    %c0_13 = arith.constant 0 : index
    %13 = vector.load %arg5[%c0_12, %c0_13] : memref<13x128xf32, #tpu.memory_space<vmem>>, vector<13x128xf32>
    tpu.vector_store %arg5[%c0_12, %c0_13], %12 {strides = array<i32>} : memref<13x128xf32, #tpu.memory_space<vmem>>, vector<13x128xf32>,
    %c2_i32 = arith.constant 2 : i32
    %14 = arith.cmpi eq, %arg2, %c2_i32 : i32
    %15 = arith.extui %14 : i1 to i32
    %c0_i32_14 = arith.constant 0 : i32
    %16 = arith.cmpi ne, %15, %c0_i32_14 : i32
    scf.if %16 {
      %c0_15 = arith.constant 0 : index
      %c0_16 = arith.constant 0 : index
      %17 = vector.load %arg5[%c0_15, %c0_16] : memref<13x128xf32, #tpu.memory_space<vmem>>, vector<13x128xf32>
      %c0_17 = arith.constant 0 : index
      %c0_18 = arith.constant 0 : index
      %c0_19 = arith.constant 0 : index
      %c0_20 = arith.constant 0 : index
      %18 = vector.load %arg4[%c0_17, %c0_18, %c0_19, %c0_20] : memref<1x1x13x128xf32, #tpu.memory_space<vmem>>, vector<1x1x13x128xf32>
      %19 = vector.shape_cast %18 : vector<1x1x13x128xf32> to vector<13x128xf32>
      %20 = vector.shape_cast %17 : vector<13x128xf32> to vector<1x1x13x128xf32>
      tpu.vector_store %arg4[%c0_17, %c0_18, %c0_19, %c0_20], %20 {strides = array<i32>} : memref<1x1x13x128xf32, #tpu.memory_space<vmem>>, vector<1x1x13x128xf32>,
    } else {
    }
    return
  }
  func.func @transform_0(%arg0: i32, %arg1: i32, %arg2: i32) -> (i32, i32, i32, i32) {
    %c2_i32 = arith.constant 2 : i32
    %0 = arith.muli %c2_i32, %arg1 : i32
    %1 = arith.addi %0, %arg2 : i32
    %c0_i32 = arith.constant 0 : i32
    %c0_i32_0 = arith.constant 0 : i32
    %c0_i32_1 = arith.constant 0 : i32
    return %arg0, %1, %c0_i32, %c0_i32_0 : i32, i32, i32, i32
  }
  func.func @transform_1(%arg0: i32, %arg1: i32, %arg2: i32) -> (i32, i32, i32, i32) {
    %c0_i32 = arith.constant 0 : i32
    %c0_i32_0 = arith.constant 0 : i32
    %c0_i32_1 = arith.constant 0 : i32
    return %arg0, %arg1, %c0_i32, %c0_i32_0 : i32, i32, i32, i32
  }
}

module attributes {stable_mosaic.version = 11 : i64} {
  func.func @_maxpool_row_kernel(%arg0: i32, %arg1: i32, %arg2: i32, %arg3: memref<1x1x13x128xf32, #tpu.memory_space<vmem>>, %arg4: memref<1x1x6x128xf32, #tpu.memory_space<vmem>>, %arg5: memref<6x128xf32, #tpu.memory_space<vmem>>) attributes {dimension_semantics = [#tpu.dimension_semantics<parallel>, #tpu.dimension_semantics<parallel>, #tpu.dimension_semantics<arbitrary>], iteration_bounds = array<i64: 2, 6, 3>, scalar_prefetch = 0 : i64, scratch_operands = 1 : i64, tpu.core_type = #tpu.core_type<tc>, window_params = [{transform_indices = @transform_0, window_bounds = array<i64: 1, 1, 13, 128>}, {transform_indices = @transform_1, window_bounds = array<i64: 1, 1, 6, 128>}]} {
    %c0_i32 = arith.constant 0 : i32
    %0 = arith.cmpi eq, %arg2, %c0_i32 : i32
    %1 = arith.extui %0 : i1 to i32
    %c0_i32_0 = arith.constant 0 : i32
    %2 = arith.cmpi ne, %1, %c0_i32_0 : i32
    scf.if %2 {
      %cst = arith.constant 0xFF800000 : f32
      %17 = vector.broadcast %cst : f32 to vector<6x128xf32>
      %c0_15 = arith.constant 0 : index
      %c0_16 = arith.constant 0 : index
      %18 = vector.load %arg5[%c0_15, %c0_16] : memref<6x128xf32, #tpu.memory_space<vmem>>, vector<6x128xf32>
      tpu.vector_store %arg5[%c0_15, %c0_16], %17 {strides = array<i32>} : memref<6x128xf32, #tpu.memory_space<vmem>>, vector<6x128xf32>,
    } else {
    }
    %c0 = arith.constant 0 : index
    %c0_1 = arith.constant 0 : index
    %c0_2 = arith.constant 0 : index
    %c0_3 = arith.constant 0 : index
    %3 = tpu.strided_load %arg3[%c0, %c0_1, %c0_2, %c0_3] {strides = array<i32: 1, 1, 2, 1>} : memref<1x1x13x128xf32, #tpu.memory_space<vmem>>, vector<1x1x6x128xf32>
    %4 = vector.shape_cast %3 : vector<1x1x6x128xf32> to vector<6x128xf32>
    %c0_4 = arith.constant 0 : index
    %c0_5 = arith.constant 0 : index
    %c1 = arith.constant 1 : index
    %c0_6 = arith.constant 0 : index
    %5 = tpu.strided_load %arg3[%c0_4, %c0_5, %c1, %c0_6] {strides = array<i32: 1, 1, 2, 1>} : memref<1x1x13x128xf32, #tpu.memory_space<vmem>>, vector<1x1x6x128xf32>
    %6 = vector.shape_cast %5 : vector<1x1x6x128xf32> to vector<6x128xf32>
    %7 = arith.maximumf %4, %6 : vector<6x128xf32>
    %c0_7 = arith.constant 0 : index
    %c0_8 = arith.constant 0 : index
    %c2 = arith.constant 2 : index
    %c0_9 = arith.constant 0 : index
    %8 = tpu.strided_load %arg3[%c0_7, %c0_8, %c2, %c0_9] {strides = array<i32: 1, 1, 2, 1>} : memref<1x1x13x128xf32, #tpu.memory_space<vmem>>, vector<1x1x6x128xf32>
    %9 = vector.shape_cast %8 : vector<1x1x6x128xf32> to vector<6x128xf32>
    %10 = arith.maximumf %7, %9 : vector<6x128xf32>
    %c0_10 = arith.constant 0 : index
    %c0_11 = arith.constant 0 : index
    %11 = vector.load %arg5[%c0_10, %c0_11] : memref<6x128xf32, #tpu.memory_space<vmem>>, vector<6x128xf32>
    %12 = arith.maximumf %11, %10 : vector<6x128xf32>
    %c0_12 = arith.constant 0 : index
    %c0_13 = arith.constant 0 : index
    %13 = vector.load %arg5[%c0_12, %c0_13] : memref<6x128xf32, #tpu.memory_space<vmem>>, vector<6x128xf32>
    tpu.vector_store %arg5[%c0_12, %c0_13], %12 {strides = array<i32>} : memref<6x128xf32, #tpu.memory_space<vmem>>, vector<6x128xf32>,
    %c2_i32 = arith.constant 2 : i32
    %14 = arith.cmpi eq, %arg2, %c2_i32 : i32
    %15 = arith.extui %14 : i1 to i32
    %c0_i32_14 = arith.constant 0 : i32
    %16 = arith.cmpi ne, %15, %c0_i32_14 : i32
    scf.if %16 {
      %c0_15 = arith.constant 0 : index
      %c0_16 = arith.constant 0 : index
      %17 = vector.load %arg5[%c0_15, %c0_16] : memref<6x128xf32, #tpu.memory_space<vmem>>, vector<6x128xf32>
      %c0_17 = arith.constant 0 : index
      %c0_18 = arith.constant 0 : index
      %c0_19 = arith.constant 0 : index
      %c0_20 = arith.constant 0 : index
      %18 = vector.load %arg4[%c0_17, %c0_18, %c0_19, %c0_20] : memref<1x1x6x128xf32, #tpu.memory_space<vmem>>, vector<1x1x6x128xf32>
      %19 = vector.shape_cast %18 : vector<1x1x6x128xf32> to vector<6x128xf32>
      %20 = vector.shape_cast %17 : vector<6x128xf32> to vector<1x1x6x128xf32>
      tpu.vector_store %arg4[%c0_17, %c0_18, %c0_19, %c0_20], %20 {strides = array<i32>} : memref<1x1x6x128xf32, #tpu.memory_space<vmem>>, vector<1x1x6x128xf32>,
    } else {
    }
    return
  }
  func.func @transform_0(%arg0: i32, %arg1: i32, %arg2: i32) -> (i32, i32, i32, i32) {
    %c2_i32 = arith.constant 2 : i32
    %0 = arith.muli %c2_i32, %arg1 : i32
    %1 = arith.addi %0, %arg2 : i32
    %c0_i32 = arith.constant 0 : i32
    %c0_i32_0 = arith.constant 0 : i32
    %c0_i32_1 = arith.constant 0 : i32
    return %arg0, %1, %c0_i32, %c0_i32_0 : i32, i32, i32, i32
  }
  func.func @transform_1(%arg0: i32, %arg1: i32, %arg2: i32) -> (i32, i32, i32, i32) {
    %c0_i32 = arith.constant 0 : i32
    %c0_i32_0 = arith.constant 0 : i32
    %c0_i32_1 = arith.constant 0 : i32
    return %arg0, %arg1, %c0_i32, %c0_i32_0 : i32, i32, i32, i32
  }
}

module attributes {stable_mosaic.version = 11 : i64} {
  func.func @_conv_row_kernel(%arg0: i32, %arg1: i32, %arg2: i32, %arg3: i32, %arg4: memref<1x1x15x128xf32, #tpu.memory_space<vmem>>, %arg5: memref<1x3x128x128xf32, #tpu.memory_space<vmem>>, %arg6: memref<1x128xf32, #tpu.memory_space<vmem>>, %arg7: memref<1x1x13x128xf32, #tpu.memory_space<vmem>>, %arg8: memref<13x128xf32, #tpu.memory_space<vmem>>) attributes {dimension_semantics = [#tpu.dimension_semantics<parallel>, #tpu.dimension_semantics<parallel>, #tpu.dimension_semantics<parallel>, #tpu.dimension_semantics<arbitrary>], iteration_bounds = array<i64: 2, 13, 1, 3>, scalar_prefetch = 0 : i64, scratch_operands = 1 : i64, tpu.core_type = #tpu.core_type<tc>, window_params = [{transform_indices = @transform_0, window_bounds = array<i64: 1, 1, 15, 128>}, {transform_indices = @transform_1, window_bounds = array<i64: 1, 3, 128, 128>}, {transform_indices = @transform_2, window_bounds = array<i64: 1, 128>}, {transform_indices = @transform_3, window_bounds = array<i64: 1, 1, 13, 128>}]} {
    %c0_i32 = arith.constant 0 : i32
    %0 = arith.cmpi eq, %arg3, %c0_i32 : i32
    %1 = arith.extui %0 : i1 to i32
    %c0_i32_0 = arith.constant 0 : i32
    %2 = arith.cmpi ne, %1, %c0_i32_0 : i32
    scf.if %2 {
      %cst_29 = arith.constant 0.000000e+00 : f32
      %26 = vector.broadcast %cst_29 : f32 to vector<13x128xf32>
      %c0_30 = arith.constant 0 : index
      %c0_31 = arith.constant 0 : index
      %27 = vector.load %arg8[%c0_30, %c0_31] : memref<13x128xf32, #tpu.memory_space<vmem>>, vector<13x128xf32>
      tpu.vector_store %arg8[%c0_30, %c0_31], %26 {strides = array<i32>} : memref<13x128xf32, #tpu.memory_space<vmem>>, vector<13x128xf32>,
    } else {
    }
    %c0 = arith.constant 0 : index
    %c0_1 = arith.constant 0 : index
    %3 = vector.load %arg8[%c0, %c0_1] : memref<13x128xf32, #tpu.memory_space<vmem>>, vector<13x128xf32>
    %c0_2 = arith.constant 0 : index
    %c0_3 = arith.constant 0 : index
    %c0_4 = arith.constant 0 : index
    %c0_5 = arith.constant 0 : index
    %4 = vector.load %arg4[%c0_2, %c0_3, %c0_4, %c0_5] : memref<1x1x15x128xf32, #tpu.memory_space<vmem>>, vector<1x1x13x128xf32>
    %5 = vector.shape_cast %4 : vector<1x1x13x128xf32> to vector<13x128xf32>
    %c0_6 = arith.constant 0 : index
    %c0_7 = arith.constant 0 : index
    %c0_8 = arith.constant 0 : index
    %c0_9 = arith.constant 0 : index
    %6 = vector.load %arg5[%c0_6, %c0_7, %c0_8, %c0_9] : memref<1x3x128x128xf32, #tpu.memory_space<vmem>>, vector<1x1x128x128xf32>
    %7 = vector.shape_cast %6 : vector<1x1x128x128xf32> to vector<128x128xf32>
    %cst = arith.constant dense<0.000000e+00> : vector<13x128xf32>
    %8 = tpu.matmul %5, %7, %cst {dimension_numbers = #tpu.dot_dimension_numbers<[1], [0], [0], [1], [0, 0, 1, 1], [], []>} : vector<13x128xf32>, vector<128x128xf32>, vector<13x128xf32> -> vector<13x128xf32>
    %9 = arith.addf %3, %8 : vector<13x128xf32>
    %c0_10 = arith.constant 0 : index
    %c0_11 = arith.constant 0 : index
    %c1 = arith.constant 1 : index
    %c0_12 = arith.constant 0 : index
    %10 = vector.load %arg4[%c0_10, %c0_11, %c1, %c0_12] : memref<1x1x15x128xf32, #tpu.memory_space<vmem>>, vector<1x1x13x128xf32>
    %11 = vector.shape_cast %10 : vector<1x1x13x128xf32> to vector<13x128xf32>
    %c0_13 = arith.constant 0 : index
    %c1_14 = arith.constant 1 : index
    %c0_15 = arith.constant 0 : index
    %c0_16 = arith.constant 0 : index
    %12 = vector.load %arg5[%c0_13, %c1_14, %c0_15, %c0_16] : memref<1x3x128x128xf32, #tpu.memory_space<vmem>>, vector<1x1x128x128xf32>
    %13 = vector.shape_cast %12 : vector<1x1x128x128xf32> to vector<128x128xf32>
    %cst_17 = arith.constant dense<0.000000e+00> : vector<13x128xf32>
    %14 = tpu.matmul %11, %13, %cst_17 {dimension_numbers = #tpu.dot_dimension_numbers<[1], [0], [0], [1], [0, 0, 1, 1], [], []>} : vector<13x128xf32>, vector<128x128xf32>, vector<13x128xf32> -> vector<13x128xf32>
    %15 = arith.addf %9, %14 : vector<13x128xf32>
    %c0_18 = arith.constant 0 : index
    %c0_19 = arith.constant 0 : index
    %c2 = arith.constant 2 : index
    %c0_20 = arith.constant 0 : index
    %16 = vector.load %arg4[%c0_18, %c0_19, %c2, %c0_20] : memref<1x1x15x128xf32, #tpu.memory_space<vmem>>, vector<1x1x13x128xf32>
    %17 = vector.shape_cast %16 : vector<1x1x13x128xf32> to vector<13x128xf32>
    %c0_21 = arith.constant 0 : index
    %c2_22 = arith.constant 2 : index
    %c0_23 = arith.constant 0 : index
    %c0_24 = arith.constant 0 : index
    %18 = vector.load %arg5[%c0_21, %c2_22, %c0_23, %c0_24] : memref<1x3x128x128xf32, #tpu.memory_space<vmem>>, vector<1x1x128x128xf32>
    %19 = vector.shape_cast %18 : vector<1x1x128x128xf32> to vector<128x128xf32>
    %cst_25 = arith.constant dense<0.000000e+00> : vector<13x128xf32>
    %20 = tpu.matmul %17, %19, %cst_25 {dimension_numbers = #tpu.dot_dimension_numbers<[1], [0], [0], [1], [0, 0, 1, 1], [], []>} : vector<13x128xf32>, vector<128x128xf32>, vector<13x128xf32> -> vector<13x128xf32>
    %21 = arith.addf %15, %20 : vector<13x128xf32>
    %c0_26 = arith.constant 0 : index
    %c0_27 = arith.constant 0 : index
    %22 = vector.load %arg8[%c0_26, %c0_27] : memref<13x128xf32, #tpu.memory_space<vmem>>, vector<13x128xf32>
    tpu.vector_store %arg8[%c0_26, %c0_27], %21 {strides = array<i32>} : memref<13x128xf32, #tpu.memory_space<vmem>>, vector<13x128xf32>,
    %c2_i32 = arith.constant 2 : i32
    %23 = arith.cmpi eq, %arg3, %c2_i32 : i32
    %24 = arith.extui %23 : i1 to i32
    %c0_i32_28 = arith.constant 0 : i32
    %25 = arith.cmpi ne, %24, %c0_i32_28 : i32
    scf.if %25 {
      %c0_29 = arith.constant 0 : index
      %c0_30 = arith.constant 0 : index
      %26 = vector.load %arg8[%c0_29, %c0_30] : memref<13x128xf32, #tpu.memory_space<vmem>>, vector<13x128xf32>
      %c0_31 = arith.constant 0 : index
      %c0_32 = arith.constant 0 : index
      %27 = vector.load %arg6[%c0_31, %c0_32] : memref<1x128xf32, #tpu.memory_space<vmem>>, vector<1x128xf32>
      %28 = vector.broadcast %27 : vector<1x128xf32> to vector<13x128xf32>
      %29 = arith.addf %26, %28 : vector<13x128xf32>
      %cst_33 = arith.constant 0.000000e+00 : f32
      %30 = vector.broadcast %cst_33 : f32 to vector<13x128xf32>
      %31 = arith.maximumf %29, %30 : vector<13x128xf32>
      %c0_34 = arith.constant 0 : index
      %c0_35 = arith.constant 0 : index
      %c0_36 = arith.constant 0 : index
      %c0_37 = arith.constant 0 : index
      %32 = vector.load %arg7[%c0_34, %c0_35, %c0_36, %c0_37] : memref<1x1x13x128xf32, #tpu.memory_space<vmem>>, vector<1x1x13x128xf32>
      %33 = vector.shape_cast %32 : vector<1x1x13x128xf32> to vector<13x128xf32>
      %34 = vector.shape_cast %31 : vector<13x128xf32> to vector<1x1x13x128xf32>
      tpu.vector_store %arg7[%c0_34, %c0_35, %c0_36, %c0_37], %34 {strides = array<i32>} : memref<1x1x13x128xf32, #tpu.memory_space<vmem>>, vector<1x1x13x128xf32>,
    } else {
    }
    return
  }
  func.func @transform_0(%arg0: i32, %arg1: i32, %arg2: i32, %arg3: i32) -> (i32, i32, i32, i32) {
    %c1_i32 = arith.constant 1 : i32
    %0 = arith.muli %arg1, %c1_i32 : i32
    %1 = arith.addi %0, %arg3 : i32
    %c0_i32 = arith.constant 0 : i32
    %c0_i32_0 = arith.constant 0 : i32
    %c0_i32_1 = arith.constant 0 : i32
    return %arg0, %1, %c0_i32, %c0_i32_0 : i32, i32, i32, i32
  }
  func.func @transform_1(%arg0: i32, %arg1: i32, %arg2: i32, %arg3: i32) -> (i32, i32, i32, i32) {
    %c0_i32 = arith.constant 0 : i32
    %c0_i32_0 = arith.constant 0 : i32
    %c0_i32_1 = arith.constant 0 : i32
    return %arg3, %c0_i32, %c0_i32_0, %arg2 : i32, i32, i32, i32
  }
  func.func @transform_2(%arg0: i32, %arg1: i32, %arg2: i32, %arg3: i32) -> (i32, i32) {
    %c0_i32 = arith.constant 0 : i32
    %c0_i32_0 = arith.constant 0 : i32
    return %c0_i32, %arg2 : i32, i32
  }
  func.func @transform_3(%arg0: i32, %arg1: i32, %arg2: i32, %arg3: i32) -> (i32, i32, i32, i32) {
    %c0_i32 = arith.constant 0 : i32
    %c0_i32_0 = arith.constant 0 : i32
    return %arg0, %arg1, %c0_i32, %arg2 : i32, i32, i32, i32
  }
}

module attributes {stable_mosaic.version = 11 : i64} {
  func.func @_matmul_bias_act_kernel(%arg0: i32, %arg1: i32, %arg2: i32, %arg3: memref<2x576xf32, #tpu.memory_space<vmem>>, %arg4: memref<576x512xbf16, #tpu.memory_space<vmem>>, %arg5: memref<1x512xf32, #tpu.memory_space<vmem>>, %arg6: memref<2x512xf32, #tpu.memory_space<vmem>>, %arg7: memref<2x512xf32, #tpu.memory_space<vmem>>) attributes {dimension_semantics = [#tpu.dimension_semantics<parallel>, #tpu.dimension_semantics<parallel>, #tpu.dimension_semantics<arbitrary>], iteration_bounds = array<i64: 1, 8, 1>, scalar_prefetch = 0 : i64, scratch_operands = 1 : i64, tpu.core_type = #tpu.core_type<tc>, window_params = [{transform_indices = @transform_0, window_bounds = array<i64: 2, 576>}, {transform_indices = @transform_1, window_bounds = array<i64: 576, 512>}, {transform_indices = @transform_2, window_bounds = array<i64: 1, 512>}, {transform_indices = @transform_3, window_bounds = array<i64: 2, 512>}]} {
    %c0_i32 = arith.constant 0 : i32
    %0 = arith.cmpi eq, %arg2, %c0_i32 : i32
    %1 = arith.extui %0 : i1 to i32
    %c0_i32_0 = arith.constant 0 : i32
    %2 = arith.cmpi ne, %1, %c0_i32_0 : i32
    scf.if %2 {
      %cst_10 = arith.constant 0.000000e+00 : f32
      %13 = vector.broadcast %cst_10 : f32 to vector<2x512xf32>
      %c0_11 = arith.constant 0 : index
      %c0_12 = arith.constant 0 : index
      %14 = vector.load %arg7[%c0_11, %c0_12] : memref<2x512xf32, #tpu.memory_space<vmem>>, vector<2x512xf32>
      tpu.vector_store %arg7[%c0_11, %c0_12], %13 {strides = array<i32>} : memref<2x512xf32, #tpu.memory_space<vmem>>, vector<2x512xf32>,
    } else {
    }
    %c0 = arith.constant 0 : index
    %c0_1 = arith.constant 0 : index
    %3 = vector.load %arg3[%c0, %c0_1] : memref<2x576xf32, #tpu.memory_space<vmem>>, vector<2x576xf32>
    %c0_2 = arith.constant 0 : index
    %c0_3 = arith.constant 0 : index
    %4 = vector.load %arg4[%c0_2, %c0_3] : memref<576x512xbf16, #tpu.memory_space<vmem>>, vector<576x512xbf16>
    %5 = arith.truncf %3 : vector<2x576xf32> to vector<2x576xbf16>
    %c0_4 = arith.constant 0 : index
    %c0_5 = arith.constant 0 : index
    %6 = vector.load %arg7[%c0_4, %c0_5] : memref<2x512xf32, #tpu.memory_space<vmem>>, vector<2x512xf32>
    %cst = arith.constant dense<0.000000e+00> : vector<2x512xf32>
    %7 = tpu.matmul %5, %4, %cst {dimension_numbers = #tpu.dot_dimension_numbers<[1], [0], [0], [1], [0, 0, 1, 1], [], []>} : vector<2x576xbf16>, vector<576x512xbf16>, vector<2x512xf32> -> vector<2x512xf32>
    %8 = arith.addf %6, %7 : vector<2x512xf32>
    %c0_6 = arith.constant 0 : index
    %c0_7 = arith.constant 0 : index
    %9 = vector.load %arg7[%c0_6, %c0_7] : memref<2x512xf32, #tpu.memory_space<vmem>>, vector<2x512xf32>
    tpu.vector_store %arg7[%c0_6, %c0_7], %8 {strides = array<i32>} : memref<2x512xf32, #tpu.memory_space<vmem>>, vector<2x512xf32>,
    %c0_i32_8 = arith.constant 0 : i32
    %10 = arith.cmpi eq, %arg2, %c0_i32_8 : i32
    %11 = arith.extui %10 : i1 to i32
    %c0_i32_9 = arith.constant 0 : i32
    %12 = arith.cmpi ne, %11, %c0_i32_9 : i32
    scf.if %12 {
      %c0_10 = arith.constant 0 : index
      %c0_11 = arith.constant 0 : index
      %13 = vector.load %arg7[%c0_10, %c0_11] : memref<2x512xf32, #tpu.memory_space<vmem>>, vector<2x512xf32>
      %c0_12 = arith.constant 0 : index
      %c0_13 = arith.constant 0 : index
      %14 = vector.load %arg5[%c0_12, %c0_13] : memref<1x512xf32, #tpu.memory_space<vmem>>, vector<1x512xf32>
      %15 = vector.broadcast %14 : vector<1x512xf32> to vector<2x512xf32>
      %16 = arith.addf %13, %15 : vector<2x512xf32>
      %cst_14 = arith.constant 0.000000e+00 : f32
      %17 = vector.broadcast %cst_14 : f32 to vector<2x512xf32>
      %18 = arith.maximumf %16, %17 : vector<2x512xf32>
      %c0_15 = arith.constant 0 : index
      %c0_16 = arith.constant 0 : index
      %19 = vector.load %arg6[%c0_15, %c0_16] : memref<2x512xf32, #tpu.memory_space<vmem>>, vector<2x512xf32>
      tpu.vector_store %arg6[%c0_15, %c0_16], %18 {strides = array<i32>} : memref<2x512xf32, #tpu.memory_space<vmem>>, vector<2x512xf32>,
    } else {
    }
    return
  }
  func.func @transform_0(%arg0: i32, %arg1: i32, %arg2: i32) -> (i32, i32) {
    %c0_i32 = arith.constant 0 : i32
    return %arg0, %arg2 : i32, i32
  }
  func.func @transform_1(%arg0: i32, %arg1: i32, %arg2: i32) -> (i32, i32) {
    %c0_i32 = arith.constant 0 : i32
    return %arg2, %arg1 : i32, i32
  }
  func.func @transform_2(%arg0: i32, %arg1: i32, %arg2: i32) -> (i32, i32) {
    %c0_i32 = arith.constant 0 : i32
    %c0_i32_0 = arith.constant 0 : i32
    return %c0_i32, %arg1 : i32, i32
  }
  func.func @transform_3(%arg0: i32, %arg1: i32, %arg2: i32) -> (i32, i32) {
    %c0_i32 = arith.constant 0 : i32
    return %arg0, %arg1 : i32, i32
  }
}

module attributes {stable_mosaic.version = 11 : i64} {
  func.func @_matmul_bias_act_kernel(%arg0: i32, %arg1: i32, %arg2: i32, %arg3: memref<2x512xf32, #tpu.memory_space<vmem>>, %arg4: memref<512x512xbf16, #tpu.memory_space<vmem>>, %arg5: memref<1x512xf32, #tpu.memory_space<vmem>>, %arg6: memref<2x512xf32, #tpu.memory_space<vmem>>, %arg7: memref<2x512xf32, #tpu.memory_space<vmem>>) attributes {dimension_semantics = [#tpu.dimension_semantics<parallel>, #tpu.dimension_semantics<parallel>, #tpu.dimension_semantics<arbitrary>], iteration_bounds = array<i64: 1, 8, 8>, scalar_prefetch = 0 : i64, scratch_operands = 1 : i64, tpu.core_type = #tpu.core_type<tc>, window_params = [{transform_indices = @transform_0, window_bounds = array<i64: 2, 512>}, {transform_indices = @transform_1, window_bounds = array<i64: 512, 512>}, {transform_indices = @transform_2, window_bounds = array<i64: 1, 512>}, {transform_indices = @transform_3, window_bounds = array<i64: 2, 512>}]} {
    %c0_i32 = arith.constant 0 : i32
    %0 = arith.cmpi eq, %arg2, %c0_i32 : i32
    %1 = arith.extui %0 : i1 to i32
    %c0_i32_0 = arith.constant 0 : i32
    %2 = arith.cmpi ne, %1, %c0_i32_0 : i32
    scf.if %2 {
      %cst_9 = arith.constant 0.000000e+00 : f32
      %13 = vector.broadcast %cst_9 : f32 to vector<2x512xf32>
      %c0_10 = arith.constant 0 : index
      %c0_11 = arith.constant 0 : index
      %14 = vector.load %arg7[%c0_10, %c0_11] : memref<2x512xf32, #tpu.memory_space<vmem>>, vector<2x512xf32>
      tpu.vector_store %arg7[%c0_10, %c0_11], %13 {strides = array<i32>} : memref<2x512xf32, #tpu.memory_space<vmem>>, vector<2x512xf32>,
    } else {
    }
    %c0 = arith.constant 0 : index
    %c0_1 = arith.constant 0 : index
    %3 = vector.load %arg3[%c0, %c0_1] : memref<2x512xf32, #tpu.memory_space<vmem>>, vector<2x512xf32>
    %c0_2 = arith.constant 0 : index
    %c0_3 = arith.constant 0 : index
    %4 = vector.load %arg4[%c0_2, %c0_3] : memref<512x512xbf16, #tpu.memory_space<vmem>>, vector<512x512xbf16>
    %5 = arith.truncf %3 : vector<2x512xf32> to vector<2x512xbf16>
    %c0_4 = arith.constant 0 : index
    %c0_5 = arith.constant 0 : index
    %6 = vector.load %arg7[%c0_4, %c0_5] : memref<2x512xf32, #tpu.memory_space<vmem>>, vector<2x512xf32>
    %cst = arith.constant dense<0.000000e+00> : vector<2x512xf32>
    %7 = tpu.matmul %5, %4, %cst {dimension_numbers = #tpu.dot_dimension_numbers<[1], [0], [0], [1], [0, 0, 1, 1], [], []>} : vector<2x512xbf16>, vector<512x512xbf16>, vector<2x512xf32> -> vector<2x512xf32>
    %8 = arith.addf %6, %7 : vector<2x512xf32>
    %c0_6 = arith.constant 0 : index
    %c0_7 = arith.constant 0 : index
    %9 = vector.load %arg7[%c0_6, %c0_7] : memref<2x512xf32, #tpu.memory_space<vmem>>, vector<2x512xf32>
    tpu.vector_store %arg7[%c0_6, %c0_7], %8 {strides = array<i32>} : memref<2x512xf32, #tpu.memory_space<vmem>>, vector<2x512xf32>,
    %c7_i32 = arith.constant 7 : i32
    %10 = arith.cmpi eq, %arg2, %c7_i32 : i32
    %11 = arith.extui %10 : i1 to i32
    %c0_i32_8 = arith.constant 0 : i32
    %12 = arith.cmpi ne, %11, %c0_i32_8 : i32
    scf.if %12 {
      %c0_9 = arith.constant 0 : index
      %c0_10 = arith.constant 0 : index
      %13 = vector.load %arg7[%c0_9, %c0_10] : memref<2x512xf32, #tpu.memory_space<vmem>>, vector<2x512xf32>
      %c0_11 = arith.constant 0 : index
      %c0_12 = arith.constant 0 : index
      %14 = vector.load %arg5[%c0_11, %c0_12] : memref<1x512xf32, #tpu.memory_space<vmem>>, vector<1x512xf32>
      %15 = vector.broadcast %14 : vector<1x512xf32> to vector<2x512xf32>
      %16 = arith.addf %13, %15 : vector<2x512xf32>
      %cst_13 = arith.constant 0.000000e+00 : f32
      %17 = vector.broadcast %cst_13 : f32 to vector<2x512xf32>
      %18 = arith.maximumf %16, %17 : vector<2x512xf32>
      %c0_14 = arith.constant 0 : index
      %c0_15 = arith.constant 0 : index
      %19 = vector.load %arg6[%c0_14, %c0_15] : memref<2x512xf32, #tpu.memory_space<vmem>>, vector<2x512xf32>
      tpu.vector_store %arg6[%c0_14, %c0_15], %18 {strides = array<i32>} : memref<2x512xf32, #tpu.memory_space<vmem>>, vector<2x512xf32>,
    } else {
    }
    return
  }
  func.func @transform_0(%arg0: i32, %arg1: i32, %arg2: i32) -> (i32, i32) {
    %c0_i32 = arith.constant 0 : i32
    return %arg0, %arg2 : i32, i32
  }
  func.func @transform_1(%arg0: i32, %arg1: i32, %arg2: i32) -> (i32, i32) {
    %c0_i32 = arith.constant 0 : i32
    return %arg2, %arg1 : i32, i32
  }
  func.func @transform_2(%arg0: i32, %arg1: i32, %arg2: i32) -> (i32, i32) {
    %c0_i32 = arith.constant 0 : i32
    %c0_i32_0 = arith.constant 0 : i32
    return %c0_i32, %arg1 : i32, i32
  }
  func.func @transform_3(%arg0: i32, %arg1: i32, %arg2: i32) -> (i32, i32) {
    %c0_i32 = arith.constant 0 : i32
    return %arg0, %arg1 : i32, i32
  }
}

module attributes {stable_mosaic.version = 11 : i64} {
  func.func @_matmul_bias_act_kernel(%arg0: i32, %arg1: i32, %arg2: i32, %arg3: memref<2x512xf32, #tpu.memory_space<vmem>>, %arg4: memref<512x10xbf16, #tpu.memory_space<vmem>>, %arg5: memref<1x10xf32, #tpu.memory_space<vmem>>, %arg6: memref<2x10xf32, #tpu.memory_space<vmem>>, %arg7: memref<2x10xf32, #tpu.memory_space<vmem>>) attributes {dimension_semantics = [#tpu.dimension_semantics<parallel>, #tpu.dimension_semantics<parallel>, #tpu.dimension_semantics<arbitrary>], iteration_bounds = array<i64: 1, 1, 8>, scalar_prefetch = 0 : i64, scratch_operands = 1 : i64, tpu.core_type = #tpu.core_type<tc>, window_params = [{transform_indices = @transform_0, window_bounds = array<i64: 2, 512>}, {transform_indices = @transform_1, window_bounds = array<i64: 512, 10>}, {transform_indices = @transform_2, window_bounds = array<i64: 1, 10>}, {transform_indices = @transform_3, window_bounds = array<i64: 2, 10>}]} {
    %c0_i32 = arith.constant 0 : i32
    %0 = arith.cmpi eq, %arg2, %c0_i32 : i32
    %1 = arith.extui %0 : i1 to i32
    %c0_i32_0 = arith.constant 0 : i32
    %2 = arith.cmpi ne, %1, %c0_i32_0 : i32
    scf.if %2 {
      %cst_9 = arith.constant 0.000000e+00 : f32
      %13 = vector.broadcast %cst_9 : f32 to vector<2x10xf32>
      %c0_10 = arith.constant 0 : index
      %c0_11 = arith.constant 0 : index
      %14 = vector.load %arg7[%c0_10, %c0_11] : memref<2x10xf32, #tpu.memory_space<vmem>>, vector<2x10xf32>
      tpu.vector_store %arg7[%c0_10, %c0_11], %13 {strides = array<i32>} : memref<2x10xf32, #tpu.memory_space<vmem>>, vector<2x10xf32>,
    } else {
    }
    %c0 = arith.constant 0 : index
    %c0_1 = arith.constant 0 : index
    %3 = vector.load %arg3[%c0, %c0_1] : memref<2x512xf32, #tpu.memory_space<vmem>>, vector<2x512xf32>
    %c0_2 = arith.constant 0 : index
    %c0_3 = arith.constant 0 : index
    %4 = vector.load %arg4[%c0_2, %c0_3] : memref<512x10xbf16, #tpu.memory_space<vmem>>, vector<512x10xbf16>
    %5 = arith.truncf %3 : vector<2x512xf32> to vector<2x512xbf16>
    %c0_4 = arith.constant 0 : index
    %c0_5 = arith.constant 0 : index
    %6 = vector.load %arg7[%c0_4, %c0_5] : memref<2x10xf32, #tpu.memory_space<vmem>>, vector<2x10xf32>
    %cst = arith.constant dense<0.000000e+00> : vector<2x10xf32>
    %7 = tpu.matmul %5, %4, %cst {dimension_numbers = #tpu.dot_dimension_numbers<[1], [0], [0], [1], [0, 0, 1, 1], [], []>} : vector<2x512xbf16>, vector<512x10xbf16>, vector<2x10xf32> -> vector<2x10xf32>
    %8 = arith.addf %6, %7 : vector<2x10xf32>
    %c0_6 = arith.constant 0 : index
    %c0_7 = arith.constant 0 : index
    %9 = vector.load %arg7[%c0_6, %c0_7] : memref<2x10xf32, #tpu.memory_space<vmem>>, vector<2x10xf32>
    tpu.vector_store %arg7[%c0_6, %c0_7], %8 {strides = array<i32>} : memref<2x10xf32, #tpu.memory_space<vmem>>, vector<2x10xf32>,
    %c7_i32 = arith.constant 7 : i32
    %10 = arith.cmpi eq, %arg2, %c7_i32 : i32
    %11 = arith.extui %10 : i1 to i32
    %c0_i32_8 = arith.constant 0 : i32
    %12 = arith.cmpi ne, %11, %c0_i32_8 : i32
    scf.if %12 {
      %c0_9 = arith.constant 0 : index
      %c0_10 = arith.constant 0 : index
      %13 = vector.load %arg7[%c0_9, %c0_10] : memref<2x10xf32, #tpu.memory_space<vmem>>, vector<2x10xf32>
      %c0_11 = arith.constant 0 : index
      %c0_12 = arith.constant 0 : index
      %14 = vector.load %arg5[%c0_11, %c0_12] : memref<1x10xf32, #tpu.memory_space<vmem>>, vector<1x10xf32>
      %15 = vector.broadcast %14 : vector<1x10xf32> to vector<2x10xf32>
      %16 = arith.addf %13, %15 : vector<2x10xf32>
      %c0_13 = arith.constant 0 : index
      %c0_14 = arith.constant 0 : index
      %17 = vector.load %arg6[%c0_13, %c0_14] : memref<2x10xf32, #tpu.memory_space<vmem>>, vector<2x10xf32>
      tpu.vector_store %arg6[%c0_13, %c0_14], %16 {strides = array<i32>} : memref<2x10xf32, #tpu.memory_space<vmem>>, vector<2x10xf32>,
    } else {
    }
    return
  }
  func.func @transform_0(%arg0: i32, %arg1: i32, %arg2: i32) -> (i32, i32) {
    %c0_i32 = arith.constant 0 : i32
    return %arg0, %arg2 : i32, i32
  }
  func.func @transform_1(%arg0: i32, %arg1: i32, %arg2: i32) -> (i32, i32) {
    %c0_i32 = arith.constant 0 : i32
    return %arg2, %arg1 : i32, i32
  }
  func.func @transform_2(%arg0: i32, %arg1: i32, %arg2: i32) -> (i32, i32) {
    %c0_i32 = arith.constant 0 : i32
    %c0_i32_0 = arith.constant 0 : i32
    return %c0_i32, %arg1 : i32, i32
  }
  func.func @transform_3(%arg0: i32, %arg1: i32, %arg2: i32) -> (i32, i32) {
    %c0_i32 = arith.constant 0 : i32
    return %arg0, %arg1 : i32, i32
  }
}

</mosaic_0001>

<bundles_post_ra>
// kernel: alexnet_forward.11
= control target key start
LH: loop header
LB: loop body
LE: loop exit
PB: predicated region body
PF: predicated region fallthrough
CT: control target
= control target key end

     0   :  { %s1359_s12 = smov 0   ;;  %s1361_s13 = smov 0   ;;  %s1613_s0 = inlined_call_operand.vmem [shape: f32[2,56,56,8], index: 0, kind: input, shape index: {}]   ;;  %s1614_s1 = inlined_call_operand.vmem [shape: f32[3,3,8,128], index: 1, kind: input, shape index: {}]   ;;  %s1615_s2 = inlined_call_operand.vmem [shape: f32[1,128], index: 2, kind: input, shape index: {}]   ;;  %s1616_s3 = inlined_call_operand.vmem [shape: f32[2,54,54,128], index: 3, kind: output, shape index: {}]  }
   0x1   :  { %s1363_s14 = smov 0   ;;  %s1365_s15 = smov 0  }
   0x2   :  { %s1367_s16 = smov 0   ;;  %s1369_s17 = smov 0  }
   0x3   :  { %s1371_s18 = smov 0  }
   0x4 LB: > { %s28_s19 = sadd.s32 1, %s1318_s15  ;;  %s35_s20 = sadd.s32 1, %s1322_s16  ;;  %s1330_s18 = sphi %s1371_s18, %s13_s18   ;;  %s1326_s17 = sphi %s1369_s17, %s1622_s17   ;;  %s1322_s16 = sphi %s1367_s16, %s1621_s16   ;;  %s1318_s15 = sphi %s1365_s15, %s1620_s15   ;;  %s1314_s14 = sphi %s1363_s14, %s1619_s14   ;;  %s1310_s13 = sphi %s1361_s13, %s1618_s13   ;;  %s1306_s12 = sphi %s1359_s12, %s1617_s12  }
   0x5   : > { %p29_p0 = scmp.ge.s32.totalorder %s28_s19, 3  ;;  %p1053_p1 = scmp.ge.s32.totalorder %s1330_s18, 1 }
   0x6   : > { %p200_p2 = scmp.lt.s32.totalorder %s1330_s18, 325  ;;  %s39_s21 = sadd.s32 1, %s1326_s17 }
   0x7   : > { %s1624_s19 = smov (%p29_p0, %s28_s19), 0  ;;  %s1626_s20 = smov (!%p29_p0, %s35_s20), %s1322_s16 }
   0x8   : > { %p201_p3 = pnand %p1053_p1, %p200_p2  ;;  %p37_p4 = scmp.ge.s32.totalorder %s1626_s20, 54 }
   0x9   : > { %s247_s22 = sadd.s32 (!%p201_p3), %s1306_s12, %s1310_s13  ;;  %p248_p6 = scmp.lt.s32.totalorder (!%p201_p3), %s1314_s14, 1 }
   0xa   : > { %s1628_s20 = smov (%p37_p4, %s1626_s20), 0  ;;  %s1630_s21 = smov (!%p37_p4, %s39_s21), %s1326_s17 }
   0xb   : > { %p41_p5 = scmp.ge.s32.totalorder %s1630_s21, 2  ;;  %204 = sbr.rel (%p201_p3) target bundleno = 491 (0x1eb), region = 32 }
   0xc   : > { %p250_p7 = scmp.lt.s32.totalorder (!%p201_p3), %s247_s22, 55  ;;  %p258_p8 = scmp.lt.s32.totalorder (!%p201_p3), %s1306_s12, 2 }
   0xd   : > { %s1632_s21 = smov (%p41_p5, %s1630_s21), 0  ;;  %p271_p9 = scmp.lt.s32.totalorder (!%p201_p3), %s1310_s13, 53 }
   0xe   : > { %p1057_p10 = scmp.ne.s32.totalorder (!%p201_p3), %s1306_s12, 0 }
  0x10   : > { %s1634_s14 = smov (!%p248_p6, %s1314_s14), 1  ;;  %s1636_s22 = smov (!%p250_p7, %s247_s22), 55 }
  0x11   : > { %s1181_s23 = smul.u32 392, %s1634_s14  ;;  %s1638_s13 = smov (!%p271_p9, %s1310_s13), 53 }
  0x12   : > { %s1180_s24 = smul.u32 7, %s1636_s22 }
  0x13   : > { %s259_s25 = scalar_select %p258_p8, %s1306_s12, 2 }
  0x14   : > { %s254_s26 = sadd.s32 %s1181_s23, %s1180_s24  ;;  %s1184_s8 = smul.u32 378, %s1634_s14 }
  0x15   : > { %s1054_s27 = sshll.u32 %s254_s26, 3  ;;  %s1182_s28 = smul.u32 24, %s259_s25 }
  0x16   : > { %s1413_s4 = scalar_lea.vmem %s1613_s0, %s1054_s27  ;;  %s1183_s9 = smul.u32 7, %s1638_s13 }
  0x17   : > { %s1418_s7 = scalar_lea.vmem %s1614_s1, %s1182_s28  ;;  %284 = sbr.rel (%p1057_p10) target bundleno = 33 (0x21), region = 36 }
  0x18   : > { %s278_s10 = sadd.s32 %s1184_s8, %s1183_s9 }
  0x19   : > { %s1056_s11 = sshll.u32 %s278_s10, 3 }
  0x1a   : > { %s1424_s24 = scalar_lea.vmem %s1616_s3, %s1056_s11 }
  0x1c   : > { %v1332_v0 = vmov 0.0  }
  0x1d   : > { %285 = vst [vmem:[#allocation2 + $0x30] sm:$0xff] %v1332_v0  ;;  %286 = vst [vmem:[#allocation2] sm:$0xff] %v1332_v0 }
  0x1e   : > { %287 = vst [vmem:[#allocation2 + $0x18] sm:$0xff] %v1332_v0  ;;  %288 = vst [vmem:[#allocation2 + $0x10] sm:$0xff] %v1332_v0 }
  0x1f   : > { %289 = vst [vmem:[#allocation2 + $0x8] sm:$0xff] %v1332_v0  ;;  %290 = vst [vmem:[#allocation2 + $0x20] sm:$0xff] %v1332_v0 }
  0x20   : > { %291 = vst [vmem:[#allocation2 + $0x28] sm:$0x3f] %v1332_v0 }
  0x21 PF: > { %v306_v1 = vld [vmem:[%s1418_s7] sm:$0xff]  ;;  %v1333_v2 = vmov 0.0   ;;  %vm307_vm0 = vcmask 64512   ;;  %vm1334_vm1 = vmmov 0   ;;  %v1073_v5 = vld [vmem:[%s1418_s7 + $0x10] sm:$0xff]  ;;  %v1065_v6 = vld [vmem:[%s1418_s7 + $0x8] sm:$0xff] }
  0x22   : > { %1109 = vmatprep.subr.mxu0 %v1333_v2  ;;  %1178 = vmatprep.subr.mxu1 %v1333_v2  ;;  %v299_v3 = vld [vmem:[%s1413_s4] sm:$0xff]  ;;  %v300_v7 = vld [vmem:[%s1413_s4 + $0x8] sm:$0xff]  ;;  %v301_v9 = vld [vmem:[%s1413_s4 + $0x10] sm:$0xff]  ;;  %p1081_p11 = scmp.ne.s32.totalorder %s1306_s12, 2 }
  0x23   : > { %v303_v4 = vld [vmem:[%s1413_s4 + $0x20] sm:$0xff]  ;;  %1110 = vmatpush3.msra.mxu0 %v306_v1  ;;  %1179 = vmatpush3.msra.mxu1 %v306_v1  ;;  %v304_v8 = vld [vmem:[%s1413_s4 + $0x28] sm:$0xff]  ;;  %v305_v10 = vld [vmem:[%s1413_s4 + $0x30] sm:$0x3f]  ;;  %s1335_s12 = smov (!%p1081_p11), 1   ;;  %s1336_s25 = smov (!%p1081_p11), 127  }
  0x24   : > { %1111 = vmatprep.mubr.msk.f32.mxu0 %vm1334_vm1, %v1333_v2  ;;  %1123 = vmatprep.mubr.msk.f32.mxu1 %vm1334_vm1, %v1333_v2  ;;  %v302_v11 = vld [vmem:[%s1413_s4 + $0x18] sm:$0xff]  ;;  %v436_v12 = vld [vmem:[%s1413_s4 + $0x1] sm:$0xff]  ;;  %v437_v13 = vld [vmem:[%s1413_s4 + $0x9] sm:$0xff]  ;;  %s1337_s26 = smov (!%p1081_p11), 2   ;;  %s1338_s27 = smov (!%p1081_p11), 126  }
  0x25   : > { %1112 = vmatmul.mubr.msk.f32.vlgmr.msra.gmra.mxu0 %vm307_vm0, %v299_v3  ;;  %1124 = vmatmul.mubr.msk.f32.vlgmr.msra.gmra.mxu1 %vm307_vm0, %v303_v4  ;;  %v573_v14 = vld [vmem:[%s1413_s4 + $0x2] sm:$0xff]  ;;  %v438_v15 = vld [vmem:[%s1413_s4 + $0x11] sm:$0xff]  ;;  %v439_v17 = vld [vmem:[%s1413_s4 + $0x19] sm:$0xff] }
  0x26   : > { %1155 = vmatprep.subr.mxu0 %v1333_v2  ;;  %1132 = vmatprep.subr.mxu1 %v1333_v2  ;;  %v574_v16 = vld [vmem:[%s1413_s4 + $0xa] sm:$0xff]  ;;  %v575_v18 = vld [vmem:[%s1413_s4 + $0x12] sm:$0xff]  ;;  %v440_v19 = vld [vmem:[%s1413_s4 + $0x21] sm:$0xff] }
  0x27   : > { %1156 = vmatpush3.msra.mxu0 %v1073_v5  ;;  %1114 = vmatprep.mubr.msk.f32.mxu0 %vm1334_vm1, %v1333_v2  ;;  %v576_v20 = vld [vmem:[%s1413_s4 + $0x1a] sm:$0xff]  ;;  %v441_v21 = vld [vmem:[%s1413_s4 + $0x29] sm:$0xff]  ;;  %v442_v23 = vld [vmem:[%s1413_s4 + $0x31] sm:$0x3f] }
  0x28   : > { %1126 = vmatprep.mubr.msk.f32.mxu1 %vm1334_vm1, %v1333_v2  ;;  %1133 = vmatpush3.msra.mxu1 %v1065_v6  ;;  %v577_v22 = vld [vmem:[%s1413_s4 + $0x22] sm:$0xff]  ;;  %v578_v24 = vld [vmem:[%s1413_s4 + $0x2a] sm:$0xff]  ;;  %v579_v25 = vld [vmem:[%s1413_s4 + $0x32] sm:$0x3f] }
  0x29   : > { %1115 = vmatmul.mubr.msk.f32.gmra.mxu0 %vm307_vm0, %v300_v7  ;;  %1127 = vmatmul.mubr.msk.f32.gmra.mxu1 %vm307_vm0, %v304_v8  ;;  %v292_v36 = vld [vmem:[#allocation2 + $0x30] sm:$0xff]  ;;  %v293_v42 = vld [vmem:[#allocation2] sm:$0xff]  ;;  %v294_v50 = vld [vmem:[#allocation2 + $0x18] sm:$0xff] }
  0x2a   : > { %1117 = vmatprep.mubr.msk.f32.mxu0 %vm1334_vm1, %v1333_v2  ;;  %1129 = vmatprep.mubr.msk.f32.mxu1 %vm1334_vm1, %v1333_v2  ;;  %v295_v58 = vld [vmem:[#allocation2 + $0x10] sm:$0xff] }
  0x2d   : > { %1118 = vmatmul.mubr.msk.f32.gmra.mxu0 %vm307_vm0, %v301_v9  ;;  %1130 = vmatmul.mubr.msk.f32.gmra.mxu1 %vm307_vm0, %v305_v10  ;;  %v297_v10 = vld [vmem:[#allocation2 + $0x20] sm:$0xff] }
  0x2e   : > { %1120 = vmatprep.mubr.msk.f32.mxu0 %vm1334_vm1, %v1333_v2  ;;  %1134 = vmatprep.mubr.msk.f32.mxu1 %vm1334_vm1, %v1333_v2 }
  0x31   : > { %1121 = vmatmul.mubr.msk.f32.gmra.mxu0 %vm307_vm0, %v302_v11  ;;  %1135 = vmatmul.mubr.msk.f32.vlgmr.msra.gmra.mxu1 %vm307_vm0, %v436_v12 }
  0x32   : > { %1137 = vmatprep.mubr.msk.f32.mxu1 %vm1334_vm1, %v1333_v2  ;;  %1157 = vmatprep.mubr.msk.f32.mxu0 %vm1334_vm1, %v1333_v2 }
  0x35   : > { %1138 = vmatmul.mubr.msk.f32.gmra.mxu1 %vm307_vm0, %v437_v13  ;;  %1158 = vmatmul.mubr.msk.f32.vlgmr.msra.gmra.mxu0 %vm307_vm0, %v573_v14 }
  0x36   : > { %1140 = vmatprep.mubr.msk.f32.mxu1 %vm1334_vm1, %v1333_v2  ;;  %1160 = vmatprep.mubr.msk.f32.mxu0 %vm1334_vm1, %v1333_v2 }
  0x39   : > { %1141 = vmatmul.mubr.msk.f32.gmra.mxu1 %vm307_vm0, %v438_v15  ;;  %1161 = vmatmul.mubr.msk.f32.gmra.mxu0 %vm307_vm0, %v574_v16 }
  0x3a   : > { %1143 = vmatprep.mubr.msk.f32.mxu1 %vm1334_vm1, %v1333_v2  ;;  %1163 = vmatprep.mubr.msk.f32.mxu0 %vm1334_vm1, %v1333_v2 }
  0x3d   : > { %1144 = vmatmul.mubr.msk.f32.gmra.mxu1 %vm307_vm0, %v439_v17  ;;  %1164 = vmatmul.mubr.msk.f32.gmra.mxu0 %vm307_vm0, %v575_v18  ;;  %v298_v18 = vld [vmem:[#allocation2 + $0x28] sm:$0x3f] }
  0x3e   : > { %1146 = vmatprep.mubr.msk.f32.mxu1 %vm1334_vm1, %v1333_v2  ;;  %1166 = vmatprep.mubr.msk.f32.mxu0 %vm1334_vm1, %v1333_v2 }
  0x41   : > { %1147 = vmatmul.mubr.msk.f32.gmra.mxu1 %vm307_vm0, %v440_v19  ;;  %1167 = vmatmul.mubr.msk.f32.gmra.mxu0 %vm307_vm0, %v576_v20 }
  0x42   : > { %1149 = vmatprep.mubr.msk.f32.mxu1 %vm1334_vm1, %v1333_v2  ;;  %1169 = vmatprep.mubr.msk.f32.mxu0 %vm1334_vm1, %v1333_v2 }
  0x45   : > { %1150 = vmatmul.mubr.msk.f32.gmra.mxu1 %vm307_vm0, %v441_v21  ;;  %1170 = vmatmul.mubr.msk.f32.gmra.mxu0 %vm307_vm0, %v577_v22 }
  0x46   : > { %1152 = vmatprep.mubr.msk.f32.mxu1 %vm1334_vm1, %v1333_v2  ;;  %1172 = vmatprep.mubr.msk.f32.mxu0 %vm1334_vm1, %v1333_v2 }
  0x49   : > { %1153 = vmatmul.mubr.msk.f32.gmra.mxu1 %vm307_vm0, %v442_v23  ;;  %1173 = vmatmul.mubr.msk.f32.gmra.mxu0 %vm307_vm0, %v578_v24 }
  0x4a   : > { %1175 = vmatprep.mubr.msk.f32.mxu0 %vm1334_vm1, %v1333_v2  ;;  %v296_v2 = vld [vmem:[#allocation2 + $0x8] sm:$0xff] }
  0x4d   : > { %1176 = vmatmul.mubr.msk.f32.gmra.mxu0 %vm307_vm0, %v579_v25 }
  0xe5   : > { %v395_v26 = vpop.f32.mrf.mxu0  ;;  %v415_v27 = vpop.f32.mrf.mxu1 }
  0xe6   : > { %v429_v41 = vadd.f32 %v395_v26, %v292_v36  ;;  %v433_v8 = vadd.f32 %v415_v27, %v296_v2 }
  0xe7   : > { %v1113_v28 = vpop.f32.mrf.mxu0  ;;  %v1125_v29 = vpop.f32.mrf.mxu1 }
  0xe9   : > { %v400_v30 = vpop.f32.mrf.mxu0  ;;  %v420_v31 = vpop.f32.mrf.mxu1 }
  0xea   : > { %v430_v48 = vadd.f32 %v400_v30, %v293_v42  ;;  %v434_v16 = vadd.f32 %v420_v31, %v297_v10 }
  0xeb   : > { %v1116_v32 = vpop.f32.mrf.mxu0  ;;  %v1128_v33 = vpop.f32.mrf.mxu1 }
  0xed   : > { %v405_v34 = vpop.f32.mrf.mxu0  ;;  %v425_v35 = vpop.f32.mrf.mxu1 }
  0xee   : > { %v431_v56 = vadd.f32 %v405_v34, %v294_v50  ;;  %v435_v24 = vadd.f32 %v425_v35, %v298_v18 }
  0xef   : > { %v1119_v37 = vpop.f32.mrf.mxu0  ;;  %v1131_v38 = vpop.f32.mrf.mxu1 }
  0xf1   : > { %v410_v39 = vpop.f32.mrf.mxu0  ;;  %v532_v40 = vpop.f32.mrf.mxu1 }
  0xf2   : > { %v566_v45 = vadd.f32 %v532_v40, %v429_v41  ;;  %v432_v0 = vadd.f32 %v410_v39, %v295_v58 }
  0xf3   : > { %v1122_v43 = vpop.f32.mrf.mxu0  ;;  %v1136_v44 = vpop.f32.mrf.mxu1 }
  0xf5   : > { %v537_v46 = vpop.f32.mrf.mxu1  ;;  %v669_v47 = vpop.f32.mrf.mxu0 }
  0xf6   : > { %v703_v49 = vadd.f32 %v669_v47, %v566_v45  ;;  %v567_v53 = vadd.f32 %v537_v46, %v430_v48 }
  0xf7   : > { %v1139_v51 = vpop.f32.mrf.mxu1  ;;  %v1159_v52 = vpop.f32.mrf.mxu0 }
  0xf8   : > { %710 = vst [vmem:[#allocation2 + $0x30] sm:$0xff] %v703_v49 }
  0xf9   : > { %v542_v54 = vpop.f32.mrf.mxu1  ;;  %v674_v55 = vpop.f32.mrf.mxu0 }
  0xfa   : > { %v704_v57 = vadd.f32 %v674_v55, %v567_v53  ;;  %v568_v61 = vadd.f32 %v542_v54, %v431_v56 }
  0xfb   : > { %v1142_v59 = vpop.f32.mrf.mxu1  ;;  %v1162_v60 = vpop.f32.mrf.mxu0 }
  0xfc   : > { %711 = vst [vmem:[#allocation2] sm:$0xff] %v704_v57 }
  0xfd   : > { %v547_v62 = vpop.f32.mrf.mxu1  ;;  %v679_v63 = vpop.f32.mrf.mxu0 }
  0xfe   : > { %v705_v1 = vadd.f32 %v679_v63, %v568_v61  ;;  %v569_v5 = vadd.f32 %v547_v62, %v432_v0 }
  0xff   : > { %v1145_v3 = vpop.f32.mrf.mxu1  ;;  %v1165_v4 = vpop.f32.mrf.mxu0 }
 0x100   : > { %712 = vst [vmem:[#allocation2 + $0x18] sm:$0xff] %v705_v1 }
 0x101   : > { %v552_v6 = vpop.f32.mrf.mxu1  ;;  %v684_v7 = vpop.f32.mrf.mxu0 }
 0x102   : > { %v706_v9 = vadd.f32 %v684_v7, %v569_v5  ;;  %v570_v13 = vadd.f32 %v552_v6, %v433_v8 }
 0x103   : > { %v1148_v11 = vpop.f32.mrf.mxu1  ;;  %v1168_v12 = vpop.f32.mrf.mxu0 }
 0x104   : > { %713 = vst [vmem:[#allocation2 + $0x10] sm:$0xff] %v706_v9 }
 0x105   : > { %v557_v14 = vpop.f32.mrf.mxu1  ;;  %v689_v15 = vpop.f32.mrf.mxu0 }
 0x106   : > { %v707_v17 = vadd.f32 %v689_v15, %v570_v13  ;;  %v571_v21 = vadd.f32 %v557_v14, %v434_v16 }
 0x107   : > { %v1151_v19 = vpop.f32.mrf.mxu1  ;;  %v1171_v20 = vpop.f32.mrf.mxu0 }
 0x108   : > { %714 = vst [vmem:[#allocation2 + $0x8] sm:$0xff] %v707_v17 }
 0x109   : > { %v562_v22 = vpop.f32.mrf.mxu1  ;;  %v694_v23 = vpop.f32.mrf.mxu0 }
 0x10a   : > { %v708_v25 = vadd.f32 %v694_v23, %v571_v21  ;;  %v572_v28 = vadd.f32 %v562_v22, %v435_v24 }
 0x10b   : > { %v1174_v26 = vpop.f32.mrf.mxu0  ;;  %v1154_v27 = vpop.f32.mrf.mxu1 }
 0x10c   : > { %715 = vst [vmem:[#allocation2 + $0x20] sm:$0xff] %v708_v25  ;;  %720 = sbr.rel (%p1081_p11) target bundleno = 491 (0x1eb), region = 40 }
 0x10d   : > { %v699_v29 = vpop.f32.mrf.mxu0 }
 0x10e   : > { %v709_v30 = vadd.f32 %v699_v29, %v572_v28 }
 0x10f   : > { %v1177_v32 = vpop.f32.mrf.mxu0 }
 0x110   : > { %716 = vst [vmem:[#allocation2 + $0x28] sm:$0x3f] %v709_v30 }
 0x111   : > { %v723_v31 = vld [vmem:[#allocation2 + $0x18] sm:$0xff]  ;;  %v1082_v33 = vld [vmem:[%s1615_s2] ss:$0 sm:$0xff]  ;;  %v721_v34 = vld [vmem:[#allocation2 + $0x30] sm:$0xff] }
 0x112   : > { %v737_v36 = vadd.f32 %v1082_v33, %v723_v31  ;;  %v735_v35 = vadd.f32 %v1082_v33, %v721_v34  ;;  %v724_v37 = vld [vmem:[#allocation2 + $0x10] sm:$0xff]  ;;  %v722_v38 = vld [vmem:[#allocation2] sm:$0xff]  ;;  %v725_v42 = vld [vmem:[#allocation2 + $0x8] sm:$0xff] }
 0x113   : > { %v726_v39 = vld [vmem:[#allocation2 + $0x20] sm:$0xff]  ;;  %v738_v40 = vadd.f32 %v1082_v33, %v724_v37  ;;  %v736_v41 = vadd.f32 %v1082_v33, %v722_v38  ;;  %v739_v46 = vadd.f32 %v1082_v33, %v725_v42 }
 0x114   : > { %v1522_v43 = vmax.f32 %v737_v36, 0.0  ;;  %v1524_v44 = vmax.f32 %v735_v35, 0.0  ;;  %v740_v45 = vadd.f32 %v1082_v33, %v726_v39 }
 0x115   : > { %v1526_v48 = vmax.f32 %v738_v40, 0.0  ;;  %v1528_v49 = vmax.f32 %v736_v41, 0.0  ;;  %v1545_v56 = vmax.f32 %v739_v46, 0.0 }
 0x116   : > { %v1532_v50 = vmul.f32 %v1522_v43, %v1522_v43  ;;  %v749_v51 = vmul.f32 %v1524_v44, %v1524_v44  ;;  %v1543_v55 = vmax.f32 %v740_v45, 0.0 }
 0x117   : > { %v727_v47 = vld [vmem:[#allocation2 + $0x28] sm:$0x3f]  ;;  %v1539_v53 = vmul.f32 %v1526_v48, %v1526_v48  ;;  %v750_v54 = vmul.f32 %v1528_v49, %v1528_v49  ;;  %v753_v58 = vmul.f32 %v1545_v56, %v1545_v56 }
 0x118   : > { %v741_v52 = vadd.f32 %v1082_v33, %v727_v47  ;;  %760 = vrot.lane.b32.xlu1 %v1532_v50, %s1335_s12  ;;  %756 = vrot.lane.b32.xlu0 %v749_v51, %s1335_s12  ;;  %v1550_v57 = vmul.f32 %v1543_v55, %v1543_v55 }
 0x11a   : > { %v1554_v59 = vmax.f32 %v741_v52, 0.0 }
 0x11c   : > { %762 = vrot.lane.b32.xlu1 %v1539_v53, %s1335_s12  ;;  %758 = vrot.lane.b32.xlu0 %v750_v54, %s1335_s12  ;;  %v1559_v60 = vmul.f32 %v1554_v59, %v1554_v59 }
 0x120   : > { %766 = vrot.lane.b32.xlu1 %v1550_v57, %s1335_s12  ;;  %764 = vrot.lane.b32.xlu0 %v753_v58, %s1335_s12 }
 0x124   : > { %777 = vrot.lane.b32.xlu1 %v749_v51, %s1336_s25  ;;  %768 = vrot.lane.b32.xlu0 %v1559_v60, %s1335_s12 }
 0x128   : > { %781 = vrot.lane.b32.xlu1 %v1532_v50, %s1336_s25  ;;  %779 = vrot.lane.b32.xlu0 %v750_v54, %s1336_s25 }
 0x12c   : > { %785 = vrot.lane.b32.xlu1 %v753_v58, %s1336_s25  ;;  %783 = vrot.lane.b32.xlu0 %v1539_v53, %s1336_s25 }
 0x130   : > { %789 = vrot.lane.b32.xlu1 %v1559_v60, %s1336_s25  ;;  %787 = vrot.lane.b32.xlu0 %v1550_v57, %s1336_s25 }
 0x134   : > { %800 = vrot.lane.b32.xlu1 %v750_v54, %s1337_s26  ;;  %798 = vrot.lane.b32.xlu0 %v749_v51, %s1337_s26 }
 0x138   : > { %804 = vrot.lane.b32.xlu1 %v1539_v53, %s1337_s26  ;;  %802 = vrot.lane.b32.xlu0 %v1532_v50, %s1337_s26 }
 0x13c   : > { %808 = vrot.lane.b32.xlu1 %v1550_v57, %s1337_s26  ;;  %806 = vrot.lane.b32.xlu0 %v753_v58, %s1337_s26 }
 0x140   : > { %819 = vrot.lane.b32.xlu1 %v749_v51, %s1338_s27  ;;  %810 = vrot.lane.b32.xlu0 %v1559_v60, %s1337_s26 }
 0x144   : > { %823 = vrot.lane.b32.xlu1 %v1532_v50, %s1338_s27  ;;  %821 = vrot.lane.b32.xlu0 %v750_v54, %s1338_s27 }
 0x148   : > { %827 = vrot.lane.b32.xlu1 %v753_v58, %s1338_s27  ;;  %825 = vrot.lane.b32.xlu0 %v1539_v53, %s1338_s27 }
 0x14c   : > { %831 = vrot.lane.b32.xlu1 %v1559_v60, %s1338_s27  ;;  %829 = vrot.lane.b32.xlu0 %v1550_v57, %s1338_s27 }
 0x18a   : > { %v761_v61 = vpop.permute.xlu1 %760  ;;  %v757_v62 = vpop.permute.xlu0 %756 }
 0x18b   : > { %v770_v15 = vadd.f32 %v757_v62, %v749_v51  ;;  %v772_v19 = vadd.f32 %v761_v61, %v1532_v50 }
 0x18e   : > { %v763_v63 = vpop.permute.xlu1 %762  ;;  %v759_v0 = vpop.permute.xlu0 %758 }
 0x18f   : > { %v771_v20 = vadd.f32 %v759_v0, %v750_v54  ;;  %v773_v27 = vadd.f32 %v763_v63, %v1539_v53 }
 0x192   : > { %v767_v1 = vpop.permute.xlu1 %766  ;;  %v765_v2 = vpop.permute.xlu0 %764 }
 0x193   : > { %v774_v28 = vadd.f32 %v765_v2, %v753_v58  ;;  %v775_v39 = vadd.f32 %v767_v1, %v1550_v57 }
 0x196   : > { %v778_v3 = vpop.permute.xlu1 %777  ;;  %v769_v4 = vpop.permute.xlu0 %768 }
 0x197   : > { %v791_v18 = vadd.f32 %v778_v3, %v770_v15  ;;  %v776_v40 = vadd.f32 %v769_v4, %v1559_v60 }
 0x19a   : > { %v782_v5 = vpop.permute.xlu1 %781  ;;  %v780_v6 = vpop.permute.xlu0 %779 }
 0x19b   : > { %v793_v24 = vadd.f32 %v782_v5, %v772_v19  ;;  %v792_v25 = vadd.f32 %v780_v6, %v771_v20 }
 0x19e   : > { %v786_v7 = vpop.permute.xlu1 %785  ;;  %v784_v8 = vpop.permute.xlu0 %783 }
 0x19f   : > { %v794_v31 = vadd.f32 %v784_v8, %v773_v27  ;;  %v795_v36 = vadd.f32 %v786_v7, %v774_v28 }
 0x1a2   : > { %v790_v9 = vpop.permute.xlu1 %789  ;;  %v788_v10 = vpop.permute.xlu0 %787 }
 0x1a3   : > { %v797_v47 = vadd.f32 %v790_v9, %v776_v40  ;;  %v796_v50 = vadd.f32 %v788_v10, %v775_v39 }
 0x1a6   : > { %v801_v11 = vpop.permute.xlu1 %800  ;;  %v799_v12 = vpop.permute.xlu0 %798 }
 0x1a7   : > { %v812_v21 = vadd.f32 %v799_v12, %v791_v18  ;;  %v813_v29 = vadd.f32 %v801_v11, %v792_v25 }
 0x1aa   : > { %v805_v13 = vpop.permute.xlu1 %804  ;;  %v803_v14 = vpop.permute.xlu0 %802 }
 0x1ab   : > { %v814_v30 = vadd.f32 %v803_v14, %v793_v24  ;;  %v815_v41 = vadd.f32 %v805_v13, %v794_v31 }
 0x1ae   : > { %v809_v16 = vpop.permute.xlu1 %808  ;;  %v807_v17 = vpop.permute.xlu0 %806 }
 0x1af   : > { %v816_v42 = vadd.f32 %v807_v17, %v795_v36  ;;  %v817_v62 = vadd.f32 %v809_v16, %v796_v50 }
 0x1b2   : > { %v820_v22 = vpop.permute.xlu1 %819  ;;  %v811_v23 = vpop.permute.xlu0 %810 }
 0x1b3   : > { %v833_v26 = vadd.f32 %v820_v22, %v812_v21  ;;  %v818_v63 = vadd.f32 %v811_v23, %v797_v47 }
 0x1b5   : > { %v840_v32 = vmul.f32 2e-05, %v833_v26 }
 0x1b6   : > { %v824_v33 = vpop.permute.xlu1 %823  ;;  %v822_v34 = vpop.permute.xlu0 %821 }
 0x1b7   : > { %v847_v35 = vadd.f32 2.0, %v840_v32  ;;  %v835_v37 = vadd.f32 %v824_v33, %v814_v30  ;;  %v834_v38 = vadd.f32 %v822_v34, %v813_v29 }
 0x1b9   : > { %1248 = vlog2.f32 %v847_v35  ;;  %v842_v45 = vmul.f32 2e-05, %v835_v37  ;;  %v841_v46 = vmul.f32 2e-05, %v834_v38 }
 0x1ba   : > { %v828_v51 = vpop.permute.xlu1 %827  ;;  %v826_v52 = vpop.permute.xlu0 %825 }
 0x1bb   : > { %v849_v53 = vadd.f32 2.0, %v842_v45  ;;  %v848_v54 = vadd.f32 2.0, %v841_v46  ;;  %v837_v58 = vadd.f32 %v828_v51, %v816_v42  ;;  %v836_v61 = vadd.f32 %v826_v52, %v815_v41 }
 0x1bd   : > { %1250 = vlog2.f32 %v849_v53  ;;  %v844_v0 = vmul.f32 2e-05, %v837_v58  ;;  %v843_v57 = vmul.f32 2e-05, %v836_v61 }
 0x1be   : > { %1252 = vlog2.f32 %v848_v54  ;;  %v832_v60 = vpop.permute.xlu1 %831  ;;  %v830_v1 = vpop.permute.xlu0 %829 }
 0x1bf   : > { %v851_v2 = vadd.f32 2.0, %v844_v0  ;;  %v850_v3 = vadd.f32 2.0, %v843_v57  ;;  %v839_v4 = vadd.f32 %v832_v60, %v818_v63  ;;  %v838_v5 = vadd.f32 %v830_v1, %v817_v62 }
 0x1c1   : > { %1254 = vlog2.f32 %v851_v2  ;;  %v846_v6 = vmul.f32 2e-05, %v839_v4  ;;  %v845_v7 = vmul.f32 2e-05, %v838_v5 }
 0x1c2   : > { %1256 = vlog2.f32 %v850_v3 }
 0x1c3   : > { %v853_v8 = vadd.f32 2.0, %v846_v6  ;;  %v852_v9 = vadd.f32 2.0, %v845_v7 }
 0x1c5   : > { %1258 = vlog2.f32 %v853_v8 }
 0x1c6   : > { %v1249_v10 = vpop.eup %1248  ;;  %1260 = vlog2.f32 %v852_v9 }
 0x1c7   : > { %v855_v11 = vmul.f32 0.6931472, %v1249_v10 }
 0x1c9   : > { %v868_v12 = vmul.f32 -0.75, %v855_v11 }
 0x1ca   : > { %v1251_v13 = vpop.eup %1250 }
 0x1cb   : > { %v1253_v14 = vpop.eup %1252  ;;  %v875_v15 = vmul.f32 1.442695, %v868_v12  ;;  %v859_v16 = vmul.f32 0.6931472, %v1251_v13 }
 0x1cc   : > { %v857_v17 = vmul.f32 0.6931472, %v1253_v14 }
 0x1cd   : > { %1262 = vpow2.f32 %v875_v15  ;;  %v870_v18 = vmul.f32 -0.75, %v859_v16 }
 0x1ce   : > { %v1255_v19 = vpop.eup %1254  ;;  %v869_v20 = vmul.f32 -0.75, %v857_v17 }
 0x1cf   : > { %v1257_v21 = vpop.eup %1256  ;;  %v879_v22 = vmul.f32 1.442695, %v870_v18  ;;  %v863_v23 = vmul.f32 0.6931472, %v1255_v19 }
 0x1d0   : > { %v877_v24 = vmul.f32 1.442695, %v869_v20  ;;  %v861_v25 = vmul.f32 0.6931472, %v1257_v21 }
 0x1d1   : > { %1264 = vpow2.f32 %v879_v22  ;;  %v872_v26 = vmul.f32 -0.75, %v863_v23 }
 0x1d2   : > { %v1259_v27 = vpop.eup %1258  ;;  %1266 = vpow2.f32 %v877_v24  ;;  %v871_v28 = vmul.f32 -0.75, %v861_v25 }
 0x1d3   : > { %v1261_v29 = vpop.eup %1260  ;;  %v883_v30 = vmul.f32 1.442695, %v872_v26  ;;  %v867_v32 = vmul.f32 0.6931472, %v1259_v27 }
 0x1d4   : > { %v881_v31 = vmul.f32 1.442695, %v871_v28  ;;  %v865_v33 = vmul.f32 0.6931472, %v1261_v29 }
 0x1d5   : > { %1268 = vpow2.f32 %v883_v30  ;;  %v874_v34 = vmul.f32 -0.75, %v867_v32 }
 0x1d6   : > { %1270 = vpow2.f32 %v881_v31  ;;  %v873_v36 = vmul.f32 -0.75, %v865_v33 }
 0x1d7   : > { %v887_v35 = vmul.f32 1.442695, %v874_v34 }
 0x1d8   : > { %v885_v37 = vmul.f32 1.442695, %v873_v36 }
 0x1d9   : > { %1272 = vpow2.f32 %v887_v35 }
 0x1da   : > { %v1263_v38 = vpop.eup %1262  ;;  %1274 = vpow2.f32 %v885_v37 }
 0x1db   : > { %v889_v39 = vmul.f32 %v1263_v38, %v1524_v44 }
 0x1dd   : > { %896 = vst [vmem:[%s1424_s24] sm:$0xff] %v889_v39 }
 0x1de   : > { %v1265_v40 = vpop.eup %1264 }
 0x1df   : > { %v1267_v41 = vpop.eup %1266  ;;  %v891_v42 = vmul.f32 %v1265_v40, %v1522_v43 }
 0x1e0   : > { %v890_v45 = vmul.f32 %v1267_v41, %v1528_v49 }
 0x1e1   : > { %898 = vst [vmem:[%s1424_s24 + $0x10] sm:$0xff] %v891_v42 }
 0x1e2   : > { %v1269_v46 = vpop.eup %1268  ;;  %897 = vst [vmem:[%s1424_s24 + $0x8] sm:$0xff] %v890_v45 }
 0x1e3   : > { %v1271_v47 = vpop.eup %1270  ;;  %v893_v50 = vmul.f32 %v1269_v46, %v1545_v56 }
 0x1e4   : > { %v892_v51 = vmul.f32 %v1271_v47, %v1526_v48 }
 0x1e5   : > { %900 = vst [vmem:[%s1424_s24 + $0x20] sm:$0xff] %v893_v50 }
 0x1e6   : > { %v1273_v52 = vpop.eup %1272  ;;  %899 = vst [vmem:[%s1424_s24 + $0x18] sm:$0xff] %v892_v51 }
 0x1e7   : > { %v1275_v44 = vpop.eup %1274  ;;  %v895_v53 = vmul.f32 %v1273_v52, %v1554_v59 }
 0x1e8   : > { %v894_v54 = vmul.f32 %v1275_v44, %v1543_v55 }
 0x1e9   : > { %902 = vst [vmem:[%s1424_s24 + $0x30] sm:$0x3f] %v895_v53 }
 0x1ea   : > { %901 = vst [vmem:[%s1424_s24 + $0x28] sm:$0xff] %v894_v54 }
 0x1eb PF: > { %s13_s18 = sadd.s32 1, %s1330_s18   ;;  %s1617_s12 = smov %s1318_s15 }
 0x1ec   : > { %p10_p12 = scmp.ge.s32.totalorder %s13_s18, 326   ;;  %s1618_s13 = smov %s1322_s16 }
 0x1ed   : > { %s1619_s14 = smov %s1326_s17  ;;  %s1620_s15 = smov %s1624_s19 }
 0x1ee   : > { %s1621_s16 = smov %s1628_s20  ;;  %s1622_s17 = smov %s1632_s21 }
 0x1ef   :  { %12 = sbr.rel (!%p10_p12) target bundleno = 4 (0x4), region = 78 }

// kernel: alexnet_forward.12
= control target key start
LH: loop header
LB: loop body
LE: loop exit
PB: predicated region body
PF: predicated region fallthrough
CT: control target
= control target key end

     0   :  { %s491_s6 = smov 0   ;;  %s493_s7 = smov 0   ;;  %s585_s0 = inlined_call_operand.vmem [shape: f32[2,55,55,128], index: 0, kind: input, shape index: {}]   ;;  %s586_s1 = inlined_call_operand.vmem [shape: f32[2,27,27,128], index: 1, kind: output, shape index: {}]  }
   0x1   :  { %s495_s8 = smov 0   ;;  %s497_s9 = smov 0  }
   0x2   :  { %s499_s10 = smov 0   ;;  %s501_s11 = smov 0  }
   0x3   :  { %s503_s12 = smov 0  }
   0x4 LB: > { %s23_s13 = sadd.s32 1, %s466_s9  ;;  %s26_s14 = sadd.s32 1, %s470_s10  ;;  %s478_s12 = sphi %s503_s12, %s11_s12   ;;  %s474_s11 = sphi %s501_s11, %s592_s11   ;;  %s470_s10 = sphi %s499_s10, %s591_s10   ;;  %s466_s9 = sphi %s497_s9, %s590_s9   ;;  %s462_s8 = sphi %s495_s8, %s589_s8   ;;  %s458_s7 = sphi %s493_s7, %s588_s7   ;;  %s454_s6 = sphi %s491_s6, %s587_s6  }
   0x5   : > { %p24_p0 = scmp.ge.s32.totalorder %s23_s13, 3  ;;  %p344_p1 = scmp.ge.s32.totalorder %s478_s12, 1 }
   0x6   : > { %p122_p2 = scmp.lt.s32.totalorder %s478_s12, 163  ;;  %s30_s15 = sadd.s32 1, %s474_s11 }
   0x7   : > { %s594_s13 = smov (%p24_p0, %s23_s13), 0  ;;  %s596_s14 = smov (!%p24_p0, %s26_s14), %s470_s10 }
   0x8   : > { %p123_p3 = pnand %p344_p1, %p122_p2  ;;  %p28_p4 = scmp.ge.s32.totalorder %s596_s14, 27 }
   0x9   : > { %s345_s16 = sshll.u32 (!%p123_p3), %s458_s7, 1  ;;  %p154_p6 = scmp.lt.s32.totalorder (!%p123_p3), %s462_s8, 1 }
   0xa   : > { %s598_s14 = smov (%p28_p4, %s596_s14), 0  ;;  %s600_s15 = smov (!%p28_p4, %s30_s15), %s474_s11 }
   0xb   : > { %p32_p5 = scmp.ge.s32.totalorder %s600_s15, 2  ;;  %126 = sbr.rel (%p123_p3) target bundleno = 48 (0x30), region = 24 }
   0xc   : > { %s153_s17 = sadd.s32 (!%p123_p3), %s454_s6, %s345_s16  ;;  %p167_p7 = scmp.lt.s32.totalorder (!%p123_p3), %s458_s7, 26 }
   0xd   : > { %s602_s15 = smov (%p32_p5, %s600_s15), 0  ;;  %p156_p8 = scmp.lt.s32.totalorder (!%p123_p3), %s153_s17, 54 }
   0xe   : > { %p349_p9 = scmp.ne.s32.totalorder (!%p123_p3), %s454_s6, 0 }
  0x10   : > { %s604_s8 = smov (!%p154_p6, %s462_s8), 1  ;;  %s606_s17 = smov (!%p156_p8, %s153_s17), 54 }
  0x11   : > { %s365_s18 = smul.u32 385, %s604_s8  ;;  %s608_s7 = smov (!%p167_p7, %s458_s7), 26 }
  0x12   : > { %s364_s19 = smul.u32 7, %s606_s17  ;;  %s347_s20 = sshll.u32 %s608_s7, 2 }
  0x13   : > { %s366_s21 = smul.u32 108, %s604_s8 }
  0x14   : > { %s160_s22 = sadd.s32 %s365_s18, %s364_s19  ;;  %177 = sbr.rel (%p349_p9) target bundleno = 28 (0x1c), region = 28 }
  0x15   : > { %s346_s23 = sshll.u32 %s160_s22, 3  ;;  %s171_s24 = sadd.s32 %s366_s21, %s347_s20 }
  0x16   : > { %s539_s27 = scalar_lea.vmem %s585_s0, %s346_s23  ;;  %s348_s28 = sshll.u32 %s171_s24, 3 }
  0x17   : > { %s544_s2 = scalar_lea.vmem %s586_s1, %s348_s28 }
  0x19   : > { %v480_v0 = vmov -inf  }
  0x1a   : > { %178 = vst [vmem:[#allocation2 + $0x10] sm:$0xff] %v480_v0  ;;  %179 = vst [vmem:[#allocation2] sm:$0xff] %v480_v0 }
  0x1b   : > { %180 = vst [vmem:[#allocation2 + $0x18] sm:$0xff] %v480_v0  ;;  %181 = vst [vmem:[#allocation2 + $0x8] sm:$0x7] %v480_v0 }
  0x1c PF: > { %v182_v1 = vld [vmem:[%s539_s27] ss:$2 sm:$0xff]  ;;  %v353_v2 = vld [vmem:[%s539_s27 + $0x1] ss:$2 sm:$0xff]  ;;  %v350_v5 = vld [vmem:[%s539_s27 + $0x10] ss:$2 sm:$0xff] }
  0x1d   : > { %v357_v3 = vld [vmem:[%s539_s27 + $0x2] ss:$2 sm:$0xff]  ;;  %v197_v4 = vmax.f32 %v182_v1, %v353_v2  ;;  %v354_v6 = vld [vmem:[%s539_s27 + $0x11] ss:$2 sm:$0xff]  ;;  %v358_v9 = vld [vmem:[%s539_s27 + $0x12] ss:$2 sm:$0xff] }
  0x1e   : > { %v198_v8 = vmax.f32 %v350_v5, %v354_v6  ;;  %v351_v10 = vld [vmem:[%s539_s27 + $0x20] ss:$2 sm:$0xff]  ;;  %v355_v13 = vld [vmem:[%s539_s27 + $0x21] ss:$2 sm:$0xff]  ;;  %p361_p10 = scmp.ne.s32.totalorder %s454_s6, 2 }
  0x1f   : > { %v209_v11 = vmax.f32 %v197_v4, %v357_v3  ;;  %v359_v14 = vld [vmem:[%s539_s27 + $0x22] ss:$2 sm:$0xff]  ;;  %v199_v16 = vmax.f32 %v351_v10, %v355_v13  ;;  %v356_v18 = vld [vmem:[%s539_s27 + $0x31] ss:$2 sm:$0x7] }
  0x20   : > { %v210_v15 = vmax.f32 %v198_v8, %v358_v9  ;;  %v352_v17 = vld [vmem:[%s539_s27 + $0x30] ss:$2 sm:$0x7] }
  0x21   : > { %v213_v7 = vld [vmem:[#allocation2 + $0x10] sm:$0xff]  ;;  %v214_v12 = vld [vmem:[#allocation2] sm:$0xff]  ;;  %v200_v21 = vmax.f32 %v352_v17, %v356_v18  ;;  %v211_v24 = vmax.f32 %v199_v16, %v359_v14 }
  0x22   : > { %v217_v19 = vmax.f32 %v213_v7, %v209_v11  ;;  %v215_v20 = vld [vmem:[#allocation2 + $0x18] sm:$0xff]  ;;  %v360_v22 = vld [vmem:[%s539_s27 + $0x32] ss:$2 sm:$0x7]  ;;  %v218_v23 = vmax.f32 %v214_v12, %v210_v15  ;;  %v216_v25 = vld [vmem:[#allocation2 + $0x8] sm:$0x7] }
  0x23   : > { %v212_v26 = vmax.f32 %v200_v21, %v360_v22  ;;  %v219_v27 = vmax.f32 %v215_v20, %v211_v24  ;;  %228 = sbr.rel (%p361_p10) target bundleno = 48 (0x30), region = 32 }
  0x24   : > { %221 = vst [vmem:[#allocation2 + $0x10] sm:$0xff] %v217_v19  ;;  %222 = vst [vmem:[#allocation2] sm:$0xff] %v218_v23 }
  0x25   : > { %v220_v28 = vmax.f32 %v216_v25, %v212_v26  ;;  %223 = vst [vmem:[#allocation2 + $0x18] sm:$0xff] %v219_v27 }
  0x27   : > { %224 = vst [vmem:[#allocation2 + $0x8] sm:$0x7] %v220_v28 }
  0x2b   : > { %v229_v29 = vld [vmem:[#allocation2 + $0x10] sm:$0xff]  ;;  %v230_v30 = vld [vmem:[#allocation2] sm:$0xff] }
  0x2c   : > { %v231_v31 = vld [vmem:[#allocation2 + $0x18] sm:$0xff]  ;;  %233 = vst [vmem:[%s544_s2] sm:$0xff] %v229_v29  ;;  %234 = vst [vmem:[%s544_s2 + $0x8] sm:$0xff] %v230_v30 }
  0x2d   : > { %235 = vst [vmem:[%s544_s2 + $0x10] sm:$0xff] %v231_v31 }
  0x2e   : > { %v232_v32 = vld [vmem:[#allocation2 + $0x8] sm:$0x7] }
  0x2f   : > { %236 = vst [vmem:[%s544_s2 + $0x18] sm:$0x7] %v232_v32 }
  0x30 PF: > { %s11_s12 = sadd.s32 1, %s478_s12   ;;  %s587_s6 = smov %s466_s9 }
  0x31   : > { %p8_p11 = scmp.ge.s32.totalorder %s11_s12, 164   ;;  %s588_s7 = smov %s470_s10 }
  0x32   : > { %s589_s8 = smov %s474_s11  ;;  %s590_s9 = smov %s594_s13 }
  0x33   : > { %s591_s10 = smov %s598_s14  ;;  %s592_s11 = smov %s602_s15 }
  0x34   :  { %10 = sbr.rel (!%p8_p11) target bundleno = 4 (0x4), region = 73 }

// kernel: alexnet_forward.13
= control target key start
LH: loop header
LB: loop body
LE: loop exit
PB: predicated region body
PF: predicated region fallthrough
CT: control target
= control target key end

     0   :  { %s1297_s12 = smov 0   ;;  %s1299_s13 = smov 0   ;;  %s1474_s0 = inlined_call_operand.vmem [shape: f32[2,29,29,128], index: 0, kind: input, shape index: {}]   ;;  %s1475_s1 = inlined_call_operand.vmem [shape: f32[3,3,128,128], index: 1, kind: input, shape index: {}]   ;;  %s1476_s2 = inlined_call_operand.vmem [shape: f32[1,128], index: 2, kind: input, shape index: {}]   ;;  %s1477_s3 = inlined_call_operand.vmem [shape: f32[2,27,27,128], index: 3, kind: output, shape index: {}]  }
   0x1   :  { %s1301_s14 = smov 0   ;;  %s1303_s15 = smov 0  }
   0x2   :  { %s1305_s16 = smov 0   ;;  %s1307_s17 = smov 0  }
   0x3   :  { %s1309_s18 = smov 0  }
   0x4 LB: > { %s28_s19 = sadd.s32 1, %s1258_s15  ;;  %s35_s20 = sadd.s32 1, %s1262_s16  ;;  %s1270_s18 = sphi %s1309_s18, %s13_s18   ;;  %s1266_s17 = sphi %s1307_s17, %s1483_s17   ;;  %s1262_s16 = sphi %s1305_s16, %s1482_s16   ;;  %s1258_s15 = sphi %s1303_s15, %s1481_s15   ;;  %s1254_s14 = sphi %s1301_s14, %s1480_s14   ;;  %s1250_s13 = sphi %s1299_s13, %s1479_s13   ;;  %s1246_s12 = sphi %s1297_s12, %s1478_s12  }
   0x5   : > { %p29_p0 = scmp.ge.s32.totalorder %s28_s19, 3  ;;  %p887_p1 = scmp.ge.s32.totalorder %s1270_s18, 1 }
   0x6   : > { %p200_p2 = scmp.lt.s32.totalorder %s1270_s18, 163  ;;  %s39_s21 = sadd.s32 1, %s1266_s17 }
   0x7   : > { %s1485_s19 = smov (%p29_p0, %s28_s19), 0  ;;  %s1487_s20 = smov (!%p29_p0, %s35_s20), %s1262_s16 }
   0x8   : > { %p201_p3 = pnand %p887_p1, %p200_p2  ;;  %p37_p4 = scmp.ge.s32.totalorder %s1487_s20, 27 }
   0x9   : > { %s247_s22 = sadd.s32 (!%p201_p3), %s1246_s12, %s1250_s13  ;;  %p248_p6 = scmp.lt.s32.totalorder (!%p201_p3), %s1254_s14, 1 }
   0xa   : > { %s1489_s20 = smov (%p37_p4, %s1487_s20), 0  ;;  %s1491_s21 = smov (!%p37_p4, %s39_s21), %s1266_s17 }
   0xb   : > { %p41_p5 = scmp.ge.s32.totalorder %s1491_s21, 2  ;;  %204 = sbr.rel (%p201_p3) target bundleno = 500 (0x1f4), region = 32 }
   0xc   : > { %p250_p7 = scmp.lt.s32.totalorder (!%p201_p3), %s247_s22, 28  ;;  %p258_p8 = scmp.lt.s32.totalorder (!%p201_p3), %s1246_s12, 2 }
   0xd   : > { %s1493_s21 = smov (%p41_p5, %s1491_s21), 0  ;;  %p271_p9 = scmp.lt.s32.totalorder (!%p201_p3), %s1250_s13, 26 }
   0xe   : > { %p893_p10 = scmp.ne.s32.totalorder (!%p201_p3), %s1246_s12, 0 }
  0x10   : > { %s1495_s14 = smov (!%p248_p6, %s1254_s14), 1  ;;  %s1497_s22 = smov (!%p250_p7, %s247_s22), 28 }
  0x11   : > { %s1136_s23 = smul.u32 116, %s1495_s14  ;;  %s888_s24 = sshll.u32 %s1497_s22, 2 }
  0x12   : > { %s1138_s30 = smul.u32 108, %s1495_s14  ;;  %s1499_s13 = smov (!%p271_p9, %s1250_s13), 26 }
  0x13   : > { %s254_s25 = sadd.s32 %s1136_s23, %s888_s24  ;;  %s891_s6 = sshll.u32 %s1499_s13, 2 }
  0x14   : > { %s889_s26 = sshll.u32 %s254_s25, 3  ;;  %s278_s10 = sadd.s32 %s1138_s30, %s891_s6 }
  0x15   : > { %s1350_s29 = scalar_lea.vmem %s1474_s0, %s889_s26  ;;  %s892_s11 = sshll.u32 %s278_s10, 3 }
  0x16   : > { %s259_s4 = scalar_select %p258_p8, %s1246_s12, 2 }
  0x17   : > { %s1362_s24 = scalar_lea.vmem %s1477_s3, %s892_s11  ;;  %284 = sbr.rel (%p893_p10) target bundleno = 31 (0x1f), region = 36 }
  0x18   : > { %s1137_s5 = smul.u32 384, %s259_s4 }
  0x1a   : > { %s1357_s9 = scalar_lea.vmem %s1475_s1, %s1137_s5 }
  0x1c   : > { %v1272_v0 = vmov 0.0  }
  0x1d   : > { %285 = vst [vmem:[#allocation2 + $0x10] sm:$0xff] %v1272_v0  ;;  %286 = vst [vmem:[#allocation2] sm:$0xff] %v1272_v0 }
  0x1e   : > { %287 = vst [vmem:[#allocation2 + $0x18] sm:$0xff] %v1272_v0  ;;  %288 = vst [vmem:[#allocation2 + $0x8] sm:$0x7] %v1272_v0 }
  0x1f PF: > { %v312_v1 = vld [vmem:[%s1357_s9 + $0x78] sm:$0xff]  ;;  %v311_v3 = vld [vmem:[%s1357_s9 + $0x70] sm:$0xff]  ;;  %v310_v5 = vld [vmem:[%s1357_s9 + $0x68] sm:$0xff]  ;;  %p926_p11 = scmp.ne.s32.totalorder %s1246_s12, 2 }
  0x20   : > { %v909_v2 = vld [vmem:[%s1357_s9 + $0xf8] sm:$0xff]  ;;  %990 = vmatprep.subr.mxu0 %v312_v1  ;;  %v908_v4 = vld [vmem:[%s1357_s9 + $0xf0] sm:$0xff]  ;;  %v907_v6 = vld [vmem:[%s1357_s9 + $0xe8] sm:$0xff]  ;;  %s1273_s12 = smov (!%p926_p11), 1   ;;  %s1274_s25 = smov (!%p926_p11), 127  }
  0x21   : > { %1028 = vmatprep.subr.mxu1 %v909_v2  ;;  %991 = vmatpush3.msra.mxu0 %v312_v1  ;;  %v309_v7 = vld [vmem:[%s1357_s9 + $0x60] sm:$0xff]  ;;  %v308_v9 = vld [vmem:[%s1357_s9 + $0x58] sm:$0xff]  ;;  %v307_v11 = vld [vmem:[%s1357_s9 + $0x50] sm:$0xff]  ;;  %s1275_s26 = smov (!%p926_p11), 2   ;;  %s1276_s27 = smov (!%p926_p11), 126  }
  0x22   : > { %1029 = vmatpush3.msra.mxu1 %v909_v2  ;;  %992 = vmatprep.subr.mxu0 %v311_v3  ;;  %v906_v8 = vld [vmem:[%s1357_s9 + $0xe0] sm:$0xff]  ;;  %v905_v10 = vld [vmem:[%s1357_s9 + $0xd8] sm:$0xff]  ;;  %v904_v12 = vld [vmem:[%s1357_s9 + $0xd0] sm:$0xff] }
  0x23   : > { %1030 = vmatprep.subr.mxu1 %v908_v4  ;;  %993 = vmatpush3.msra.mxu0 %v311_v3  ;;  %v306_v13 = vld [vmem:[%s1357_s9 + $0x48] sm:$0xff]  ;;  %v305_v15 = vld [vmem:[%s1357_s9 + $0x40] sm:$0xff]  ;;  %v304_v17 = vld [vmem:[%s1357_s9 + $0x38] sm:$0xff] }
  0x24   : > { %1031 = vmatpush3.msra.mxu1 %v908_v4  ;;  %994 = vmatprep.subr.mxu0 %v310_v5  ;;  %v903_v14 = vld [vmem:[%s1357_s9 + $0xc8] sm:$0xff]  ;;  %v902_v16 = vld [vmem:[%s1357_s9 + $0xc0] sm:$0xff]  ;;  %v901_v18 = vld [vmem:[%s1357_s9 + $0xb8] sm:$0xff] }
  0x25   : > { %1032 = vmatprep.subr.mxu1 %v907_v6  ;;  %995 = vmatpush3.msra.mxu0 %v310_v5  ;;  %v303_v19 = vld [vmem:[%s1357_s9 + $0x30] sm:$0xff]  ;;  %v302_v21 = vld [vmem:[%s1357_s9 + $0x28] sm:$0xff]  ;;  %v301_v23 = vld [vmem:[%s1357_s9 + $0x20] sm:$0xff] }
  0x26   : > { %1033 = vmatpush3.msra.mxu1 %v907_v6  ;;  %996 = vmatprep.subr.mxu0 %v309_v7  ;;  %v900_v20 = vld [vmem:[%s1357_s9 + $0xb0] sm:$0xff]  ;;  %v899_v22 = vld [vmem:[%s1357_s9 + $0xa8] sm:$0xff]  ;;  %v898_v24 = vld [vmem:[%s1357_s9 + $0xa0] sm:$0xff] }
  0x27   : > { %1034 = vmatprep.subr.mxu1 %v906_v8  ;;  %997 = vmatpush3.msra.mxu0 %v309_v7  ;;  %v300_v25 = vld [vmem:[%s1357_s9 + $0x18] sm:$0xff]  ;;  %v299_v27 = vld [vmem:[%s1357_s9 + $0x10] sm:$0xff]  ;;  %v298_v29 = vld [vmem:[%s1357_s9 + $0x8] sm:$0xff] }
  0x28   : > { %1035 = vmatpush3.msra.mxu1 %v906_v8  ;;  %998 = vmatprep.subr.mxu0 %v308_v9  ;;  %v897_v26 = vld [vmem:[%s1357_s9 + $0x98] sm:$0xff]  ;;  %v896_v28 = vld [vmem:[%s1357_s9 + $0x90] sm:$0xff]  ;;  %v895_v30 = vld [vmem:[%s1357_s9 + $0x88] sm:$0xff] }
  0x29   : > { %1036 = vmatprep.subr.mxu1 %v905_v10  ;;  %999 = vmatpush3.msra.mxu0 %v308_v9  ;;  %v297_v31 = vld [vmem:[%s1357_s9] sm:$0xff]  ;;  %v294_v35 = vld [vmem:[%s1350_s29 + $0x8] sm:$0xff]  ;;  %v925_v37 = vld [vmem:[%s1357_s9 + $0x178] sm:$0xff] }
  0x2a   : > { %1037 = vmatpush3.msra.mxu1 %v905_v10  ;;  %1000 = vmatprep.subr.mxu0 %v307_v11  ;;  %v894_v32 = vld [vmem:[%s1357_s9 + $0x80] sm:$0xff]  ;;  %v403_v36 = vld [vmem:[%s1350_s29 + $0x9] sm:$0xff]  ;;  %v921_v41 = vld [vmem:[%s1357_s9 + $0x158] sm:$0xff] }
  0x2b   : > { %1038 = vmatprep.subr.mxu1 %v904_v12  ;;  %1001 = vmatpush3.msra.mxu0 %v307_v11  ;;  %v293_v33 = vld [vmem:[%s1350_s29] sm:$0xff]  ;;  %v924_v38 = vld [vmem:[%s1357_s9 + $0x170] sm:$0xff]  ;;  %v923_v39 = vld [vmem:[%s1357_s9 + $0x168] sm:$0xff] }
  0x2c   : > { %1039 = vmatpush3.msra.mxu1 %v904_v12  ;;  %1002 = vmatprep.subr.mxu0 %v306_v13  ;;  %v402_v34 = vld [vmem:[%s1350_s29 + $0x1] sm:$0xff]  ;;  %v920_v42 = vld [vmem:[%s1357_s9 + $0x150] sm:$0xff]  ;;  %v917_v45 = vld [vmem:[%s1357_s9 + $0x138] sm:$0xff] }
  0x2d   : > { %1040 = vmatprep.subr.mxu1 %v903_v14  ;;  %1003 = vmatpush3.msra.mxu0 %v306_v13  ;;  %v922_v40 = vld [vmem:[%s1357_s9 + $0x160] sm:$0xff]  ;;  %v919_v43 = vld [vmem:[%s1357_s9 + $0x148] sm:$0xff]  ;;  %v916_v46 = vld [vmem:[%s1357_s9 + $0x130] sm:$0xff] }
  0x2e   : > { %1041 = vmatpush3.msra.mxu1 %v903_v14  ;;  %1004 = vmatprep.subr.mxu0 %v305_v15  ;;  %v918_v44 = vld [vmem:[%s1357_s9 + $0x140] sm:$0xff]  ;;  %v915_v47 = vld [vmem:[%s1357_s9 + $0x128] sm:$0xff]  ;;  %v295_v49 = vld [vmem:[%s1350_s29 + $0x10] sm:$0xff] }
  0x2f   : > { %1042 = vmatprep.subr.mxu1 %v902_v16  ;;  %1005 = vmatpush3.msra.mxu0 %v305_v15  ;;  %v914_v48 = vld [vmem:[%s1357_s9 + $0x120] sm:$0xff]  ;;  %v296_v50 = vld [vmem:[%s1350_s29 + $0x18] sm:$0x7]  ;;  %v912_v53 = vld [vmem:[%s1357_s9 + $0x110] sm:$0xff] }
  0x30   : > { %1043 = vmatpush3.msra.mxu1 %v902_v16  ;;  %1006 = vmatprep.subr.mxu0 %v304_v17  ;;  %v913_v51 = vld [vmem:[%s1357_s9 + $0x118] sm:$0xff]  ;;  %v911_v55 = vld [vmem:[%s1357_s9 + $0x108] sm:$0xff]  ;;  %v910_v56 = vld [vmem:[%s1357_s9 + $0x100] sm:$0xff] }
  0x31   : > { %1044 = vmatprep.subr.mxu1 %v901_v18  ;;  %1007 = vmatpush3.msra.mxu0 %v304_v17  ;;  %v404_v52 = vld [vmem:[%s1350_s29 + $0x11] sm:$0xff]  ;;  %v405_v54 = vld [vmem:[%s1350_s29 + $0x19] sm:$0x7]  ;;  %v512_v57 = vld [vmem:[%s1350_s29 + $0x2] sm:$0xff] }
  0x32   : > { %1045 = vmatpush3.msra.mxu1 %v901_v18  ;;  %1008 = vmatprep.subr.mxu0 %v303_v19  ;;  %v514_v58 = vld [vmem:[%s1350_s29 + $0x12] sm:$0xff]  ;;  %v513_v59 = vld [vmem:[%s1350_s29 + $0xa] sm:$0xff]  ;;  %v515_v60 = vld [vmem:[%s1350_s29 + $0x1a] sm:$0x7] }
  0x33   : > { %1046 = vmatprep.subr.mxu1 %v900_v20  ;;  %1009 = vmatpush3.msra.mxu0 %v303_v19  ;;  %v290_v1 = vld [vmem:[#allocation2] sm:$0xff]  ;;  %v292_v3 = vld [vmem:[#allocation2 + $0x8] sm:$0x7]  ;;  %v289_v4 = vld [vmem:[#allocation2 + $0x10] sm:$0xff] }
  0x34   : > { %1047 = vmatpush3.msra.mxu1 %v900_v20  ;;  %1010 = vmatprep.subr.mxu0 %v302_v21  ;;  %v291_v5 = vld [vmem:[#allocation2 + $0x18] sm:$0xff] }
  0x35   : > { %1048 = vmatprep.subr.mxu1 %v899_v22  ;;  %1011 = vmatpush3.msra.mxu0 %v302_v21 }
  0x36   : > { %1049 = vmatpush3.msra.mxu1 %v899_v22  ;;  %1012 = vmatprep.subr.mxu0 %v301_v23 }
  0x37   : > { %1050 = vmatprep.subr.mxu1 %v898_v24  ;;  %1013 = vmatpush3.msra.mxu0 %v301_v23 }
  0x38   : > { %1051 = vmatpush3.msra.mxu1 %v898_v24  ;;  %1014 = vmatprep.subr.mxu0 %v300_v25 }
  0x39   : > { %1052 = vmatprep.subr.mxu1 %v897_v26  ;;  %1015 = vmatpush3.msra.mxu0 %v300_v25 }
  0x3a   : > { %1053 = vmatpush3.msra.mxu1 %v897_v26  ;;  %1016 = vmatprep.subr.mxu0 %v299_v27 }
  0x3b   : > { %1054 = vmatprep.subr.mxu1 %v896_v28  ;;  %1017 = vmatpush3.msra.mxu0 %v299_v27 }
  0x3c   : > { %1055 = vmatpush3.msra.mxu1 %v896_v28  ;;  %1018 = vmatprep.subr.mxu0 %v298_v29 }
  0x3d   : > { %1056 = vmatprep.subr.mxu1 %v895_v30  ;;  %1019 = vmatpush3.msra.mxu0 %v298_v29 }
  0x3e   : > { %1057 = vmatpush3.msra.mxu1 %v895_v30  ;;  %1020 = vmatprep.subr.mxu0 %v297_v31 }
  0x3f   : > { %1058 = vmatprep.subr.mxu1 %v894_v32  ;;  %1021 = vmatpush3.msra.mxu0 %v297_v31 }
  0x40   : > { %1022 = vmatprep.mubr.f32.mxu0 %v293_v33  ;;  %1059 = vmatpush3.msra.mxu1 %v894_v32 }
  0x41   : > { %1060 = vmatprep.mubr.f32.mxu1 %v402_v34  ;;  %1023 = vmatmul.mubr.f32.vlgmr.msra.gmra.mxu0 %v294_v35 }
  0x42   : > { %1061 = vmatmul.mubr.f32.vlgmr.msra.gmra.mxu1 %v403_v36  ;;  %1066 = vmatprep.subr.mxu0 %v925_v37 }
  0x43   : > { %1104 = vmatprep.subr.mxu1 %v925_v37  ;;  %1067 = vmatpush3.msra.mxu0 %v925_v37 }
  0x44   : > { %1120 = vmatpush3.msra.mxu1 %v925_v37  ;;  %1068 = vmatprep.subr.mxu0 %v924_v38 }
  0x45   : > { %1105 = vmatprep.subr.mxu1 %v924_v38  ;;  %1069 = vmatpush3.msra.mxu0 %v924_v38 }
  0x46   : > { %1121 = vmatpush3.msra.mxu1 %v924_v38  ;;  %1070 = vmatprep.subr.mxu0 %v923_v39 }
  0x47   : > { %1106 = vmatprep.subr.mxu1 %v923_v39  ;;  %1071 = vmatpush3.msra.mxu0 %v923_v39 }
  0x48   : > { %1122 = vmatpush3.msra.mxu1 %v923_v39  ;;  %1072 = vmatprep.subr.mxu0 %v922_v40 }
  0x49   : > { %1107 = vmatprep.subr.mxu1 %v922_v40  ;;  %1073 = vmatpush3.msra.mxu0 %v922_v40 }
  0x4a   : > { %1123 = vmatpush3.msra.mxu1 %v922_v40  ;;  %1074 = vmatprep.subr.mxu0 %v921_v41 }
  0x4b   : > { %1108 = vmatprep.subr.mxu1 %v921_v41  ;;  %1075 = vmatpush3.msra.mxu0 %v921_v41 }
  0x4c   : > { %1124 = vmatpush3.msra.mxu1 %v921_v41  ;;  %1076 = vmatprep.subr.mxu0 %v920_v42 }
  0x4d   : > { %1109 = vmatprep.subr.mxu1 %v920_v42  ;;  %1077 = vmatpush3.msra.mxu0 %v920_v42 }
  0x4e   : > { %1125 = vmatpush3.msra.mxu1 %v920_v42  ;;  %1078 = vmatprep.subr.mxu0 %v919_v43 }
  0x4f   : > { %1110 = vmatprep.subr.mxu1 %v919_v43  ;;  %1079 = vmatpush3.msra.mxu0 %v919_v43 }
  0x50   : > { %1126 = vmatpush3.msra.mxu1 %v919_v43  ;;  %1080 = vmatprep.subr.mxu0 %v918_v44 }
  0x51   : > { %1111 = vmatprep.subr.mxu1 %v918_v44  ;;  %1081 = vmatpush3.msra.mxu0 %v918_v44 }
  0x52   : > { %1127 = vmatpush3.msra.mxu1 %v918_v44  ;;  %1082 = vmatprep.subr.mxu0 %v917_v45 }
  0x53   : > { %1112 = vmatprep.subr.mxu1 %v917_v45  ;;  %1083 = vmatpush3.msra.mxu0 %v917_v45 }
  0x54   : > { %1128 = vmatpush3.msra.mxu1 %v917_v45  ;;  %1084 = vmatprep.subr.mxu0 %v916_v46 }
  0x55   : > { %1113 = vmatprep.subr.mxu1 %v916_v46  ;;  %1085 = vmatpush3.msra.mxu0 %v916_v46 }
  0x56   : > { %1129 = vmatpush3.msra.mxu1 %v916_v46  ;;  %1086 = vmatprep.subr.mxu0 %v915_v47 }
  0x57   : > { %1114 = vmatprep.subr.mxu1 %v915_v47  ;;  %1087 = vmatpush3.msra.mxu0 %v915_v47 }
  0x58   : > { %1130 = vmatpush3.msra.mxu1 %v915_v47  ;;  %1088 = vmatprep.subr.mxu0 %v914_v48 }
  0x59   : > { %1115 = vmatprep.subr.mxu1 %v914_v48  ;;  %1025 = vmatprep.mubr.f32.mxu0 %v295_v49 }
  0x5a   : > { %1089 = vmatpush3.msra.mxu0 %v914_v48  ;;  %1131 = vmatpush3.msra.mxu1 %v914_v48 }
  0x5b   : > { %1026 = vmatmul.mubr.f32.gmra.mxu0 %v296_v50  ;;  %1090 = vmatprep.subr.mxu0 %v913_v51 }
  0x5c   : > { %1116 = vmatprep.subr.mxu1 %v913_v51  ;;  %1063 = vmatprep.mubr.f32.mxu1 %v404_v52 }
  0x5d   : > { %1091 = vmatpush3.msra.mxu0 %v913_v51  ;;  %1132 = vmatpush3.msra.mxu1 %v913_v51 }
  0x5e   : > { %1092 = vmatprep.subr.mxu0 %v912_v53  ;;  %1064 = vmatmul.mubr.f32.gmra.mxu1 %v405_v54 }
  0x5f   : > { %1117 = vmatprep.subr.mxu1 %v912_v53  ;;  %1093 = vmatpush3.msra.mxu0 %v912_v53 }
  0x60   : > { %1133 = vmatpush3.msra.mxu1 %v912_v53  ;;  %1094 = vmatprep.subr.mxu0 %v911_v55 }
  0x61   : > { %1118 = vmatprep.subr.mxu1 %v911_v55  ;;  %1095 = vmatpush3.msra.mxu0 %v911_v55 }
  0x62   : > { %1134 = vmatpush3.msra.mxu1 %v911_v55  ;;  %1096 = vmatprep.subr.mxu0 %v910_v56 }
  0x63   : > { %1119 = vmatprep.subr.mxu1 %v910_v56  ;;  %1097 = vmatpush3.msra.mxu0 %v910_v56 }
  0x64   : > { %1135 = vmatpush3.msra.mxu1 %v910_v56  ;;  %1098 = vmatprep.mubr.f32.mxu0 %v512_v57 }
  0x65   : > { %1101 = vmatprep.mubr.f32.mxu1 %v514_v58  ;;  %1099 = vmatmul.mubr.f32.vlgmr.msra.gmra.mxu0 %v513_v59 }
  0x66   : > { %1102 = vmatmul.mubr.f32.vlgmr.msra.gmra.mxu1 %v515_v60 }
 0x101   : > { %v1024_v61 = vpop.f32.mrf.mxu0 }
 0x102   : > { %v1062_v62 = vpop.f32.mrf.mxu1  ;;  %v399_v8 = vadd.f32 %v1024_v61, %v290_v1 }
 0x103   : > { %v379_v63 = vpop.f32.mrf.mxu0 }
 0x104   : > { %v489_v2 = vpop.f32.mrf.mxu1  ;;  %v398_v10 = vadd.f32 %v379_v63, %v289_v4  ;;  %v509_v13 = vadd.f32 %v1062_v62, %v399_v8 }
 0x106   : > { %v508_v17 = vadd.f32 %v489_v2, %v398_v10 }
 0x11b   : > { %v1027_v0 = vpop.f32.mrf.mxu0 }
 0x11c   : > { %v401_v9 = vadd.f32 %v1027_v0, %v292_v3 }
 0x11d   : > { %v389_v6 = vpop.f32.mrf.mxu0 }
 0x11e   : > { %v1065_v7 = vpop.f32.mrf.mxu1  ;;  %v400_v11 = vadd.f32 %v389_v6, %v291_v5 }
 0x11f   : > { %v511_v14 = vadd.f32 %v1065_v7, %v401_v9 }
 0x120   : > { %v499_v12 = vpop.f32.mrf.mxu1 }
 0x121   : > { %v510_v18 = vadd.f32 %v499_v12, %v400_v11 }
 0x125   : > { %v1100_v15 = vpop.f32.mrf.mxu0 }
 0x126   : > { %v1103_v16 = vpop.f32.mrf.mxu1  ;;  %v619_v19 = vadd.f32 %v1100_v15, %v509_v13 }
 0x127   : > { %v621_v20 = vadd.f32 %v1103_v16, %v511_v14  ;;  %v599_v21 = vpop.f32.mrf.mxu0  ;;  %629 = sbr.rel (%p926_p11) target bundleno = 500 (0x1f4), region = 40 }
 0x128   : > { %v609_v22 = vpop.f32.mrf.mxu1  ;;  %623 = vst [vmem:[#allocation2] sm:$0xff] %v619_v19  ;;  %v618_v23 = vadd.f32 %v599_v21, %v508_v17 }
 0x129   : > { %625 = vst [vmem:[#allocation2 + $0x8] sm:$0x7] %v621_v20  ;;  %v620_v24 = vadd.f32 %v609_v22, %v510_v18 }
 0x12a   : > { %622 = vst [vmem:[#allocation2 + $0x10] sm:$0xff] %v618_v23 }
 0x12b   : > { %624 = vst [vmem:[#allocation2 + $0x18] sm:$0xff] %v620_v24 }
 0x12c   : > { %v927_v26 = vld [vmem:[%s1476_s2] ss:$0 sm:$0xff] }
 0x12f   : > { %v631_v31 = vld [vmem:[#allocation2] sm:$0xff] }
 0x130   : > { %v633_v30 = vld [vmem:[#allocation2 + $0x8] sm:$0x7]  ;;  %v642_v33 = vadd.f32 %v927_v26, %v631_v31 }
 0x131   : > { %v630_v27 = vld [vmem:[#allocation2 + $0x10] sm:$0xff]  ;;  %v644_v32 = vadd.f32 %v927_v26, %v633_v30 }
 0x132   : > { %v632_v25 = vld [vmem:[#allocation2 + $0x18] sm:$0xff]  ;;  %v641_v29 = vadd.f32 %v927_v26, %v630_v27  ;;  %v1435_v37 = vmax.f32 %v642_v33, 0.0 }
 0x133   : > { %v643_v28 = vadd.f32 %v927_v26, %v632_v25  ;;  %v1433_v36 = vmax.f32 %v644_v32, 0.0 }
 0x134   : > { %v1431_v35 = vmax.f32 %v641_v29, 0.0  ;;  %v650_v41 = vmul.f32 %v1435_v37, %v1435_v37 }
 0x135   : > { %v1429_v34 = vmax.f32 %v643_v28, 0.0  ;;  %v652_v40 = vmul.f32 %v1433_v36, %v1433_v36 }
 0x136   : > { %v649_v39 = vmul.f32 %v1431_v35, %v1431_v35 }
 0x137   : > { %v651_v38 = vmul.f32 %v1429_v34, %v1429_v34 }
 0x138   : > { %653 = vrot.lane.b32.xlu0 %v649_v39, %s1273_s12 }
 0x139   : > { %657 = vrot.lane.b32.xlu1 %v651_v38, %s1273_s12 }
 0x13c   : > { %655 = vrot.lane.b32.xlu0 %v650_v41, %s1273_s12 }
 0x13d   : > { %659 = vrot.lane.b32.xlu1 %v652_v40, %s1273_s12 }
 0x140   : > { %665 = vrot.lane.b32.xlu0 %v649_v39, %s1274_s25 }
 0x141   : > { %667 = vrot.lane.b32.xlu1 %v650_v41, %s1274_s25 }
 0x144   : > { %669 = vrot.lane.b32.xlu0 %v651_v38, %s1274_s25 }
 0x145   : > { %671 = vrot.lane.b32.xlu1 %v652_v40, %s1274_s25 }
 0x148   : > { %677 = vrot.lane.b32.xlu0 %v649_v39, %s1275_s26 }
 0x149   : > { %679 = vrot.lane.b32.xlu1 %v650_v41, %s1275_s26 }
 0x14c   : > { %681 = vrot.lane.b32.xlu0 %v651_v38, %s1275_s26 }
 0x14d   : > { %683 = vrot.lane.b32.xlu1 %v652_v40, %s1275_s26 }
 0x150   : > { %689 = vrot.lane.b32.xlu0 %v649_v39, %s1276_s27 }
 0x151   : > { %691 = vrot.lane.b32.xlu1 %v650_v41, %s1276_s27 }
 0x154   : > { %693 = vrot.lane.b32.xlu0 %v651_v38, %s1276_s27 }
 0x155   : > { %695 = vrot.lane.b32.xlu1 %v652_v40, %s1276_s27 }
 0x1aa   : > { %v654_v43 = vpop.permute.xlu0 %653 }
 0x1ab   : > { %v658_v42 = vpop.permute.xlu1 %657  ;;  %v661_v52 = vadd.f32 %v654_v43, %v649_v39 }
 0x1ac   : > { %v663_v58 = vadd.f32 %v658_v42, %v651_v38 }
 0x1ae   : > { %v656_v45 = vpop.permute.xlu0 %655 }
 0x1af   : > { %v660_v44 = vpop.permute.xlu1 %659  ;;  %v662_v53 = vadd.f32 %v656_v45, %v650_v41 }
 0x1b0   : > { %v664_v59 = vadd.f32 %v660_v44, %v652_v40 }
 0x1b2   : > { %v666_v47 = vpop.permute.xlu0 %665 }
 0x1b3   : > { %v668_v46 = vpop.permute.xlu1 %667  ;;  %v673_v57 = vadd.f32 %v666_v47, %v661_v52 }
 0x1b4   : > { %v674_v56 = vadd.f32 %v668_v46, %v662_v53 }
 0x1b6   : > { %v670_v49 = vpop.permute.xlu0 %669 }
 0x1b7   : > { %v672_v48 = vpop.permute.xlu1 %671  ;;  %v675_v1 = vadd.f32 %v670_v49, %v663_v58 }
 0x1b8   : > { %v676_v0 = vadd.f32 %v672_v48, %v664_v59 }
 0x1ba   : > { %v678_v51 = vpop.permute.xlu0 %677 }
 0x1bb   : > { %v680_v50 = vpop.permute.xlu1 %679  ;;  %v685_v61 = vadd.f32 %v678_v51, %v673_v57 }
 0x1bc   : > { %v686_v60 = vadd.f32 %v680_v50, %v674_v56 }
 0x1be   : > { %v682_v55 = vpop.permute.xlu0 %681 }
 0x1bf   : > { %v684_v54 = vpop.permute.xlu1 %683  ;;  %v687_v5 = vadd.f32 %v682_v55, %v675_v1 }
 0x1c0   : > { %v688_v4 = vadd.f32 %v684_v54, %v676_v0 }
 0x1c2   : > { %v690_v63 = vpop.permute.xlu0 %689 }
 0x1c3   : > { %v692_v62 = vpop.permute.xlu1 %691  ;;  %v697_v3 = vadd.f32 %v690_v63, %v685_v61 }
 0x1c4   : > { %v698_v2 = vadd.f32 %v692_v62, %v686_v60 }
 0x1c5   : > { %v701_v7 = vmul.f32 2e-05, %v697_v3 }
 0x1c6   : > { %v702_v6 = vmul.f32 2e-05, %v698_v2  ;;  %v694_v9 = vpop.permute.xlu0 %693 }
 0x1c7   : > { %v696_v8 = vpop.permute.xlu1 %695  ;;  %v705_v11 = vadd.f32 2.0, %v701_v7  ;;  %v699_v13 = vadd.f32 %v694_v9, %v687_v5 }
 0x1c8   : > { %v706_v10 = vadd.f32 2.0, %v702_v6  ;;  %v700_v12 = vadd.f32 %v696_v8, %v688_v4 }
 0x1c9   : > { %v703_v15 = vmul.f32 2e-05, %v699_v13 }
 0x1ca   : > { %1200 = vlog2.f32 %v706_v10  ;;  %v704_v14 = vmul.f32 2e-05, %v700_v12 }
 0x1cb   : > { %1202 = vlog2.f32 %v705_v11  ;;  %v707_v17 = vadd.f32 2.0, %v703_v15 }
 0x1cc   : > { %v708_v16 = vadd.f32 2.0, %v704_v14 }
 0x1ce   : > { %1204 = vlog2.f32 %v708_v16 }
 0x1cf   : > { %1206 = vlog2.f32 %v707_v17 }
 0x1d7   : > { %v1201_v18 = vpop.eup %1200 }
 0x1d8   : > { %v1203_v19 = vpop.eup %1202  ;;  %v712_v20 = vmul.f32 0.6931472, %v1201_v18 }
 0x1d9   : > { %v710_v21 = vmul.f32 0.6931472, %v1203_v19 }
 0x1da   : > { %v718_v22 = vmul.f32 -0.75, %v712_v20 }
 0x1db   : > { %v1205_v23 = vpop.eup %1204  ;;  %v717_v24 = vmul.f32 -0.75, %v710_v21 }
 0x1dc   : > { %v1207_v25 = vpop.eup %1206  ;;  %v723_v26 = vmul.f32 1.442695, %v718_v22  ;;  %v716_v27 = vmul.f32 0.6931472, %v1205_v23 }
 0x1dd   : > { %v721_v28 = vmul.f32 1.442695, %v717_v24  ;;  %v714_v29 = vmul.f32 0.6931472, %v1207_v25 }
 0x1de   : > { %1208 = vpow2.f32 %v723_v26  ;;  %v720_v30 = vmul.f32 -0.75, %v716_v27 }
 0x1df   : > { %1210 = vpow2.f32 %v721_v28  ;;  %v719_v31 = vmul.f32 -0.75, %v714_v29 }
 0x1e0   : > { %v727_v32 = vmul.f32 1.442695, %v720_v30 }
 0x1e1   : > { %v725_v33 = vmul.f32 1.442695, %v719_v31 }
 0x1e2   : > { %1212 = vpow2.f32 %v727_v32 }
 0x1e3   : > { %1214 = vpow2.f32 %v725_v33 }
 0x1eb   : > { %v1209_v38 = vpop.eup %1208 }
 0x1ec   : > { %v1211_v39 = vpop.eup %1210  ;;  %v730_v40 = vmul.f32 %v1209_v38, %v1435_v37 }
 0x1ed   : > { %v729_v41 = vmul.f32 %v1211_v39, %v1431_v35 }
 0x1ee   : > { %734 = vst [vmem:[%s1362_s24 + $0x8] sm:$0xff] %v730_v40 }
 0x1ef   : > { %v1213_v42 = vpop.eup %1212  ;;  %733 = vst [vmem:[%s1362_s24] sm:$0xff] %v729_v41 }
 0x1f0   : > { %v1215_v43 = vpop.eup %1214  ;;  %v732_v44 = vmul.f32 %v1213_v42, %v1433_v36 }
 0x1f1   : > { %v731_v45 = vmul.f32 %v1215_v43, %v1429_v34 }
 0x1f2   : > { %736 = vst [vmem:[%s1362_s24 + $0x18] sm:$0x7] %v732_v44 }
 0x1f3   : > { %735 = vst [vmem:[%s1362_s24 + $0x10] sm:$0xff] %v731_v45 }
 0x1f4 PF: > { %s13_s18 = sadd.s32 1, %s1270_s18   ;;  %s1478_s12 = smov %s1258_s15 }
 0x1f5   : > { %p10_p12 = scmp.ge.s32.totalorder %s13_s18, 164   ;;  %s1479_s13 = smov %s1262_s16 }
 0x1f6   : > { %s1480_s14 = smov %s1266_s17  ;;  %s1481_s15 = smov %s1485_s19 }
 0x1f7   : > { %s1482_s16 = smov %s1489_s20  ;;  %s1483_s17 = smov %s1493_s21 }
 0x1f8   :  { %12 = sbr.rel (!%p10_p12) target bundleno = 4 (0x4), region = 78 }

// kernel: alexnet_forward.14
= control target key start
LH: loop header
LB: loop body
LE: loop exit
PB: predicated region body
PF: predicated region fallthrough
CT: control target
= control target key end

     0   :  { %s457_s6 = smov 0   ;;  %s459_s7 = smov 0   ;;  %s531_s0 = inlined_call_operand.vmem [shape: f32[2,27,27,128], index: 0, kind: input, shape index: {}]   ;;  %s532_s1 = inlined_call_operand.vmem [shape: f32[2,13,13,128], index: 1, kind: output, shape index: {}]  }
   0x1   :  { %s461_s8 = smov 0   ;;  %s463_s9 = smov 0  }
   0x2   :  { %s465_s10 = smov 0   ;;  %s467_s11 = smov 0  }
   0x3   :  { %s469_s12 = smov 0  }
   0x4 LB: > { %s23_s13 = sadd.s32 1, %s432_s9  ;;  %s26_s14 = sadd.s32 1, %s436_s10  ;;  %s444_s12 = sphi %s469_s12, %s11_s12   ;;  %s440_s11 = sphi %s467_s11, %s538_s11   ;;  %s436_s10 = sphi %s465_s10, %s537_s10   ;;  %s432_s9 = sphi %s463_s9, %s536_s9   ;;  %s428_s8 = sphi %s461_s8, %s535_s8   ;;  %s424_s7 = sphi %s459_s7, %s534_s7   ;;  %s420_s6 = sphi %s457_s6, %s533_s6  }
   0x5   : > { %p24_p0 = scmp.ge.s32.totalorder %s23_s13, 3  ;;  %p316_p1 = scmp.ge.s32.totalorder %s444_s12, 1 }
   0x6   : > { %p122_p2 = scmp.lt.s32.totalorder %s444_s12, 79  ;;  %s30_s15 = sadd.s32 1, %s440_s11 }
   0x7   : > { %s540_s13 = smov (%p24_p0, %s23_s13), 0  ;;  %s542_s14 = smov (!%p24_p0, %s26_s14), %s436_s10 }
   0x8   : > { %p123_p3 = pnand %p316_p1, %p122_p2  ;;  %p28_p4 = scmp.ge.s32.totalorder %s542_s14, 13 }
   0x9   : > { %s317_s16 = sshll.u32 (!%p123_p3), %s424_s7, 1  ;;  %p154_p6 = scmp.lt.s32.totalorder (!%p123_p3), %s428_s8, 1 }
   0xa   : > { %s544_s14 = smov (%p28_p4, %s542_s14), 0  ;;  %s546_s15 = smov (!%p28_p4, %s30_s15), %s440_s11 }
   0xb   : > { %p32_p5 = scmp.ge.s32.totalorder %s546_s15, 2  ;;  %126 = sbr.rel (%p123_p3) target bundleno = 47 (0x2f), region = 24 }
   0xc   : > { %s153_s17 = sadd.s32 (!%p123_p3), %s420_s6, %s317_s16  ;;  %p167_p7 = scmp.lt.s32.totalorder (!%p123_p3), %s424_s7, 12 }
   0xd   : > { %s548_s15 = smov (%p32_p5, %s546_s15), 0  ;;  %p156_p8 = scmp.lt.s32.totalorder (!%p123_p3), %s153_s17, 26 }
   0xe   : > { %p322_p9 = scmp.ne.s32.totalorder (!%p123_p3), %s420_s6, 0 }
  0x10   : > { %s550_s8 = smov (!%p154_p6, %s428_s8), 1  ;;  %s552_s17 = smov (!%p156_p8, %s153_s17), 26 }
  0x11   : > { %s331_s18 = smul.u32 108, %s550_s8  ;;  %s554_s7 = smov (!%p167_p7, %s424_s7), 12 }
  0x12   : > { %s318_s19 = sshll.u32 %s552_s17, 2  ;;  %s332_s20 = smul.u32 26, %s550_s8 }
  0x13   : > { %s160_s21 = sadd.s32 %s331_s18, %s318_s19  ;;  %s320_s22 = sshll.u32 %s554_s7, 1 }
  0x14   : > { %s319_s23 = sshll.u32 %s160_s21, 3  ;;  %s171_s24 = sadd.s32 %s332_s20, %s320_s22 }
  0x15   : > { %s162_s27 = scalar_lea.vmem %s531_s0, %s319_s23  ;;  %s321_s28 = sshll.u32 %s171_s24, 3 }
  0x16   : > { %s173_s2 = scalar_lea.vmem %s532_s1, %s321_s28  ;;  %177 = sbr.rel (%p322_p9) target bundleno = 29 (0x1d), region = 28 }
  0x1b   : > { %v446_v0 = vmov -inf  }
  0x1c   : > { %178 = vst [vmem:[#allocation2] sm:$0xff] %v446_v0  ;;  %179 = vst [vmem:[#allocation2 + $0x8] sm:$0x1f] %v446_v0 }
  0x1d PF: > { %v180_v1 = vld [vmem:[%s162_s27] ss:$2 sm:$0xff]  ;;  %v324_v2 = vld [vmem:[%s162_s27 + $0x1] ss:$2 sm:$0xff]  ;;  %p328_p10 = scmp.ne.s32.totalorder %s420_s6, 2 }
  0x1e   : > { %v326_v3 = vld [vmem:[%s162_s27 + $0x2] ss:$2 sm:$0xff]  ;;  %v187_v4 = vmax.f32 %v180_v1, %v324_v2  ;;  %v325_v7 = vld [vmem:[%s162_s27 + $0x11] ss:$2 sm:$0x1f] }
  0x1f   : > { %v323_v6 = vld [vmem:[%s162_s27 + $0x10] ss:$2 sm:$0x1f] }
  0x20   : > { %v327_v8 = vld [vmem:[%s162_s27 + $0x12] ss:$2 sm:$0x1f]  ;;  %v193_v9 = vmax.f32 %v187_v4, %v326_v3  ;;  %v188_v10 = vmax.f32 %v323_v6, %v325_v7 }
  0x22   : > { %v194_v13 = vmax.f32 %v188_v10, %v327_v8  ;;  %204 = sbr.rel (%p328_p10) target bundleno = 47 (0x2f), region = 32 }
  0x23   : > { %v195_v5 = vld [vmem:[#allocation2] sm:$0xff]  ;;  %v196_v11 = vld [vmem:[#allocation2 + $0x8] sm:$0x1f] }
  0x24   : > { %v197_v12 = vmax.f32 %v195_v5, %v193_v9  ;;  %v198_v14 = vmax.f32 %v196_v11, %v194_v13 }
  0x26   : > { %199 = vst [vmem:[#allocation2] sm:$0xff] %v197_v12  ;;  %200 = vst [vmem:[#allocation2 + $0x8] sm:$0x1f] %v198_v14 }
  0x2d   : > { %v205_v15 = vld [vmem:[#allocation2] sm:$0xff]  ;;  %v206_v16 = vld [vmem:[#allocation2 + $0x8] sm:$0x1f] }
  0x2e   : > { %207 = vst [vmem:[%s173_s2] sm:$0xff] %v205_v15  ;;  %208 = vst [vmem:[%s173_s2 + $0x8] sm:$0x1f] %v206_v16 }
  0x2f PF: > { %s11_s12 = sadd.s32 1, %s444_s12   ;;  %s533_s6 = smov %s432_s9 }
  0x30   : > { %p8_p11 = scmp.ge.s32.totalorder %s11_s12, 80   ;;  %s534_s7 = smov %s436_s10 }
  0x31   : > { %s535_s8 = smov %s440_s11  ;;  %s536_s9 = smov %s540_s13 }
  0x32   : > { %s537_s10 = smov %s544_s14  ;;  %s538_s11 = smov %s548_s15 }
  0x33   :  { %10 = sbr.rel (!%p8_p11) target bundleno = 4 (0x4), region = 67 }

// kernel: alexnet_forward.18
= control target key start
LH: loop header
LB: loop body
LE: loop exit
PB: predicated region body
PF: predicated region fallthrough
CT: control target
= control target key end

     0   :  { %s431_s6 = smov 0   ;;  %s433_s7 = smov 0   ;;  %s505_s0 = inlined_call_operand.vmem [shape: f32[2,13,13,128], index: 0, kind: input, shape index: {}]   ;;  %s506_s1 = inlined_call_operand.vmem [shape: f32[2,6,6,128], index: 1, kind: output, shape index: {}]  }
   0x1   :  { %s435_s8 = smov 0   ;;  %s437_s9 = smov 0  }
   0x2   :  { %s439_s10 = smov 0   ;;  %s441_s11 = smov 0  }
   0x3   :  { %s443_s12 = smov 0  }
   0x4 LB: > { %s23_s13 = sadd.s32 1, %s406_s9  ;;  %s26_s14 = sadd.s32 1, %s410_s10  ;;  %s418_s12 = sphi %s443_s12, %s11_s12   ;;  %s414_s11 = sphi %s441_s11, %s512_s11   ;;  %s410_s10 = sphi %s439_s10, %s511_s10   ;;  %s406_s9 = sphi %s437_s9, %s510_s9   ;;  %s402_s8 = sphi %s435_s8, %s509_s8   ;;  %s398_s7 = sphi %s433_s7, %s508_s7   ;;  %s394_s6 = sphi %s431_s6, %s507_s6  }
   0x5   : > { %p24_p0 = scmp.ge.s32.totalorder %s23_s13, 3  ;;  %p294_p1 = scmp.ge.s32.totalorder %s418_s12, 1 }
   0x6   : > { %p122_p2 = scmp.lt.s32.totalorder %s418_s12, 37  ;;  %s30_s15 = sadd.s32 1, %s414_s11 }
   0x7   : > { %s514_s13 = smov (%p24_p0, %s23_s13), 0  ;;  %s516_s14 = smov (!%p24_p0, %s26_s14), %s410_s10 }
   0x8   : > { %p123_p3 = pnand %p294_p1, %p122_p2  ;;  %p28_p4 = scmp.ge.s32.totalorder %s516_s14, 6 }
   0x9   : > { %s295_s16 = sshll.u32 (!%p123_p3), %s398_s7, 1  ;;  %p153_p6 = scmp.lt.s32.totalorder (!%p123_p3), %s402_s8, 1 }
   0xa   : > { %s518_s14 = smov (%p28_p4, %s516_s14), 0  ;;  %s520_s15 = smov (!%p28_p4, %s30_s15), %s414_s11 }
   0xb   : > { %p32_p5 = scmp.ge.s32.totalorder %s520_s15, 2  ;;  %126 = sbr.rel (%p123_p3) target bundleno = 44 (0x2c), region = 24 }
   0xc   : > { %s152_s17 = sadd.s32 (!%p123_p3), %s394_s6, %s295_s16  ;;  %p166_p7 = scmp.lt.s32.totalorder (!%p123_p3), %s398_s7, 5 }
   0xd   : > { %s522_s15 = smov (%p32_p5, %s520_s15), 0  ;;  %p155_p8 = scmp.lt.s32.totalorder (!%p123_p3), %s152_s17, 12 }
   0xe   : > { %p299_p9 = scmp.ne.s32.totalorder (!%p123_p3), %s394_s6, 0 }
  0x10   : > { %s524_s8 = smov (!%p153_p6, %s402_s8), 1  ;;  %s526_s17 = smov (!%p155_p8, %s152_s17), 12 }
  0x11   : > { %s305_s18 = smul.u32 26, %s524_s8  ;;  %s528_s7 = smov (!%p166_p7, %s398_s7), 5 }
  0x12   : > { %s296_s19 = sshll.u32 %s526_s17, 1  ;;  %s306_s20 = smul.u32 6, %s524_s8 }
  0x13   : > { %s159_s21 = sadd.s32 %s305_s18, %s296_s19  ;;  %175 = sbr.rel (%p299_p9) target bundleno = 26 (0x1a), region = 28 }
  0x14   : > { %s297_s22 = sshll.u32 %s159_s21, 3  ;;  %s169_s23 = sadd.s32 %s306_s20, %s528_s7 }
  0x15   : > { %s161_s26 = scalar_lea.vmem %s505_s0, %s297_s22  ;;  %s298_s27 = sshll.u32 %s169_s23, 3 }
  0x16   : > { %s171_s30 = scalar_lea.vmem %s506_s1, %s298_s27 }
  0x18   : > { %v420_v0 = vmov -inf  }
  0x19   : > { %176 = vst [vmem:[#allocation2] sm:$0x3f] %v420_v0 }
  0x1a PF: > { %v177_v1 = vld [vmem:[%s161_s26] ss:$2 sm:$0x3f]  ;;  %v300_v2 = vld [vmem:[%s161_s26 + $0x1] ss:$2 sm:$0x3f] }
  0x1b   : > { %v180_v3 = vmax.f32 %v177_v1, %v300_v2  ;;  %v301_v4 = vld [vmem:[%s161_s26 + $0x2] ss:$2 sm:$0x3f]  ;;  %p302_p10 = scmp.ne.s32.totalorder %s394_s6, 2 }
  0x1d   : > { %v183_v6 = vmax.f32 %v180_v3, %v301_v4 }
  0x1f   : > { %190 = sbr.rel (%p302_p10) target bundleno = 44 (0x2c), region = 32 }
  0x20   : > { %v184_v5 = vld [vmem:[#allocation2] sm:$0x3f] }
  0x21   : > { %v185_v7 = vmax.f32 %v184_v5, %v183_v6 }
  0x23   : > { %186 = vst [vmem:[#allocation2] sm:$0x3f] %v185_v7 }
  0x2a   : > { %v191_v8 = vld [vmem:[#allocation2] sm:$0x3f] }
  0x2b   : > { %192 = vst [vmem:[%s171_s30] sm:$0x3f] %v191_v8 }
  0x2c PF: > { %s11_s12 = sadd.s32 1, %s418_s12   ;;  %s507_s6 = smov %s406_s9 }
  0x2d   : > { %p8_p11 = scmp.ge.s32.totalorder %s11_s12, 38   ;;  %s508_s7 = smov %s410_s10 }
  0x2e   : > { %s509_s8 = smov %s414_s11  ;;  %s510_s9 = smov %s514_s13 }
  0x2f   : > { %s511_s10 = smov %s518_s14  ;;  %s512_s11 = smov %s522_s15 }
  0x30   :  { %10 = sbr.rel (!%p8_p11) target bundleno = 4 (0x4), region = 64 }

// kernel: alexnet_forward.15
= control target key start
LH: loop header
LB: loop body
LE: loop exit
PB: predicated region body
PF: predicated region fallthrough
CT: control target
= control target key end

     0   :  { %s1086_s12 = smov 0   ;;  %s1088_s13 = smov 0   ;;  %s1235_s0 = inlined_call_operand.vmem [shape: f32[2,15,15,128], index: 0, kind: input, shape index: {}]   ;;  %s1236_s1 = inlined_call_operand.vmem [shape: f32[3,3,128,128], index: 1, kind: input, shape index: {}]   ;;  %s1237_s2 = inlined_call_operand.vmem [shape: f32[1,128], index: 2, kind: input, shape index: {}]   ;;  %s1238_s3 = inlined_call_operand.vmem [shape: f32[2,13,13,128], index: 3, kind: output, shape index: {}]  }
   0x1   :  { %s1090_s14 = smov 0   ;;  %s1092_s15 = smov 0  }
   0x2   :  { %s1094_s16 = smov 0   ;;  %s1096_s17 = smov 0  }
   0x3   :  { %s1098_s18 = smov 0  }
   0x4 LB: > { %s28_s19 = sadd.s32 1, %s1051_s15  ;;  %s35_s20 = sadd.s32 1, %s1055_s16  ;;  %s1063_s18 = sphi %s1098_s18, %s13_s18   ;;  %s1059_s17 = sphi %s1096_s17, %s1244_s17   ;;  %s1055_s16 = sphi %s1094_s16, %s1243_s16   ;;  %s1051_s15 = sphi %s1092_s15, %s1242_s15   ;;  %s1047_s14 = sphi %s1090_s14, %s1241_s14   ;;  %s1043_s13 = sphi %s1088_s13, %s1240_s13   ;;  %s1039_s12 = sphi %s1086_s12, %s1239_s12  }
   0x5   : > { %p29_p0 = scmp.ge.s32.totalorder %s28_s19, 3  ;;  %p747_p1 = scmp.ge.s32.totalorder %s1063_s18, 1 }
   0x6   : > { %p200_p2 = scmp.lt.s32.totalorder %s1063_s18, 79  ;;  %s39_s21 = sadd.s32 1, %s1059_s17 }
   0x7   : > { %s1246_s19 = smov (%p29_p0, %s28_s19), 0  ;;  %s1248_s20 = smov (!%p29_p0, %s35_s20), %s1055_s16 }
   0x8   : > { %p201_p3 = pnand %p747_p1, %p200_p2  ;;  %p37_p4 = scmp.ge.s32.totalorder %s1248_s20, 13 }
   0x9   : > { %s247_s22 = sadd.s32 (!%p201_p3), %s1039_s12, %s1043_s13  ;;  %p248_p6 = scmp.lt.s32.totalorder (!%p201_p3), %s1047_s14, 1 }
   0xa   : > { %s1250_s20 = smov (%p37_p4, %s1248_s20), 0  ;;  %s1252_s21 = smov (!%p37_p4, %s39_s21), %s1059_s17 }
   0xb   : > { %p41_p5 = scmp.ge.s32.totalorder %s1252_s21, 2  ;;  %204 = sbr.rel (%p201_p3) target bundleno = 306 (0x132), region = 32 }
   0xc   : > { %p250_p7 = scmp.lt.s32.totalorder (!%p201_p3), %s247_s22, 14  ;;  %p258_p8 = scmp.lt.s32.totalorder (!%p201_p3), %s1039_s12, 2 }
   0xd   : > { %s1254_s21 = smov (%p41_p5, %s1252_s21), 0  ;;  %p271_p9 = scmp.lt.s32.totalorder (!%p201_p3), %s1043_s13, 12 }
   0xe   : > { %p753_p10 = scmp.ne.s32.totalorder (!%p201_p3), %s1039_s12, 0 }
  0x10   : > { %s1256_s14 = smov (!%p248_p6, %s1047_s14), 1  ;;  %s1258_s22 = smov (!%p250_p7, %s247_s22), 14 }
  0x11   : > { %s949_s23 = smul.u32 30, %s1256_s14  ;;  %s748_s24 = sshll.u32 %s1258_s22, 1 }
  0x12   : > { %s951_s30 = smul.u32 26, %s1256_s14  ;;  %s1260_s13 = smov (!%p271_p9, %s1043_s13), 12 }
  0x13   : > { %s254_s25 = sadd.s32 %s949_s23, %s748_s24  ;;  %s751_s6 = sshll.u32 %s1260_s13, 1 }
  0x14   : > { %s749_s26 = sshll.u32 %s254_s25, 3  ;;  %s278_s10 = sadd.s32 %s951_s30, %s751_s6 }
  0x15   : > { %s1139_s29 = scalar_lea.vmem %s1235_s0, %s749_s26  ;;  %s752_s11 = sshll.u32 %s278_s10, 3 }
  0x16   : > { %s259_s4 = scalar_select %p258_p8, %s1039_s12, 2 }
  0x17   : > { %s1151_s24 = scalar_lea.vmem %s1238_s3, %s752_s11  ;;  %284 = sbr.rel (%p753_p10) target bundleno = 30 (0x1e), region = 36 }
  0x18   : > { %s950_s5 = smul.u32 384, %s259_s4 }
  0x1a   : > { %s1146_s9 = scalar_lea.vmem %s1236_s1, %s950_s5 }
  0x1c   : > { %v1065_v0 = vmov 0.0  }
  0x1d   : > { %285 = vst [vmem:[#allocation2] sm:$0xff] %v1065_v0  ;;  %286 = vst [vmem:[#allocation2 + $0x8] sm:$0x1f] %v1065_v0 }
  0x1e PF: > { %v306_v1 = vld [vmem:[%s1146_s9 + $0x78] sm:$0xff]  ;;  %v305_v2 = vld [vmem:[%s1146_s9 + $0x70] sm:$0xff]  ;;  %v304_v5 = vld [vmem:[%s1146_s9 + $0x68] sm:$0xff]  ;;  %p786_p11 = scmp.ne.s32.totalorder %s1039_s12, 2 }
  0x1f   : > { %v769_v3 = vld [vmem:[%s1146_s9 + $0xf8] sm:$0xff]  ;;  %844 = vmatprep.subr.mxu0 %v306_v1  ;;  %v768_v4 = vld [vmem:[%s1146_s9 + $0xf0] sm:$0xff]  ;;  %v767_v6 = vld [vmem:[%s1146_s9 + $0xe8] sm:$0xff] }
  0x20   : > { %879 = vmatprep.subr.mxu1 %v769_v3  ;;  %845 = vmatpush3.msra.mxu0 %v306_v1  ;;  %v303_v7 = vld [vmem:[%s1146_s9 + $0x60] sm:$0xff]  ;;  %v302_v9 = vld [vmem:[%s1146_s9 + $0x58] sm:$0xff]  ;;  %v301_v11 = vld [vmem:[%s1146_s9 + $0x50] sm:$0xff] }
  0x21   : > { %880 = vmatpush3.msra.mxu1 %v769_v3  ;;  %846 = vmatprep.subr.mxu0 %v305_v2  ;;  %v766_v8 = vld [vmem:[%s1146_s9 + $0xe0] sm:$0xff]  ;;  %v765_v10 = vld [vmem:[%s1146_s9 + $0xd8] sm:$0xff]  ;;  %v764_v12 = vld [vmem:[%s1146_s9 + $0xd0] sm:$0xff] }
  0x22   : > { %881 = vmatprep.subr.mxu1 %v768_v4  ;;  %847 = vmatpush3.msra.mxu0 %v305_v2  ;;  %v300_v13 = vld [vmem:[%s1146_s9 + $0x48] sm:$0xff]  ;;  %v299_v15 = vld [vmem:[%s1146_s9 + $0x40] sm:$0xff]  ;;  %v298_v17 = vld [vmem:[%s1146_s9 + $0x38] sm:$0xff] }
  0x23   : > { %882 = vmatpush3.msra.mxu1 %v768_v4  ;;  %848 = vmatprep.subr.mxu0 %v304_v5  ;;  %v763_v14 = vld [vmem:[%s1146_s9 + $0xc8] sm:$0xff]  ;;  %v762_v16 = vld [vmem:[%s1146_s9 + $0xc0] sm:$0xff]  ;;  %v761_v18 = vld [vmem:[%s1146_s9 + $0xb8] sm:$0xff] }
  0x24   : > { %883 = vmatprep.subr.mxu1 %v767_v6  ;;  %849 = vmatpush3.msra.mxu0 %v304_v5  ;;  %v297_v19 = vld [vmem:[%s1146_s9 + $0x30] sm:$0xff]  ;;  %v296_v21 = vld [vmem:[%s1146_s9 + $0x28] sm:$0xff]  ;;  %v295_v23 = vld [vmem:[%s1146_s9 + $0x20] sm:$0xff] }
  0x25   : > { %884 = vmatpush3.msra.mxu1 %v767_v6  ;;  %850 = vmatprep.subr.mxu0 %v303_v7  ;;  %v760_v20 = vld [vmem:[%s1146_s9 + $0xb0] sm:$0xff]  ;;  %v759_v22 = vld [vmem:[%s1146_s9 + $0xa8] sm:$0xff]  ;;  %v758_v24 = vld [vmem:[%s1146_s9 + $0xa0] sm:$0xff] }
  0x26   : > { %885 = vmatprep.subr.mxu1 %v766_v8  ;;  %851 = vmatpush3.msra.mxu0 %v303_v7  ;;  %v294_v25 = vld [vmem:[%s1146_s9 + $0x18] sm:$0xff]  ;;  %v293_v27 = vld [vmem:[%s1146_s9 + $0x10] sm:$0xff]  ;;  %v292_v29 = vld [vmem:[%s1146_s9 + $0x8] sm:$0xff] }
  0x27   : > { %886 = vmatpush3.msra.mxu1 %v766_v8  ;;  %852 = vmatprep.subr.mxu0 %v302_v9  ;;  %v757_v26 = vld [vmem:[%s1146_s9 + $0x98] sm:$0xff]  ;;  %v756_v28 = vld [vmem:[%s1146_s9 + $0x90] sm:$0xff]  ;;  %v755_v30 = vld [vmem:[%s1146_s9 + $0x88] sm:$0xff] }
  0x28   : > { %887 = vmatprep.subr.mxu1 %v765_v10  ;;  %853 = vmatpush3.msra.mxu0 %v302_v9  ;;  %v289_v31 = vld [vmem:[%s1139_s29] sm:$0xff]  ;;  %v290_v34 = vld [vmem:[%s1139_s29 + $0x8] sm:$0x1f]  ;;  %v785_v35 = vld [vmem:[%s1146_s9 + $0x178] sm:$0xff] }
  0x29   : > { %888 = vmatpush3.msra.mxu1 %v765_v10  ;;  %854 = vmatprep.subr.mxu0 %v301_v11  ;;  %v291_v32 = vld [vmem:[%s1146_s9] sm:$0xff]  ;;  %v385_v37 = vld [vmem:[%s1139_s29 + $0x9] sm:$0x1f]  ;;  %v784_v38 = vld [vmem:[%s1146_s9 + $0x170] sm:$0xff] }
  0x2a   : > { %889 = vmatprep.subr.mxu1 %v764_v12  ;;  %855 = vmatpush3.msra.mxu0 %v301_v11  ;;  %v754_v33 = vld [vmem:[%s1146_s9 + $0x80] sm:$0xff]  ;;  %v783_v40 = vld [vmem:[%s1146_s9 + $0x168] sm:$0xff]  ;;  %v781_v42 = vld [vmem:[%s1146_s9 + $0x158] sm:$0xff] }
  0x2b   : > { %890 = vmatpush3.msra.mxu1 %v764_v12  ;;  %856 = vmatprep.subr.mxu0 %v300_v13  ;;  %v384_v36 = vld [vmem:[%s1139_s29 + $0x1] sm:$0xff]  ;;  %v780_v43 = vld [vmem:[%s1146_s9 + $0x150] sm:$0xff]  ;;  %v777_v46 = vld [vmem:[%s1146_s9 + $0x138] sm:$0xff] }
  0x2c   : > { %891 = vmatprep.subr.mxu1 %v763_v14  ;;  %857 = vmatpush3.msra.mxu0 %v300_v13  ;;  %v480_v39 = vld [vmem:[%s1139_s29 + $0x2] sm:$0xff]  ;;  %v776_v47 = vld [vmem:[%s1146_s9 + $0x130] sm:$0xff]  ;;  %v773_v50 = vld [vmem:[%s1146_s9 + $0x118] sm:$0xff] }
  0x2d   : > { %892 = vmatpush3.msra.mxu1 %v763_v14  ;;  %858 = vmatprep.subr.mxu0 %v299_v15  ;;  %v782_v41 = vld [vmem:[%s1146_s9 + $0x160] sm:$0xff]  ;;  %v779_v44 = vld [vmem:[%s1146_s9 + $0x148] sm:$0xff]  ;;  %v772_v51 = vld [vmem:[%s1146_s9 + $0x110] sm:$0xff] }
  0x2e   : > { %893 = vmatprep.subr.mxu1 %v762_v16  ;;  %859 = vmatpush3.msra.mxu0 %v299_v15  ;;  %v778_v45 = vld [vmem:[%s1146_s9 + $0x140] sm:$0xff]  ;;  %v775_v48 = vld [vmem:[%s1146_s9 + $0x128] sm:$0xff] }
  0x2f   : > { %894 = vmatpush3.msra.mxu1 %v762_v16  ;;  %860 = vmatprep.subr.mxu0 %v298_v17  ;;  %v774_v49 = vld [vmem:[%s1146_s9 + $0x120] sm:$0xff]  ;;  %v771_v52 = vld [vmem:[%s1146_s9 + $0x108] sm:$0xff] }
  0x30   : > { %895 = vmatprep.subr.mxu1 %v761_v18  ;;  %861 = vmatpush3.msra.mxu0 %v298_v17  ;;  %v770_v53 = vld [vmem:[%s1146_s9 + $0x100] sm:$0xff]  ;;  %v481_v54 = vld [vmem:[%s1139_s29 + $0xa] sm:$0x1f] }
  0x31   : > { %896 = vmatpush3.msra.mxu1 %v761_v18  ;;  %862 = vmatprep.subr.mxu0 %v297_v19  ;;  %v288_v56 = vld [vmem:[#allocation2 + $0x8] sm:$0x1f]  ;;  %v287_v57 = vld [vmem:[#allocation2] sm:$0xff] }
  0x32   : > { %897 = vmatprep.subr.mxu1 %v760_v20  ;;  %863 = vmatpush3.msra.mxu0 %v297_v19 }
  0x33   : > { %898 = vmatpush3.msra.mxu1 %v760_v20  ;;  %864 = vmatprep.subr.mxu0 %v296_v21 }
  0x34   : > { %899 = vmatprep.subr.mxu1 %v759_v22  ;;  %865 = vmatpush3.msra.mxu0 %v296_v21 }
  0x35   : > { %900 = vmatpush3.msra.mxu1 %v759_v22  ;;  %866 = vmatprep.subr.mxu0 %v295_v23 }
  0x36   : > { %901 = vmatprep.subr.mxu1 %v758_v24  ;;  %867 = vmatpush3.msra.mxu0 %v295_v23 }
  0x37   : > { %902 = vmatpush3.msra.mxu1 %v758_v24  ;;  %868 = vmatprep.subr.mxu0 %v294_v25 }
  0x38   : > { %903 = vmatprep.subr.mxu1 %v757_v26  ;;  %869 = vmatpush3.msra.mxu0 %v294_v25 }
  0x39   : > { %904 = vmatpush3.msra.mxu1 %v757_v26  ;;  %870 = vmatprep.subr.mxu0 %v293_v27 }
  0x3a   : > { %905 = vmatprep.subr.mxu1 %v756_v28  ;;  %871 = vmatpush3.msra.mxu0 %v293_v27 }
  0x3b   : > { %906 = vmatpush3.msra.mxu1 %v756_v28  ;;  %872 = vmatprep.subr.mxu0 %v292_v29 }
  0x3c   : > { %907 = vmatprep.subr.mxu1 %v755_v30  ;;  %873 = vmatpush3.msra.mxu0 %v292_v29 }
  0x3d   : > { %876 = vmatprep.mubr.f32.mxu0 %v289_v31  ;;  %874 = vmatprep.subr.mxu0 %v291_v32 }
  0x3e   : > { %908 = vmatpush3.msra.mxu1 %v755_v30  ;;  %875 = vmatpush3.msra.mxu0 %v291_v32 }
  0x3f   : > { %909 = vmatprep.subr.mxu1 %v754_v33  ;;  %877 = vmatmul.mubr.f32.vlgmr.msra.gmra.mxu0 %v290_v34 }
  0x40   : > { %914 = vmatprep.subr.mxu0 %v785_v35  ;;  %910 = vmatpush3.msra.mxu1 %v754_v33 }
  0x41   : > { %911 = vmatprep.mubr.f32.mxu1 %v384_v36  ;;  %915 = vmatpush3.msra.mxu0 %v785_v35 }
  0x42   : > { %912 = vmatmul.mubr.f32.vlgmr.msra.gmra.mxu1 %v385_v37  ;;  %916 = vmatprep.subr.mxu0 %v784_v38 }
  0x43   : > { %946 = vmatprep.mubr.f32.mxu0 %v480_v39  ;;  %917 = vmatpush3.msra.mxu0 %v784_v38 }
  0x44   : > { %918 = vmatprep.subr.mxu0 %v783_v40 }
  0x45   : > { %919 = vmatpush3.msra.mxu0 %v783_v40 }
  0x46   : > { %920 = vmatprep.subr.mxu0 %v782_v41 }
  0x47   : > { %921 = vmatpush3.msra.mxu0 %v782_v41 }
  0x48   : > { %922 = vmatprep.subr.mxu0 %v781_v42 }
  0x49   : > { %923 = vmatpush3.msra.mxu0 %v781_v42 }
  0x4a   : > { %924 = vmatprep.subr.mxu0 %v780_v43 }
  0x4b   : > { %925 = vmatpush3.msra.mxu0 %v780_v43 }
  0x4c   : > { %926 = vmatprep.subr.mxu0 %v779_v44 }
  0x4d   : > { %927 = vmatpush3.msra.mxu0 %v779_v44 }
  0x4e   : > { %928 = vmatprep.subr.mxu0 %v778_v45 }
  0x4f   : > { %929 = vmatpush3.msra.mxu0 %v778_v45 }
  0x50   : > { %930 = vmatprep.subr.mxu0 %v777_v46 }
  0x51   : > { %931 = vmatpush3.msra.mxu0 %v777_v46 }
  0x52   : > { %932 = vmatprep.subr.mxu0 %v776_v47 }
  0x53   : > { %933 = vmatpush3.msra.mxu0 %v776_v47 }
  0x54   : > { %934 = vmatprep.subr.mxu0 %v775_v48 }
  0x55   : > { %935 = vmatpush3.msra.mxu0 %v775_v48 }
  0x56   : > { %936 = vmatprep.subr.mxu0 %v774_v49 }
  0x57   : > { %937 = vmatpush3.msra.mxu0 %v774_v49 }
  0x58   : > { %938 = vmatprep.subr.mxu0 %v773_v50 }
  0x59   : > { %939 = vmatpush3.msra.mxu0 %v773_v50 }
  0x5a   : > { %940 = vmatprep.subr.mxu0 %v772_v51 }
  0x5b   : > { %941 = vmatpush3.msra.mxu0 %v772_v51 }
  0x5c   : > { %942 = vmatprep.subr.mxu0 %v771_v52 }
  0x5d   : > { %943 = vmatpush3.msra.mxu0 %v771_v52 }
  0x5e   : > { %944 = vmatprep.subr.mxu0 %v770_v53 }
  0x5f   : > { %945 = vmatpush3.msra.mxu0 %v770_v53 }
  0x60   : > { %947 = vmatmul.mubr.f32.vlgmr.msra.gmra.mxu0 %v481_v54 }
  0xff   : > { %v878_v55 = vpop.f32.mrf.mxu0 }
 0x100   : > { %v383_v60 = vadd.f32 %v878_v55, %v288_v56 }
 0x101   : > { %v373_v58 = vpop.f32.mrf.mxu0 }
 0x102   : > { %v913_v59 = vpop.f32.mrf.mxu1  ;;  %v382_v61 = vadd.f32 %v373_v58, %v287_v57 }
 0x103   : > { %v479_v63 = vadd.f32 %v913_v59, %v383_v60 }
 0x104   : > { %v469_v62 = vpop.f32.mrf.mxu1 }
 0x105   : > { %v478_v1 = vadd.f32 %v469_v62, %v382_v61 }
 0x120   : > { %v948_v0 = vpop.f32.mrf.mxu0 }
 0x121   : > { %v575_v2 = vadd.f32 %v948_v0, %v479_v63  ;;  %581 = sbr.rel (%p786_p11) target bundleno = 306 (0x132), region = 40 }
 0x122   : > { %v565_v3 = vpop.f32.mrf.mxu0 }
 0x123   : > { %577 = vst [vmem:[#allocation2 + $0x8] sm:$0x1f] %v575_v2  ;;  %v574_v4 = vadd.f32 %v565_v3, %v478_v1 }
 0x125   : > { %576 = vst [vmem:[#allocation2] sm:$0xff] %v574_v4 }
 0x126   : > { %v787_v6 = vld [vmem:[%s1237_s2] ss:$0 sm:$0xff] }
 0x12a   : > { %v583_v7 = vld [vmem:[#allocation2 + $0x8] sm:$0x1f] }
 0x12b   : > { %v592_v9 = vadd.f32 %v787_v6, %v583_v7 }
 0x12c   : > { %v582_v5 = vld [vmem:[#allocation2] sm:$0xff] }
 0x12d   : > { %v591_v8 = vadd.f32 %v787_v6, %v582_v5  ;;  %v594_v11 = vmax.f32 %v592_v9, 0.0 }
 0x12f   : > { %v593_v10 = vmax.f32 %v591_v8, 0.0  ;;  %596 = vst [vmem:[%s1151_s24 + $0x8] sm:$0x1f] %v594_v11 }
 0x131   : > { %595 = vst [vmem:[%s1151_s24] sm:$0xff] %v593_v10 }
 0x132 PF: > { %s13_s18 = sadd.s32 1, %s1063_s18   ;;  %s1239_s12 = smov %s1051_s15 }
 0x133   : > { %p10_p12 = scmp.ge.s32.totalorder %s13_s18, 80   ;;  %s1240_s13 = smov %s1055_s16 }
 0x134   : > { %s1241_s14 = smov %s1059_s17  ;;  %s1242_s15 = smov %s1246_s19 }
 0x135   : > { %s1243_s16 = smov %s1250_s20  ;;  %s1244_s17 = smov %s1254_s21 }
 0x136   :  { %12 = sbr.rel (!%p10_p12) target bundleno = 4 (0x4), region = 78 }

// kernel: alexnet_forward.19
= control target key start
LH: loop header
LB: loop body
LE: loop exit
PB: predicated region body
PF: predicated region fallthrough
CT: control target
= control target key end

     0   :  { %s2402_s12 = smov 0   ;;  %s2404_s13 = smov 0   ;;  %s2969_s0 = inlined_call_operand.vmem [shape: f32[2,576], index: 0, kind: input, shape index: {}]   ;;  %s2970_s1 = inlined_call_operand.vmem [shape: bf16[576,4096], index: 1, kind: input, shape index: {}]   ;;  %s2971_s2 = inlined_call_operand.vmem [shape: f32[1,4096], index: 2, kind: input, shape index: {}]   ;;  %s2972_s3 = inlined_call_operand.vmem [shape: f32[2,4096], index: 3, kind: output, shape index: {}]  }
   0x1   :  { %s2406_s14 = smov 0   ;;  %s2408_s15 = smov 0  }
   0x2   :  { %s2410_s16 = smov 0  }
   0x3 LB: > { %s28_s17 = sadd.s32 1, %s2374_s15  ;;  %p76_p1 = scmp.ne.s32.totalorder %s2366_s13, %s2362_s12  ;;  %s2378_s16 = sphi %s2410_s16, %s13_s16   ;;  %s2374_s15 = sphi %s2408_s15, %s2976_s15   ;;  %s2370_s14 = sphi %s2406_s14, %s2975_s14   ;;  %s2366_s13 = sphi %s2404_s13, %s2974_s13   ;;  %s2362_s12 = sphi %s2402_s12, %s2973_s12  }
   0x4   : > { %p30_p0 = scmp.ge.s32.totalorder %s28_s17, 8  ;;  %p77_p2 = scmp.eq.s32.totalorder %s2378_s16, 0 }
   0x5   : > { %s69_s19 = sadd.s32 1, %s2366_s13  ;;  %p1922_p5 = scmp.ge.s32.totalorder %s2378_s16, 8 }
   0x6   : > { %s2978_s17 = smov (%p30_p0, %s28_s17), 0  ;;  %p78_p3 = por %p77_p2, %p76_p1 }
   0x7   : > { %s65_s18 = ssub.s32 %s2374_s15, %s2978_s17  ;;  %169 = sbr.rel (%p1922_p5) target bundleno = 88 (0x58), region = 20 }
   0x8   : > { %p67_p4 = scmp.eq.s32.totalorder %s65_s18, 0 }
   0xa   : > { %s2437_s20 = scalar_select %p67_p4, %s2366_s13, %s69_s19  }
   0xc   : > { %172 = sbr.rel (!%p78_p3) target bundleno = 88 (0x58), region = 24  ;;  %s174_s21 = sand.u32 (%p78_p3), 1, %s2366_s13  }
   0xd   : > { %s2078_s22 = sshll.u32 (%p78_p3), %s2374_s15, 4  ;;  %s2079_s23 = smul.u32 (%p78_p3), 1152, %s174_s21 }
   0xe   : > { %s2445_s26 = scalar_lea.vmem (%p78_p3), %s2970_s1, %s2078_s22 }
   0xf   : > { %v195_v0 = vld [vmem:[%s2445_s26] sm:$0xff] (%p78_p3)  ;;  %v197_v1 = vld [vmem:[%s2445_s26 + $0x8] sm:$0xff] (%p78_p3)  ;;  %s2453_s27 = scalar_lea.vmem (%p78_p3), [#allocation3], %s2079_s23 }
  0x10   : > { %v199_v2 = vld [vmem:[%s2445_s26 + $0x80] sm:$0xff] (%p78_p3)  ;;  %v201_v3 = vld [vmem:[%s2445_s26 + $0x88] sm:$0xff] (%p78_p3)  ;;  %196 = vst [vmem:[%s2453_s27] sm:$0xff] (%p78_p3), %v195_v0  ;;  %198 = vst [vmem:[%s2453_s27 + $0x8] sm:$0xff] (%p78_p3), %v197_v1 }
  0x11   : > { %v203_v4 = vld [vmem:[%s2445_s26 + $0x100] sm:$0xff]  ;;  %v205_v5 = vld [vmem:[%s2445_s26 + $0x108] sm:$0xff]  ;;  %200 = vst [vmem:[%s2453_s27 + $0x10] sm:$0xff] %v199_v2  ;;  %202 = vst [vmem:[%s2453_s27 + $0x18] sm:$0xff] %v201_v3 }
  0x12   : > { %204 = vst [vmem:[%s2453_s27 + $0x20] sm:$0xff] %v203_v4  ;;  %206 = vst [vmem:[%s2453_s27 + $0x28] sm:$0xff] %v205_v5  ;;  %v207_v6 = vld [vmem:[%s2445_s26 + $0x180] sm:$0xff]  ;;  %v209_v7 = vld [vmem:[%s2445_s26 + $0x188] sm:$0xff] }
  0x13   : > { %v211_v8 = vld [vmem:[%s2445_s26 + $0x200] sm:$0xff]  ;;  %208 = vst [vmem:[%s2453_s27 + $0x30] sm:$0xff] %v207_v6  ;;  %210 = vst [vmem:[%s2453_s27 + $0x38] sm:$0xff] %v209_v7  ;;  %v213_v9 = vld [vmem:[%s2445_s26 + $0x208] sm:$0xff] }
  0x14   : > { %212 = vst [vmem:[%s2453_s27 + $0x40] sm:$0xff] %v211_v8  ;;  %v215_v10 = vld [vmem:[%s2445_s26 + $0x280] sm:$0xff]  ;;  %v217_v11 = vld [vmem:[%s2445_s26 + $0x288] sm:$0xff]  ;;  %214 = vst [vmem:[%s2453_s27 + $0x48] sm:$0xff] %v213_v9 }
  0x15   : > { %216 = vst [vmem:[%s2453_s27 + $0x50] sm:$0xff] %v215_v10  ;;  %218 = vst [vmem:[%s2453_s27 + $0x58] sm:$0xff] %v217_v11  ;;  %v219_v12 = vld [vmem:[%s2445_s26 + $0x300] sm:$0xff]  ;;  %v221_v13 = vld [vmem:[%s2445_s26 + $0x308] sm:$0xff] }
  0x16   : > { %v223_v14 = vld [vmem:[%s2445_s26 + $0x380] sm:$0xff]  ;;  %220 = vst [vmem:[%s2453_s27 + $0x60] sm:$0xff] %v219_v12  ;;  %222 = vst [vmem:[%s2453_s27 + $0x68] sm:$0xff] %v221_v13  ;;  %v225_v15 = vld [vmem:[%s2445_s26 + $0x388] sm:$0xff] }
  0x17   : > { %224 = vst [vmem:[%s2453_s27 + $0x70] sm:$0xff] %v223_v14  ;;  %v227_v16 = vld [vmem:[%s2445_s26 + $0x400] sm:$0xff]  ;;  %v229_v17 = vld [vmem:[%s2445_s26 + $0x408] sm:$0xff]  ;;  %226 = vst [vmem:[%s2453_s27 + $0x78] sm:$0xff] %v225_v15 }
  0x18   : > { %228 = vst [vmem:[%s2453_s27 + $0x80] sm:$0xff] %v227_v16  ;;  %230 = vst [vmem:[%s2453_s27 + $0x88] sm:$0xff] %v229_v17  ;;  %v231_v18 = vld [vmem:[%s2445_s26 + $0x480] sm:$0xff]  ;;  %v233_v19 = vld [vmem:[%s2445_s26 + $0x488] sm:$0xff] }
  0x19   : > { %v235_v20 = vld [vmem:[%s2445_s26 + $0x500] sm:$0xff]  ;;  %232 = vst [vmem:[%s2453_s27 + $0x90] sm:$0xff] %v231_v18  ;;  %234 = vst [vmem:[%s2453_s27 + $0x98] sm:$0xff] %v233_v19  ;;  %v237_v21 = vld [vmem:[%s2445_s26 + $0x508] sm:$0xff] }
  0x1a   : > { %236 = vst [vmem:[%s2453_s27 + $0xa0] sm:$0xff] %v235_v20  ;;  %v239_v22 = vld [vmem:[%s2445_s26 + $0x580] sm:$0xff]  ;;  %v241_v23 = vld [vmem:[%s2445_s26 + $0x588] sm:$0xff]  ;;  %238 = vst [vmem:[%s2453_s27 + $0xa8] sm:$0xff] %v237_v21 }
  0x1b   : > { %240 = vst [vmem:[%s2453_s27 + $0xb0] sm:$0xff] %v239_v22  ;;  %242 = vst [vmem:[%s2453_s27 + $0xb8] sm:$0xff] %v241_v23  ;;  %v243_v24 = vld [vmem:[%s2445_s26 + $0x600] sm:$0xff]  ;;  %v245_v25 = vld [vmem:[%s2445_s26 + $0x608] sm:$0xff] }
  0x1c   : > { %v247_v26 = vld [vmem:[%s2445_s26 + $0x680] sm:$0xff]  ;;  %244 = vst [vmem:[%s2453_s27 + $0xc0] sm:$0xff] %v243_v24  ;;  %246 = vst [vmem:[%s2453_s27 + $0xc8] sm:$0xff] %v245_v25  ;;  %v249_v27 = vld [vmem:[%s2445_s26 + $0x688] sm:$0xff] }
  0x1d   : > { %248 = vst [vmem:[%s2453_s27 + $0xd0] sm:$0xff] %v247_v26  ;;  %v251_v28 = vld [vmem:[%s2445_s26 + $0x700] sm:$0xff]  ;;  %v253_v29 = vld [vmem:[%s2445_s26 + $0x708] sm:$0xff]  ;;  %250 = vst [vmem:[%s2453_s27 + $0xd8] sm:$0xff] %v249_v27 }
  0x1e   : > { %252 = vst [vmem:[%s2453_s27 + $0xe0] sm:$0xff] %v251_v28  ;;  %254 = vst [vmem:[%s2453_s27 + $0xe8] sm:$0xff] %v253_v29  ;;  %v255_v30 = vld [vmem:[%s2445_s26 + $0x780] sm:$0xff]  ;;  %v257_v31 = vld [vmem:[%s2445_s26 + $0x788] sm:$0xff] }
  0x1f   : > { %v259_v32 = vld [vmem:[%s2445_s26 + $0x800] sm:$0xff]  ;;  %256 = vst [vmem:[%s2453_s27 + $0xf0] sm:$0xff] %v255_v30  ;;  %258 = vst [vmem:[%s2453_s27 + $0xf8] sm:$0xff] %v257_v31  ;;  %v261_v33 = vld [vmem:[%s2445_s26 + $0x808] sm:$0xff] }
  0x20   : > { %260 = vst [vmem:[%s2453_s27 + $0x100] sm:$0xff] %v259_v32  ;;  %v263_v34 = vld [vmem:[%s2445_s26 + $0x880] sm:$0xff]  ;;  %v265_v35 = vld [vmem:[%s2445_s26 + $0x888] sm:$0xff]  ;;  %262 = vst [vmem:[%s2453_s27 + $0x108] sm:$0xff] %v261_v33 }
  0x21   : > { %264 = vst [vmem:[%s2453_s27 + $0x110] sm:$0xff] %v263_v34  ;;  %266 = vst [vmem:[%s2453_s27 + $0x118] sm:$0xff] %v265_v35  ;;  %v267_v36 = vld [vmem:[%s2445_s26 + $0x900] sm:$0xff]  ;;  %v269_v37 = vld [vmem:[%s2445_s26 + $0x908] sm:$0xff] }
  0x22   : > { %v271_v38 = vld [vmem:[%s2445_s26 + $0x980] sm:$0xff]  ;;  %268 = vst [vmem:[%s2453_s27 + $0x120] sm:$0xff] %v267_v36  ;;  %270 = vst [vmem:[%s2453_s27 + $0x128] sm:$0xff] %v269_v37  ;;  %v273_v39 = vld [vmem:[%s2445_s26 + $0x988] sm:$0xff] }
  0x23   : > { %272 = vst [vmem:[%s2453_s27 + $0x130] sm:$0xff] %v271_v38  ;;  %v275_v40 = vld [vmem:[%s2445_s26 + $0xa00] sm:$0xff]  ;;  %v277_v41 = vld [vmem:[%s2445_s26 + $0xa08] sm:$0xff]  ;;  %274 = vst [vmem:[%s2453_s27 + $0x138] sm:$0xff] %v273_v39 }
  0x24   : > { %276 = vst [vmem:[%s2453_s27 + $0x140] sm:$0xff] %v275_v40  ;;  %278 = vst [vmem:[%s2453_s27 + $0x148] sm:$0xff] %v277_v41  ;;  %v279_v42 = vld [vmem:[%s2445_s26 + $0xa80] sm:$0xff]  ;;  %v281_v43 = vld [vmem:[%s2445_s26 + $0xa88] sm:$0xff] }
  0x25   : > { %v283_v44 = vld [vmem:[%s2445_s26 + $0xb00] sm:$0xff]  ;;  %280 = vst [vmem:[%s2453_s27 + $0x150] sm:$0xff] %v279_v42  ;;  %282 = vst [vmem:[%s2453_s27 + $0x158] sm:$0xff] %v281_v43  ;;  %v285_v45 = vld [vmem:[%s2445_s26 + $0xb08] sm:$0xff] }
  0x26   : > { %284 = vst [vmem:[%s2453_s27 + $0x160] sm:$0xff] %v283_v44  ;;  %v287_v46 = vld [vmem:[%s2445_s26 + $0xb80] sm:$0xff]  ;;  %v289_v47 = vld [vmem:[%s2445_s26 + $0xb88] sm:$0xff]  ;;  %286 = vst [vmem:[%s2453_s27 + $0x168] sm:$0xff] %v285_v45 }
  0x27   : > { %288 = vst [vmem:[%s2453_s27 + $0x170] sm:$0xff] %v287_v46  ;;  %290 = vst [vmem:[%s2453_s27 + $0x178] sm:$0xff] %v289_v47  ;;  %v291_v48 = vld [vmem:[%s2445_s26 + $0xc00] sm:$0xff]  ;;  %v293_v49 = vld [vmem:[%s2445_s26 + $0xc08] sm:$0xff] }
  0x28   : > { %v295_v50 = vld [vmem:[%s2445_s26 + $0xc80] sm:$0xff]  ;;  %292 = vst [vmem:[%s2453_s27 + $0x180] sm:$0xff] %v291_v48  ;;  %294 = vst [vmem:[%s2453_s27 + $0x188] sm:$0xff] %v293_v49  ;;  %v297_v51 = vld [vmem:[%s2445_s26 + $0xc88] sm:$0xff] }
  0x29   : > { %296 = vst [vmem:[%s2453_s27 + $0x190] sm:$0xff] %v295_v50  ;;  %v299_v52 = vld [vmem:[%s2445_s26 + $0xd00] sm:$0xff]  ;;  %v301_v53 = vld [vmem:[%s2445_s26 + $0xd08] sm:$0xff]  ;;  %298 = vst [vmem:[%s2453_s27 + $0x198] sm:$0xff] %v297_v51 }
  0x2a   : > { %300 = vst [vmem:[%s2453_s27 + $0x1a0] sm:$0xff] %v299_v52  ;;  %302 = vst [vmem:[%s2453_s27 + $0x1a8] sm:$0xff] %v301_v53  ;;  %v303_v54 = vld [vmem:[%s2445_s26 + $0xd80] sm:$0xff]  ;;  %v305_v55 = vld [vmem:[%s2445_s26 + $0xd88] sm:$0xff] }
  0x2b   : > { %v307_v56 = vld [vmem:[%s2445_s26 + $0xe00] sm:$0xff]  ;;  %304 = vst [vmem:[%s2453_s27 + $0x1b0] sm:$0xff] %v303_v54  ;;  %306 = vst [vmem:[%s2453_s27 + $0x1b8] sm:$0xff] %v305_v55  ;;  %v309_v57 = vld [vmem:[%s2445_s26 + $0xe08] sm:$0xff] }
  0x2c   : > { %308 = vst [vmem:[%s2453_s27 + $0x1c0] sm:$0xff] %v307_v56  ;;  %v311_v58 = vld [vmem:[%s2445_s26 + $0xe80] sm:$0xff]  ;;  %v313_v59 = vld [vmem:[%s2445_s26 + $0xe88] sm:$0xff]  ;;  %310 = vst [vmem:[%s2453_s27 + $0x1c8] sm:$0xff] %v309_v57 }
  0x2d   : > { %312 = vst [vmem:[%s2453_s27 + $0x1d0] sm:$0xff] %v311_v58  ;;  %314 = vst [vmem:[%s2453_s27 + $0x1d8] sm:$0xff] %v313_v59  ;;  %v315_v60 = vld [vmem:[%s2445_s26 + $0xf00] sm:$0xff]  ;;  %v317_v61 = vld [vmem:[%s2445_s26 + $0xf08] sm:$0xff] }
  0x2e   : > { %v319_v62 = vld [vmem:[%s2445_s26 + $0xf80] sm:$0xff]  ;;  %316 = vst [vmem:[%s2453_s27 + $0x1e0] sm:$0xff] %v315_v60  ;;  %318 = vst [vmem:[%s2453_s27 + $0x1e8] sm:$0xff] %v317_v61  ;;  %v321_v63 = vld [vmem:[%s2445_s26 + $0xf88] sm:$0xff] }
  0x2f   : > { %320 = vst [vmem:[%s2453_s27 + $0x1f0] sm:$0xff] %v319_v62  ;;  %v323_v0 = vld [vmem:[%s2445_s26 + $0x1000] sm:$0xff]  ;;  %v325_v1 = vld [vmem:[%s2445_s26 + $0x1008] sm:$0xff]  ;;  %322 = vst [vmem:[%s2453_s27 + $0x1f8] sm:$0xff] %v321_v63 }
  0x30   : > { %324 = vst [vmem:[%s2453_s27 + $0x200] sm:$0xff] %v323_v0  ;;  %326 = vst [vmem:[%s2453_s27 + $0x208] sm:$0xff] %v325_v1  ;;  %v327_v2 = vld [vmem:[%s2445_s26 + $0x1080] sm:$0xff]  ;;  %v329_v3 = vld [vmem:[%s2445_s26 + $0x1088] sm:$0xff] }
  0x31   : > { %v331_v4 = vld [vmem:[%s2445_s26 + $0x1100] sm:$0xff]  ;;  %328 = vst [vmem:[%s2453_s27 + $0x210] sm:$0xff] %v327_v2  ;;  %330 = vst [vmem:[%s2453_s27 + $0x218] sm:$0xff] %v329_v3  ;;  %v333_v5 = vld [vmem:[%s2445_s26 + $0x1108] sm:$0xff] }
  0x32   : > { %332 = vst [vmem:[%s2453_s27 + $0x220] sm:$0xff] %v331_v4  ;;  %v335_v6 = vld [vmem:[%s2445_s26 + $0x1180] sm:$0xff]  ;;  %v337_v7 = vld [vmem:[%s2445_s26 + $0x1188] sm:$0xff]  ;;  %334 = vst [vmem:[%s2453_s27 + $0x228] sm:$0xff] %v333_v5 }
  0x33   : > { %336 = vst [vmem:[%s2453_s27 + $0x230] sm:$0xff] %v335_v6  ;;  %338 = vst [vmem:[%s2453_s27 + $0x238] sm:$0xff] %v337_v7  ;;  %v339_v8 = vld [vmem:[%s2445_s26 + $0x1200] sm:$0xff]  ;;  %v341_v9 = vld [vmem:[%s2445_s26 + $0x1208] sm:$0xff] }
  0x34   : > { %v343_v10 = vld [vmem:[%s2445_s26 + $0x1280] sm:$0xff]  ;;  %340 = vst [vmem:[%s2453_s27 + $0x240] sm:$0xff] %v339_v8  ;;  %342 = vst [vmem:[%s2453_s27 + $0x248] sm:$0xff] %v341_v9  ;;  %v345_v11 = vld [vmem:[%s2445_s26 + $0x1288] sm:$0xff] }
  0x35   : > { %344 = vst [vmem:[%s2453_s27 + $0x250] sm:$0xff] %v343_v10  ;;  %v347_v12 = vld [vmem:[%s2445_s26 + $0x1300] sm:$0xff]  ;;  %v349_v13 = vld [vmem:[%s2445_s26 + $0x1308] sm:$0xff]  ;;  %346 = vst [vmem:[%s2453_s27 + $0x258] sm:$0xff] %v345_v11 }
  0x36   : > { %348 = vst [vmem:[%s2453_s27 + $0x260] sm:$0xff] %v347_v12  ;;  %350 = vst [vmem:[%s2453_s27 + $0x268] sm:$0xff] %v349_v13  ;;  %v351_v14 = vld [vmem:[%s2445_s26 + $0x1380] sm:$0xff]  ;;  %v353_v15 = vld [vmem:[%s2445_s26 + $0x1388] sm:$0xff] }
  0x37   : > { %v355_v16 = vld [vmem:[%s2445_s26 + $0x1400] sm:$0xff]  ;;  %352 = vst [vmem:[%s2453_s27 + $0x270] sm:$0xff] %v351_v14  ;;  %354 = vst [vmem:[%s2453_s27 + $0x278] sm:$0xff] %v353_v15  ;;  %v357_v17 = vld [vmem:[%s2445_s26 + $0x1408] sm:$0xff] }
  0x38   : > { %356 = vst [vmem:[%s2453_s27 + $0x280] sm:$0xff] %v355_v16  ;;  %v359_v18 = vld [vmem:[%s2445_s26 + $0x1480] sm:$0xff]  ;;  %v361_v19 = vld [vmem:[%s2445_s26 + $0x1488] sm:$0xff]  ;;  %358 = vst [vmem:[%s2453_s27 + $0x288] sm:$0xff] %v357_v17 }
  0x39   : > { %360 = vst [vmem:[%s2453_s27 + $0x290] sm:$0xff] %v359_v18  ;;  %362 = vst [vmem:[%s2453_s27 + $0x298] sm:$0xff] %v361_v19  ;;  %v363_v20 = vld [vmem:[%s2445_s26 + $0x1500] sm:$0xff]  ;;  %v365_v21 = vld [vmem:[%s2445_s26 + $0x1508] sm:$0xff] }
  0x3a   : > { %v367_v22 = vld [vmem:[%s2445_s26 + $0x1580] sm:$0xff]  ;;  %364 = vst [vmem:[%s2453_s27 + $0x2a0] sm:$0xff] %v363_v20  ;;  %366 = vst [vmem:[%s2453_s27 + $0x2a8] sm:$0xff] %v365_v21  ;;  %v369_v23 = vld [vmem:[%s2445_s26 + $0x1588] sm:$0xff] }
  0x3b   : > { %368 = vst [vmem:[%s2453_s27 + $0x2b0] sm:$0xff] %v367_v22  ;;  %v371_v24 = vld [vmem:[%s2445_s26 + $0x1600] sm:$0xff]  ;;  %v373_v25 = vld [vmem:[%s2445_s26 + $0x1608] sm:$0xff]  ;;  %370 = vst [vmem:[%s2453_s27 + $0x2b8] sm:$0xff] %v369_v23 }
  0x3c   : > { %372 = vst [vmem:[%s2453_s27 + $0x2c0] sm:$0xff] %v371_v24  ;;  %374 = vst [vmem:[%s2453_s27 + $0x2c8] sm:$0xff] %v373_v25  ;;  %v375_v26 = vld [vmem:[%s2445_s26 + $0x1680] sm:$0xff]  ;;  %v377_v27 = vld [vmem:[%s2445_s26 + $0x1688] sm:$0xff] }
  0x3d   : > { %v379_v28 = vld [vmem:[%s2445_s26 + $0x1700] sm:$0xff]  ;;  %376 = vst [vmem:[%s2453_s27 + $0x2d0] sm:$0xff] %v375_v26  ;;  %378 = vst [vmem:[%s2453_s27 + $0x2d8] sm:$0xff] %v377_v27  ;;  %v381_v29 = vld [vmem:[%s2445_s26 + $0x1708] sm:$0xff] }
  0x3e   : > { %380 = vst [vmem:[%s2453_s27 + $0x2e0] sm:$0xff] %v379_v28  ;;  %v383_v30 = vld [vmem:[%s2445_s26 + $0x1780] sm:$0xff]  ;;  %v385_v31 = vld [vmem:[%s2445_s26 + $0x1788] sm:$0xff]  ;;  %382 = vst [vmem:[%s2453_s27 + $0x2e8] sm:$0xff] %v381_v29 }
  0x3f   : > { %384 = vst [vmem:[%s2453_s27 + $0x2f0] sm:$0xff] %v383_v30  ;;  %386 = vst [vmem:[%s2453_s27 + $0x2f8] sm:$0xff] %v385_v31  ;;  %v387_v32 = vld [vmem:[%s2445_s26 + $0x1800] sm:$0xff]  ;;  %v389_v33 = vld [vmem:[%s2445_s26 + $0x1808] sm:$0xff] }
  0x40   : > { %v391_v34 = vld [vmem:[%s2445_s26 + $0x1880] sm:$0xff]  ;;  %388 = vst [vmem:[%s2453_s27 + $0x300] sm:$0xff] %v387_v32  ;;  %390 = vst [vmem:[%s2453_s27 + $0x308] sm:$0xff] %v389_v33  ;;  %v393_v35 = vld [vmem:[%s2445_s26 + $0x1888] sm:$0xff] }
  0x41   : > { %392 = vst [vmem:[%s2453_s27 + $0x310] sm:$0xff] %v391_v34  ;;  %v395_v36 = vld [vmem:[%s2445_s26 + $0x1900] sm:$0xff]  ;;  %v397_v37 = vld [vmem:[%s2445_s26 + $0x1908] sm:$0xff]  ;;  %394 = vst [vmem:[%s2453_s27 + $0x318] sm:$0xff] %v393_v35 }
  0x42   : > { %396 = vst [vmem:[%s2453_s27 + $0x320] sm:$0xff] %v395_v36  ;;  %398 = vst [vmem:[%s2453_s27 + $0x328] sm:$0xff] %v397_v37  ;;  %v399_v38 = vld [vmem:[%s2445_s26 + $0x1980] sm:$0xff]  ;;  %v401_v39 = vld [vmem:[%s2445_s26 + $0x1988] sm:$0xff] }
  0x43   : > { %v403_v40 = vld [vmem:[%s2445_s26 + $0x1a00] sm:$0xff]  ;;  %400 = vst [vmem:[%s2453_s27 + $0x330] sm:$0xff] %v399_v38  ;;  %402 = vst [vmem:[%s2453_s27 + $0x338] sm:$0xff] %v401_v39  ;;  %v405_v41 = vld [vmem:[%s2445_s26 + $0x1a08] sm:$0xff] }
  0x44   : > { %404 = vst [vmem:[%s2453_s27 + $0x340] sm:$0xff] %v403_v40  ;;  %v407_v42 = vld [vmem:[%s2445_s26 + $0x1a80] sm:$0xff]  ;;  %v409_v43 = vld [vmem:[%s2445_s26 + $0x1a88] sm:$0xff]  ;;  %406 = vst [vmem:[%s2453_s27 + $0x348] sm:$0xff] %v405_v41 }
  0x45   : > { %408 = vst [vmem:[%s2453_s27 + $0x350] sm:$0xff] %v407_v42  ;;  %410 = vst [vmem:[%s2453_s27 + $0x358] sm:$0xff] %v409_v43  ;;  %v411_v44 = vld [vmem:[%s2445_s26 + $0x1b00] sm:$0xff]  ;;  %v413_v45 = vld [vmem:[%s2445_s26 + $0x1b08] sm:$0xff] }
  0x46   : > { %v415_v46 = vld [vmem:[%s2445_s26 + $0x1b80] sm:$0xff]  ;;  %412 = vst [vmem:[%s2453_s27 + $0x360] sm:$0xff] %v411_v44  ;;  %414 = vst [vmem:[%s2453_s27 + $0x368] sm:$0xff] %v413_v45  ;;  %v417_v47 = vld [vmem:[%s2445_s26 + $0x1b88] sm:$0xff] }
  0x47   : > { %416 = vst [vmem:[%s2453_s27 + $0x370] sm:$0xff] %v415_v46  ;;  %v419_v48 = vld [vmem:[%s2445_s26 + $0x1c00] sm:$0xff]  ;;  %v421_v49 = vld [vmem:[%s2445_s26 + $0x1c08] sm:$0xff]  ;;  %418 = vst [vmem:[%s2453_s27 + $0x378] sm:$0xff] %v417_v47 }
  0x48   : > { %420 = vst [vmem:[%s2453_s27 + $0x380] sm:$0xff] %v419_v48  ;;  %422 = vst [vmem:[%s2453_s27 + $0x388] sm:$0xff] %v421_v49  ;;  %v423_v50 = vld [vmem:[%s2445_s26 + $0x1c80] sm:$0xff]  ;;  %v425_v51 = vld [vmem:[%s2445_s26 + $0x1c88] sm:$0xff] }
  0x49   : > { %v427_v52 = vld [vmem:[%s2445_s26 + $0x1d00] sm:$0xff]  ;;  %424 = vst [vmem:[%s2453_s27 + $0x390] sm:$0xff] %v423_v50  ;;  %426 = vst [vmem:[%s2453_s27 + $0x398] sm:$0xff] %v425_v51  ;;  %v429_v53 = vld [vmem:[%s2445_s26 + $0x1d08] sm:$0xff] }
  0x4a   : > { %428 = vst [vmem:[%s2453_s27 + $0x3a0] sm:$0xff] %v427_v52  ;;  %v431_v54 = vld [vmem:[%s2445_s26 + $0x1d80] sm:$0xff]  ;;  %v433_v55 = vld [vmem:[%s2445_s26 + $0x1d88] sm:$0xff]  ;;  %430 = vst [vmem:[%s2453_s27 + $0x3a8] sm:$0xff] %v429_v53 }
  0x4b   : > { %432 = vst [vmem:[%s2453_s27 + $0x3b0] sm:$0xff] %v431_v54  ;;  %434 = vst [vmem:[%s2453_s27 + $0x3b8] sm:$0xff] %v433_v55  ;;  %v435_v56 = vld [vmem:[%s2445_s26 + $0x1e00] sm:$0xff]  ;;  %v437_v57 = vld [vmem:[%s2445_s26 + $0x1e08] sm:$0xff] }
  0x4c   : > { %v439_v58 = vld [vmem:[%s2445_s26 + $0x1e80] sm:$0xff]  ;;  %436 = vst [vmem:[%s2453_s27 + $0x3c0] sm:$0xff] %v435_v56  ;;  %438 = vst [vmem:[%s2453_s27 + $0x3c8] sm:$0xff] %v437_v57  ;;  %v441_v59 = vld [vmem:[%s2445_s26 + $0x1e88] sm:$0xff] }
  0x4d   : > { %440 = vst [vmem:[%s2453_s27 + $0x3d0] sm:$0xff] %v439_v58  ;;  %v443_v60 = vld [vmem:[%s2445_s26 + $0x1f00] sm:$0xff]  ;;  %v445_v61 = vld [vmem:[%s2445_s26 + $0x1f08] sm:$0xff]  ;;  %442 = vst [vmem:[%s2453_s27 + $0x3d8] sm:$0xff] %v441_v59 }
  0x4e   : > { %444 = vst [vmem:[%s2453_s27 + $0x3e0] sm:$0xff] %v443_v60  ;;  %446 = vst [vmem:[%s2453_s27 + $0x3e8] sm:$0xff] %v445_v61  ;;  %v447_v62 = vld [vmem:[%s2445_s26 + $0x1f80] sm:$0xff]  ;;  %v449_v63 = vld [vmem:[%s2445_s26 + $0x1f88] sm:$0xff] }
  0x4f   : > { %v451_v0 = vld [vmem:[%s2445_s26 + $0x2000] sm:$0xff]  ;;  %448 = vst [vmem:[%s2453_s27 + $0x3f0] sm:$0xff] %v447_v62  ;;  %450 = vst [vmem:[%s2453_s27 + $0x3f8] sm:$0xff] %v449_v63  ;;  %v453_v1 = vld [vmem:[%s2445_s26 + $0x2008] sm:$0xff] }
  0x50   : > { %452 = vst [vmem:[%s2453_s27 + $0x400] sm:$0xff] %v451_v0  ;;  %v455_v2 = vld [vmem:[%s2445_s26 + $0x2080] sm:$0xff]  ;;  %v457_v3 = vld [vmem:[%s2445_s26 + $0x2088] sm:$0xff]  ;;  %454 = vst [vmem:[%s2453_s27 + $0x408] sm:$0xff] %v453_v1 }
  0x51   : > { %456 = vst [vmem:[%s2453_s27 + $0x410] sm:$0xff] %v455_v2  ;;  %458 = vst [vmem:[%s2453_s27 + $0x418] sm:$0xff] %v457_v3  ;;  %v459_v4 = vld [vmem:[%s2445_s26 + $0x2100] sm:$0xff]  ;;  %v461_v5 = vld [vmem:[%s2445_s26 + $0x2108] sm:$0xff] }
  0x52   : > { %v463_v6 = vld [vmem:[%s2445_s26 + $0x2180] sm:$0xff]  ;;  %460 = vst [vmem:[%s2453_s27 + $0x420] sm:$0xff] %v459_v4  ;;  %462 = vst [vmem:[%s2453_s27 + $0x428] sm:$0xff] %v461_v5  ;;  %v465_v7 = vld [vmem:[%s2445_s26 + $0x2188] sm:$0xff] }
  0x53   : > { %464 = vst [vmem:[%s2453_s27 + $0x430] sm:$0xff] %v463_v6  ;;  %v467_v8 = vld [vmem:[%s2445_s26 + $0x2200] sm:$0xff]  ;;  %v469_v9 = vld [vmem:[%s2445_s26 + $0x2208] sm:$0xff]  ;;  %466 = vst [vmem:[%s2453_s27 + $0x438] sm:$0xff] %v465_v7 }
  0x54   : > { %468 = vst [vmem:[%s2453_s27 + $0x440] sm:$0xff] %v467_v8  ;;  %470 = vst [vmem:[%s2453_s27 + $0x448] sm:$0xff] %v469_v9  ;;  %v471_v10 = vld [vmem:[%s2445_s26 + $0x2280] sm:$0xff]  ;;  %v473_v11 = vld [vmem:[%s2445_s26 + $0x2288] sm:$0xff] }
  0x55   : > { %v475_v12 = vld [vmem:[%s2445_s26 + $0x2300] sm:$0xff]  ;;  %472 = vst [vmem:[%s2453_s27 + $0x450] sm:$0xff] %v471_v10  ;;  %474 = vst [vmem:[%s2453_s27 + $0x458] sm:$0xff] %v473_v11  ;;  %v477_v13 = vld [vmem:[%s2445_s26 + $0x2308] sm:$0xff] }
  0x56   : > { %476 = vst [vmem:[%s2453_s27 + $0x460] sm:$0xff] %v475_v12  ;;  %v479_v14 = vld [vmem:[%s2445_s26 + $0x2380] sm:$0xff]  ;;  %v481_v15 = vld [vmem:[%s2445_s26 + $0x2388] sm:$0xff]  ;;  %478 = vst [vmem:[%s2453_s27 + $0x468] sm:$0xff] %v477_v13 }
  0x57   : > { %480 = vst [vmem:[%s2453_s27 + $0x470] sm:$0xff] %v479_v14  ;;  %482 = vst [vmem:[%s2453_s27 + $0x478] sm:$0xff] %v481_v15 }
  0x58 PF: > { %p1925_p6 = scmp.ge.s32.totalorder %s2378_s16, 1  ;;  %p495_p7 = scmp.lt.s32.totalorder %s2378_s16, 9 }
  0x5a   : > { %p496_p8 = pnand %p1925_p6, %p495_p7 }
  0x5b   : > { %s502_s28 = sand.u32 (!%p496_p8), 1, %s2362_s12   ;;  %s1926_s8 = sshll.u32 (!%p496_p8), %s2370_s14, 2 }
  0x5c   : > { %499 = sbr.rel (%p496_p8) target bundleno = 453 (0x1c5), region = 51  ;;  %p555_p9 = scmp.lt.s32.totalorder (!%p496_p8), %s1926_s8, 31 }
  0x5d   : > { %s2080_s4 = smul.u32 (!%p496_p8), 1152, %s502_s28 }
  0x5f   : > { %s2745_s5 = scalar_lea.vmem (!%p496_p8), [#allocation3], %s2080_s4 }
  0x61   : > { %v575_v16 = vld [vmem:[%s2969_s0] sm:$0xff]  ;;  %v727_v17 = vlaneseq  ;;  %v2380_v18 = vmov 1983009808   ;;  %vm1478_vm0 = vcmask 523264   ;;  %s2980_s8 = smov (!%p555_p9, %s1926_s8), 31 }
  0x62   : > { %v725_v19 = vunpack.c.l.s4 %v2380_v18  ;;  %v723_v22 = vcombine.high %v575_v16, %v575_v16  ;;  %v2123_v23 = vld [vmem:[%s2745_s5 + $0xe4] ss:$16 sps:$4 sm:$0xff]   ;;  %v2127_v26 = vld [vmem:[%s2745_s5 + $0xe0] ss:$16 sps:$4 sm:$0xff]   ;;  %s557_s11 = scalar_lea.vmem %s2971_s2, %s2980_s8  ;;  %s1928_s12 = sshll.u32 %s2980_s8, 1 }
  0x63   : > { %v2743_v20 = vshrl.u32 %v727_v17, 7  ;;  %v2125_v24 = vld [vmem:[%s2745_s5 + $0x2e4] ss:$16 sps:$4 sm:$0xff]   ;;  %1482 = vmatprep.subr.bf16.mxu0 %v2123_v23  ;;  %v2128_v27 = vld [vmem:[%s2745_s5 + $0x2e0] ss:$16 sps:$4 sm:$0xff]   ;;  %s567_s19 = scalar_lea.vmem %s2972_s3, %s1928_s12 }
  0x64   : > { %v726_v21 = vunpack.c.0.s8 %v725_v19  ;;  %1523 = vmatprep.subr.bf16.mxu1 %v2125_v24  ;;  %v2129_v28 = vld [vmem:[%s2745_s5 + $0xc4] ss:$16 sps:$4 sm:$0xff]   ;;  %1483 = vmatpush1.bf16.msra.mxu0 %v2127_v26  ;;  %v2133_v32 = vld [vmem:[%s2745_s5 + $0xc0] ss:$16 sps:$4 sm:$0xff]  }
  0x65   : > { %1524 = vmatpush1.bf16.msra.mxu1 %v2128_v27  ;;  %v2131_v31 = vld [vmem:[%s2745_s5 + $0x2c4] ss:$16 sps:$4 sm:$0xff]   ;;  %1484 = vmatprep.subr.bf16.mxu0 %v2129_v28  ;;  %v2134_v33 = vld [vmem:[%s2745_s5 + $0x2c0] ss:$16 sps:$4 sm:$0xff]  }
  0x66   : > { %v2750_v25 = vsub.s32 %v726_v21, %v2743_v20  ;;  %1525 = vmatprep.subr.bf16.mxu1 %v2131_v31  ;;  %v2135_v36 = vld [vmem:[%s2745_s5 + $0xa4] ss:$16 sps:$4 sm:$0xff]   ;;  %v2139_v38 = vld [vmem:[%s2745_s5 + $0xa0] ss:$16 sps:$4 sm:$0xff]  }
  0x67   : > { %v2137_v37 = vld [vmem:[%s2745_s5 + $0x2a4] ss:$16 sps:$4 sm:$0xff]   ;;  %v2140_v39 = vld [vmem:[%s2745_s5 + $0x2a0] ss:$16 sps:$4 sm:$0xff]  }
  0x68   : > { %v2756_v29 = vrot.slane %v575_v16, %v2750_v25  ;;  %v2759_v30 = vrot.slane %v723_v22, %v2750_v25  ;;  %1485 = vmatpush1.bf16.msra.mxu0 %v2133_v32  ;;  %v2141_v42 = vld [vmem:[%s2745_s5 + $0x84] ss:$16 sps:$4 sm:$0xff]   ;;  %v2145_v44 = vld [vmem:[%s2745_s5 + $0x80] ss:$16 sps:$4 sm:$0xff]  }
  0x69   : > { %1526 = vmatpush1.bf16.msra.mxu1 %v2134_v33  ;;  %1486 = vmatprep.subr.bf16.mxu0 %v2135_v36  ;;  %v2143_v43 = vld [vmem:[%s2745_s5 + $0x284] ss:$16 sps:$4 sm:$0xff]   ;;  %v2146_v45 = vld [vmem:[%s2745_s5 + $0x280] ss:$16 sps:$4 sm:$0xff]  }
  0x6a   : > { %v738_v34 = vcombine.high %v2756_v29, %v2756_v29  ;;  %v739_v35 = vcombine.high %v2759_v30, %v2759_v30  ;;  %1527 = vmatprep.subr.bf16.mxu1 %v2137_v37  ;;  %v2147_v46 = vld [vmem:[%s2745_s5 + $0x64] ss:$16 sps:$4 sm:$0xff]   ;;  %v2151_v48 = vld [vmem:[%s2745_s5 + $0x60] ss:$16 sps:$4 sm:$0xff]   ;;  %v2834_v36 = vpack.c.bf16 %v2756_v29, %v2756_v29  ;;  %v2838_v37 = vpack.c.bf16 %v2759_v30, %v2759_v30 }
  0x6b   : > { %v2149_v47 = vld [vmem:[%s2745_s5 + $0x264] ss:$16 sps:$4 sm:$0xff]   ;;  %v2152_v49 = vld [vmem:[%s2745_s5 + $0x260] ss:$16 sps:$4 sm:$0xff]  }
  0x6c   : > { %v2772_v40 = vpack.c.bf16 %v738_v34, %v738_v34  ;;  %v2774_v41 = vpack.c.bf16 %v739_v35, %v739_v35  ;;  %1487 = vmatpush1.bf16.msra.mxu0 %v2139_v38  ;;  %v2153_v50 = vld [vmem:[%s2745_s5 + $0x44] ss:$16 sps:$4 sm:$0xff]   ;;  %v2157_v52 = vld [vmem:[%s2745_s5 + $0x40] ss:$16 sps:$4 sm:$0xff]   ;;  %v2225_v35 = vld [vmem:[%s2745_s5 + $0xec] ss:$16 sps:$4 sm:$0xff]  }
  0x6d   : > { %1528 = vmatpush1.bf16.msra.mxu1 %v2140_v39  ;;  %1488 = vmatprep.subr.bf16.mxu0 %v2141_v42  ;;  %v2155_v51 = vld [vmem:[%s2745_s5 + $0x244] ss:$16 sps:$4 sm:$0xff]   ;;  %v2158_v53 = vld [vmem:[%s2745_s5 + $0x240] ss:$16 sps:$4 sm:$0xff]   ;;  %v2223_v39 = vld [vmem:[%s2745_s5 + $0xe8] ss:$16 sps:$4 sm:$0xff]  }
  0x6e   : > { %1514 = vmatprep.mubr.bf16.mxu0 %v2772_v40  ;;  %1555 = vmatprep.mubr.bf16.mxu1 %v2774_v41  ;;  %v2159_v54 = vld [vmem:[%s2745_s5 + $0x24] ss:$16 sps:$4 sm:$0xff]   ;;  %v2163_v56 = vld [vmem:[%s2745_s5 + $0x20] ss:$16 sps:$4 sm:$0xff]  }
  0x6f   : > { %1529 = vmatprep.subr.bf16.mxu1 %v2143_v43  ;;  %v2161_v55 = vld [vmem:[%s2745_s5 + $0x224] ss:$16 sps:$4 sm:$0xff]   ;;  %v2164_v57 = vld [vmem:[%s2745_s5 + $0x220] ss:$16 sps:$4 sm:$0xff]   ;;  %v2231_v43 = vld [vmem:[%s2745_s5 + $0xcc] ss:$16 sps:$4 sm:$0xff]  }
  0x70   : > { %1489 = vmatpush1.bf16.msra.mxu0 %v2145_v44  ;;  %v2165_v58 = vld [vmem:[%s2745_s5 + $0x4] ss:$16 sps:$4 sm:$0xff]   ;;  %v2169_v60 = vld [vmem:[%s2745_s5] ss:$16 sps:$4 sm:$0xff]   ;;  %v2229_v44 = vld [vmem:[%s2745_s5 + $0xc8] ss:$16 sps:$4 sm:$0xff]  }
  0x71   : > { %1530 = vmatpush1.bf16.msra.mxu1 %v2146_v45  ;;  %1490 = vmatprep.subr.bf16.mxu0 %v2147_v46  ;;  %v2167_v59 = vld [vmem:[%s2745_s5 + $0x204] ss:$16 sps:$4 sm:$0xff]   ;;  %v2170_v61 = vld [vmem:[%s2745_s5 + $0x200] ss:$16 sps:$4 sm:$0xff]   ;;  %v2237_v45 = vld [vmem:[%s2745_s5 + $0xac] ss:$16 sps:$4 sm:$0xff]  }
  0x72   : > { %1531 = vmatprep.subr.bf16.mxu1 %v2149_v47  ;;  %v2171_v62 = vld [vmem:[%s2745_s5 + $0x1e4] ss:$16 sps:$4 sm:$0xff]   ;;  %v2175_v0 = vld [vmem:[%s2745_s5 + $0x1e0] ss:$16 sps:$4 sm:$0xff]   ;;  %v2381_v46 = vmov 0  }
  0x73   : > { %v2173_v63 = vld [vmem:[%s2745_s5 + $0x3e4] ss:$16 sps:$4 sm:$0xff]   ;;  %v2176_v1 = vld [vmem:[%s2745_s5 + $0x3e0] ss:$16 sps:$4 sm:$0xff]  }
  0x74   : > { %1491 = vmatpush1.bf16.msra.mxu0 %v2151_v48  ;;  %v2177_v2 = vld [vmem:[%s2745_s5 + $0x1c4] ss:$16 sps:$4 sm:$0xff]   ;;  %v2181_v4 = vld [vmem:[%s2745_s5 + $0x1c0] ss:$16 sps:$4 sm:$0xff]   ;;  %v2235_v48 = vld [vmem:[%s2745_s5 + $0xa8] ss:$16 sps:$4 sm:$0xff]  }
  0x75   : > { %1532 = vmatpush1.bf16.msra.mxu1 %v2152_v49  ;;  %1492 = vmatprep.subr.bf16.mxu0 %v2153_v50  ;;  %v2179_v3 = vld [vmem:[%s2745_s5 + $0x3c4] ss:$16 sps:$4 sm:$0xff]   ;;  %v2182_v5 = vld [vmem:[%s2745_s5 + $0x3c0] ss:$16 sps:$4 sm:$0xff]   ;;  %v2243_v50 = vld [vmem:[%s2745_s5 + $0x8c] ss:$16 sps:$4 sm:$0xff]  }
  0x76   : > { %1533 = vmatprep.subr.bf16.mxu1 %v2155_v51  ;;  %v2183_v6 = vld [vmem:[%s2745_s5 + $0x1a4] ss:$16 sps:$4 sm:$0xff]   ;;  %v2187_v8 = vld [vmem:[%s2745_s5 + $0x1a0] ss:$16 sps:$4 sm:$0xff]  }
  0x77   : > { %v2185_v7 = vld [vmem:[%s2745_s5 + $0x3a4] ss:$16 sps:$4 sm:$0xff]   ;;  %v2188_v9 = vld [vmem:[%s2745_s5 + $0x3a0] ss:$16 sps:$4 sm:$0xff]  }
  0x78   : > { %1493 = vmatpush1.bf16.msra.mxu0 %v2157_v52  ;;  %v2189_v10 = vld [vmem:[%s2745_s5 + $0x184] ss:$16 sps:$4 sm:$0xff]   ;;  %v2193_v12 = vld [vmem:[%s2745_s5 + $0x180] ss:$16 sps:$4 sm:$0xff]  }
  0x79   : > { %1534 = vmatpush1.bf16.msra.mxu1 %v2158_v53  ;;  %1494 = vmatprep.subr.bf16.mxu0 %v2159_v54  ;;  %v2191_v11 = vld [vmem:[%s2745_s5 + $0x384] ss:$16 sps:$4 sm:$0xff]   ;;  %v2194_v13 = vld [vmem:[%s2745_s5 + $0x380] ss:$16 sps:$4 sm:$0xff]   ;;  %v2241_v53 = vld [vmem:[%s2745_s5 + $0x88] ss:$16 sps:$4 sm:$0xff]  }
  0x7a   : > { %1535 = vmatprep.subr.bf16.mxu1 %v2161_v55  ;;  %v2195_v14 = vld [vmem:[%s2745_s5 + $0x164] ss:$16 sps:$4 sm:$0xff]   ;;  %v2199_v16 = vld [vmem:[%s2745_s5 + $0x160] ss:$16 sps:$4 sm:$0xff]   ;;  %v2249_v54 = vld [vmem:[%s2745_s5 + $0x2ec] ss:$16 sps:$4 sm:$0xff]  }
  0x7b   : > { %v2197_v15 = vld [vmem:[%s2745_s5 + $0x364] ss:$16 sps:$4 sm:$0xff]   ;;  %v2200_v17 = vld [vmem:[%s2745_s5 + $0x360] ss:$16 sps:$4 sm:$0xff]  }
  0x7c   : > { %1495 = vmatpush1.bf16.msra.mxu0 %v2163_v56  ;;  %v2201_v18 = vld [vmem:[%s2745_s5 + $0x144] ss:$16 sps:$4 sm:$0xff]   ;;  %v2205_v21 = vld [vmem:[%s2745_s5 + $0x140] ss:$16 sps:$4 sm:$0xff]   ;;  %v2244_v56 = vld [vmem:[%s2745_s5 + $0x68] ss:$16 sps:$4 sm:$0xff]  }
  0x7d   : > { %1536 = vmatpush1.bf16.msra.mxu1 %v2164_v57  ;;  %1496 = vmatprep.subr.bf16.mxu0 %v2165_v58  ;;  %v2203_v19 = vld [vmem:[%s2745_s5 + $0x344] ss:$16 sps:$4 sm:$0xff]   ;;  %v2206_v22 = vld [vmem:[%s2745_s5 + $0x340] ss:$16 sps:$4 sm:$0xff]   ;;  %v2247_v57 = vld [vmem:[%s2745_s5 + $0x2e8] ss:$16 sps:$4 sm:$0xff]  }
  0x7e   : > { %1537 = vmatprep.subr.bf16.mxu1 %v2167_v59  ;;  %v2207_v23 = vld [vmem:[%s2745_s5 + $0x124] ss:$16 sps:$4 sm:$0xff]   ;;  %v2211_v26 = vld [vmem:[%s2745_s5 + $0x120] ss:$16 sps:$4 sm:$0xff]   ;;  %v2252_v58 = vld [vmem:[%s2745_s5 + $0x4c] ss:$16 sps:$4 sm:$0xff]  }
  0x7f   : > { %v2209_v24 = vld [vmem:[%s2745_s5 + $0x324] ss:$16 sps:$4 sm:$0xff]   ;;  %v2212_v27 = vld [vmem:[%s2745_s5 + $0x320] ss:$16 sps:$4 sm:$0xff]   ;;  %v2255_v59 = vld [vmem:[%s2745_s5 + $0x2cc] ss:$16 sps:$4 sm:$0xff]  }
  0x80   : > { %1497 = vmatpush1.bf16.msra.mxu0 %v2169_v60  ;;  %v2213_v28 = vld [vmem:[%s2745_s5 + $0x104] ss:$16 sps:$4 sm:$0xff]   ;;  %v2217_v32 = vld [vmem:[%s2745_s5 + $0x100] ss:$16 sps:$4 sm:$0xff]   ;;  %v2250_v60 = vld [vmem:[%s2745_s5 + $0x48] ss:$16 sps:$4 sm:$0xff]  }
  0x81   : > { %1538 = vmatpush1.bf16.msra.mxu1 %v2170_v61  ;;  %1498 = vmatprep.subr.bf16.mxu0 %v2171_v62  ;;  %v2215_v31 = vld [vmem:[%s2745_s5 + $0x304] ss:$16 sps:$4 sm:$0xff]   ;;  %v2218_v33 = vld [vmem:[%s2745_s5 + $0x300] ss:$16 sps:$4 sm:$0xff]   ;;  %v2253_v61 = vld [vmem:[%s2745_s5 + $0x2c8] ss:$16 sps:$4 sm:$0xff]  }
  0x82   : > { %1539 = vmatprep.subr.bf16.mxu1 %v2173_v63  ;;  %v2222_v34 = vld [vmem:[%s2745_s5 + $0x464] ss:$16 sps:$4 sm:$0xff]   ;;  %v2220_v38 = vld [vmem:[%s2745_s5 + $0x460] ss:$16 sps:$4 sm:$0xff]   ;;  %v2258_v62 = vld [vmem:[%s2745_s5 + $0x2c] ss:$16 sps:$4 sm:$0xff]  }
  0x83   : > { %v2228_v42 = vld [vmem:[%s2745_s5 + $0x444] ss:$16 sps:$4 sm:$0xff]   ;;  %v2226_v29 = vld [vmem:[%s2745_s5 + $0x440] ss:$16 sps:$4 sm:$0xff]   ;;  %v2261_v63 = vld [vmem:[%s2745_s5 + $0x2ac] ss:$16 sps:$4 sm:$0xff]  }
  0x84   : > { %1499 = vmatpush2.bf16.msra.mxu0 %v2175_v0  ;;  %v2234_v30 = vld [vmem:[%s2745_s5 + $0x424] ss:$16 sps:$4 sm:$0xff]   ;;  %v2232_v47 = vld [vmem:[%s2745_s5 + $0x420] ss:$16 sps:$4 sm:$0xff]   ;;  %v2256_v0 = vld [vmem:[%s2745_s5 + $0x28] ss:$16 sps:$4 sm:$0xff]  }
  0x85   : > { %1540 = vmatpush2.bf16.msra.mxu1 %v2176_v1  ;;  %1500 = vmatprep.subr.bf16.mxu0 %v2177_v2  ;;  %v2240_v49 = vld [vmem:[%s2745_s5 + $0x404] ss:$16 sps:$4 sm:$0xff]   ;;  %v1929_v51 = vld.sshfl [vmem:[%s2969_s0 + $0x8] sm:$0x3 pattern:$0x76325410] }
  0x86   : > { %1541 = vmatprep.subr.bf16.mxu1 %v2179_v3  ;;  %v2238_v52 = vld [vmem:[%s2745_s5 + $0x400] ss:$16 sps:$4 sm:$0xff]   ;;  %v2863_v55 = vpack.c.bf16 %v1929_v51, %v1929_v51  ;;  %v2259_v1 = vld [vmem:[%s2745_s5 + $0x2a8] ss:$16 sps:$4 sm:$0xff]   ;;  %v2264_v2 = vld [vmem:[%s2745_s5 + $0xc] ss:$16 sps:$4 sm:$0xff]  }
  0x87   : > { %v2267_v3 = vld [vmem:[%s2745_s5 + $0x28c] ss:$16 sps:$4 sm:$0xff]   ;;  %v2325_v51 = vld [vmem:[%s2745_s5 + $0x448] ss:$16 sps:$4 sm:$0xff]  }
  0x88   : > { %1501 = vmatpush2.bf16.msra.mxu0 %v2181_v4  ;;  %v2262_v4 = vld [vmem:[%s2745_s5 + $0x8] ss:$16 sps:$4 sm:$0xff]  }
  0x89   : > { %1542 = vmatpush2.bf16.msra.mxu1 %v2182_v5  ;;  %1502 = vmatprep.subr.bf16.mxu0 %v2183_v6  ;;  %v2265_v5 = vld [vmem:[%s2745_s5 + $0x288] ss:$16 sps:$4 sm:$0xff]   ;;  %v2273_v6 = vld [vmem:[%s2745_s5 + $0x26c] ss:$16 sps:$4 sm:$0xff]  }
  0x8a   : > { %1543 = vmatprep.subr.bf16.mxu1 %v2185_v7  ;;  %v2268_v7 = vld [vmem:[%s2745_s5 + $0x1e8] ss:$16 sps:$4 sm:$0xff]  }
  0x8c   : > { %1503 = vmatpush2.bf16.msra.mxu0 %v2187_v8  ;;  %v2271_v8 = vld [vmem:[%s2745_s5 + $0x268] ss:$16 sps:$4 sm:$0xff]  }
  0x8d   : > { %1544 = vmatpush2.bf16.msra.mxu1 %v2188_v9  ;;  %1504 = vmatprep.subr.bf16.mxu0 %v2189_v10  ;;  %v2276_v9 = vld [vmem:[%s2745_s5 + $0x1cc] ss:$16 sps:$4 sm:$0xff]  }
  0x8e   : > { %1545 = vmatprep.subr.bf16.mxu1 %v2191_v11  ;;  %v2279_v10 = vld [vmem:[%s2745_s5 + $0x24c] ss:$16 sps:$4 sm:$0xff]   ;;  %v2274_v11 = vld [vmem:[%s2745_s5 + $0x1c8] ss:$16 sps:$4 sm:$0xff]  }
  0x90   : > { %1505 = vmatpush2.bf16.msra.mxu0 %v2193_v12  ;;  %v2277_v12 = vld [vmem:[%s2745_s5 + $0x248] ss:$16 sps:$4 sm:$0xff]  }
  0x91   : > { %1546 = vmatpush2.bf16.msra.mxu1 %v2194_v13  ;;  %1506 = vmatprep.subr.bf16.mxu0 %v2195_v14  ;;  %v2282_v13 = vld [vmem:[%s2745_s5 + $0x1ac] ss:$16 sps:$4 sm:$0xff]  }
  0x92   : > { %1547 = vmatprep.subr.bf16.mxu1 %v2197_v15  ;;  %v2285_v14 = vld [vmem:[%s2745_s5 + $0x22c] ss:$16 sps:$4 sm:$0xff]   ;;  %v2280_v15 = vld [vmem:[%s2745_s5 + $0x1a8] ss:$16 sps:$4 sm:$0xff]  }
  0x94   : > { %1507 = vmatpush2.bf16.msra.mxu0 %v2199_v16  ;;  %v2283_v16 = vld [vmem:[%s2745_s5 + $0x228] ss:$16 sps:$4 sm:$0xff]  }
  0x95   : > { %1548 = vmatpush2.bf16.msra.mxu1 %v2200_v17  ;;  %1508 = vmatprep.subr.bf16.mxu0 %v2201_v18  ;;  %v2288_v17 = vld [vmem:[%s2745_s5 + $0x18c] ss:$16 sps:$4 sm:$0xff]  }
  0x96   : > { %1549 = vmatprep.subr.bf16.mxu1 %v2203_v19  ;;  %v2291_v18 = vld [vmem:[%s2745_s5 + $0x20c] ss:$16 sps:$4 sm:$0xff]   ;;  %v2286_v19 = vld [vmem:[%s2745_s5 + $0x188] ss:$16 sps:$4 sm:$0xff]  }
  0x98   : > { %1509 = vmatpush2.bf16.msra.mxu0 %v2205_v21  ;;  %v2289_v21 = vld [vmem:[%s2745_s5 + $0x208] ss:$16 sps:$4 sm:$0xff]  }
  0x99   : > { %1550 = vmatpush2.bf16.msra.mxu1 %v2206_v22  ;;  %1510 = vmatprep.subr.bf16.mxu0 %v2207_v23  ;;  %v2294_v22 = vld [vmem:[%s2745_s5 + $0x16c] ss:$16 sps:$4 sm:$0xff]  }
  0x9a   : > { %1551 = vmatprep.subr.bf16.mxu1 %v2209_v24  ;;  %v2297_v23 = vld [vmem:[%s2745_s5 + $0x3ec] ss:$16 sps:$4 sm:$0xff]   ;;  %v2292_v24 = vld [vmem:[%s2745_s5 + $0x168] ss:$16 sps:$4 sm:$0xff]  }
  0x9c   : > { %1511 = vmatpush2.bf16.msra.mxu0 %v2211_v26  ;;  %v2295_v26 = vld [vmem:[%s2745_s5 + $0x3e8] ss:$16 sps:$4 sm:$0xff]  }
  0x9d   : > { %1552 = vmatpush2.bf16.msra.mxu1 %v2212_v27  ;;  %1512 = vmatprep.subr.bf16.mxu0 %v2213_v28  ;;  %v2300_v27 = vld [vmem:[%s2745_s5 + $0x14c] ss:$16 sps:$4 sm:$0xff]  }
  0x9e   : > { %1553 = vmatprep.subr.bf16.mxu1 %v2215_v31  ;;  %v2303_v28 = vld [vmem:[%s2745_s5 + $0x3cc] ss:$16 sps:$4 sm:$0xff]   ;;  %v2298_v31 = vld [vmem:[%s2745_s5 + $0x148] ss:$16 sps:$4 sm:$0xff]  }
  0xa0   : > { %1513 = vmatpush2.bf16.msra.mxu0 %v2217_v32  ;;  %v2301_v32 = vld [vmem:[%s2745_s5 + $0x3c8] ss:$16 sps:$4 sm:$0xff]  }
  0xa1   : > { %1554 = vmatpush2.bf16.msra.mxu1 %v2218_v33  ;;  %1572 = vmatprep.subr.bf16.mxu0 %v2222_v34  ;;  %v2306_v33 = vld [vmem:[%s2745_s5 + $0x12c] ss:$16 sps:$4 sm:$0xff]  }
  0xa2   : > { %1605 = vmatprep.subr.bf16.mxu1 %v2225_v35  ;;  %v2309_v34 = vld [vmem:[%s2745_s5 + $0x3ac] ss:$16 sps:$4 sm:$0xff]   ;;  %v2304_v35 = vld [vmem:[%s2745_s5 + $0x128] ss:$16 sps:$4 sm:$0xff]  }
  0xa3   : > { %1515 = vmatmul.mubr.bf16.vlgmr.msra.gmra.mxu0 %v2834_v36 }
  0xa4   : > { %1556 = vmatmul.mubr.bf16.vlgmr.msra.gmra.mxu1 %v2838_v37  ;;  %1573 = vmatpush1.bf16.msra.mxu0 %v2220_v38  ;;  %v2307_v38 = vld [vmem:[%s2745_s5 + $0x3a8] ss:$16 sps:$4 sm:$0xff]  }
  0xa5   : > { %1606 = vmatpush1.bf16.msra.mxu1 %v2223_v39  ;;  %1574 = vmatprep.subr.bf16.mxu0 %v2228_v42  ;;  %v2312_v39 = vld [vmem:[%s2745_s5 + $0x10c] ss:$16 sps:$4 sm:$0xff]  }
  0xa6   : > { %1607 = vmatprep.subr.bf16.mxu1 %v2231_v43  ;;  %1596 = vmatprep.mubr.bf16.mxu0 %v2381_v46  ;;  %v2315_v42 = vld [vmem:[%s2745_s5 + $0x38c] ss:$16 sps:$4 sm:$0xff]   ;;  %v2310_v43 = vld [vmem:[%s2745_s5 + $0x108] ss:$16 sps:$4 sm:$0xff]  }
  0xa7   : > { %1637 = vmatprep.mubr.bf16.mxu1 %v2772_v40  ;;  %v2246_v40 = vld [vmem:[%s2745_s5 + $0x6c] ss:$16 sps:$4 sm:$0xff]  }
  0xa8   : > { %1575 = vmatpush1.bf16.msra.mxu0 %v2226_v29  ;;  %v2313_v29 = vld [vmem:[%s2745_s5 + $0x388] ss:$16 sps:$4 sm:$0xff]  }
  0xa9   : > { %1608 = vmatpush1.bf16.msra.mxu1 %v2229_v44  ;;  %1576 = vmatprep.subr.bf16.mxu0 %v2234_v30  ;;  %v2318_v44 = vld [vmem:[%s2745_s5 + $0x36c] ss:$16 sps:$4 sm:$0xff]  }
  0xaa   : > { %1609 = vmatprep.subr.bf16.mxu1 %v2237_v45  ;;  %v2321_v30 = vld [vmem:[%s2745_s5 + $0x46c] ss:$16 sps:$4 sm:$0xff]   ;;  %v2316_v45 = vld [vmem:[%s2745_s5 + $0x368] ss:$16 sps:$4 sm:$0xff]  }
  0xac   : > { %1577 = vmatpush1.bf16.msra.mxu0 %v2232_v47  ;;  %v2319_v47 = vld [vmem:[%s2745_s5 + $0x468] ss:$16 sps:$4 sm:$0xff]  }
  0xad   : > { %1610 = vmatpush1.bf16.msra.mxu1 %v2235_v48  ;;  %1578 = vmatprep.subr.bf16.mxu0 %v2240_v49  ;;  %v2324_v48 = vld [vmem:[%s2745_s5 + $0x34c] ss:$16 sps:$4 sm:$0xff]  }
  0xae   : > { %1611 = vmatprep.subr.bf16.mxu1 %v2243_v50  ;;  %v2327_v49 = vld [vmem:[%s2745_s5 + $0x44c] ss:$16 sps:$4 sm:$0xff]   ;;  %v2322_v50 = vld [vmem:[%s2745_s5 + $0x348] ss:$16 sps:$4 sm:$0xff]  }
  0xb0   : > { %1579 = vmatpush1.bf16.msra.mxu0 %v2238_v52  ;;  %v2330_v52 = vld [vmem:[%s2745_s5 + $0x32c] ss:$16 sps:$4 sm:$0xff]  }
  0xb1   : > { %1612 = vmatpush1.bf16.msra.mxu1 %v2241_v53  ;;  %1646 = vmatprep.subr.bf16.mxu0 %v2249_v54  ;;  %v2333_v53 = vld [vmem:[%s2745_s5 + $0x42c] ss:$16 sps:$4 sm:$0xff]   ;;  %v2331_v54 = vld [vmem:[%s2745_s5 + $0x428] ss:$16 sps:$4 sm:$0xff]  }
  0xb2   : > { %1613 = vmatprep.subr.bf16.mxu1 %v2246_v40  ;;  %v2328_v40 = vld [vmem:[%s2745_s5 + $0x328] ss:$16 sps:$4 sm:$0xff]  }
  0xb3   : > { %2074 = vmatmul.mubr.msk.bf16.vlgmr.msra.gmra.mxu0 %vm1478_vm0, %v2863_v55 }
  0xb4   : > { %1647 = vmatpush1.bf16.msra.mxu0 %v2247_v57  ;;  %1678 = vmatprep.mubr.bf16.mxu0 %v2774_v41  ;;  %v2270_v41 = vld [vmem:[%s2745_s5 + $0x1ec] ss:$16 sps:$4 sm:$0xff]   ;;  %v2334_v57 = vld [vmem:[%s2745_s5 + $0x308] ss:$16 sps:$4 sm:$0xff]  }
  0xb5   : > { %1614 = vmatpush1.bf16.msra.mxu1 %v2244_v56  ;;  %1648 = vmatprep.subr.bf16.mxu0 %v2255_v59  ;;  %v2339_v56 = vld [vmem:[%s2745_s5 + $0x40c] ss:$16 sps:$4 sm:$0xff]  }
  0xb6   : > { %1615 = vmatprep.subr.bf16.mxu1 %v2252_v58  ;;  %v2337_v58 = vld [vmem:[%s2745_s5 + $0x408] ss:$16 sps:$4 sm:$0xff]  }
  0xb8   : > { %1649 = vmatpush1.bf16.msra.mxu0 %v2253_v61 }
  0xb9   : > { %1616 = vmatpush1.bf16.msra.mxu1 %v2250_v60  ;;  %1650 = vmatprep.subr.bf16.mxu0 %v2261_v63 }
  0xba   : > { %1617 = vmatprep.subr.bf16.mxu1 %v2258_v62 }
  0xbc   : > { %1651 = vmatpush1.bf16.msra.mxu0 %v2259_v1 }
  0xbd   : > { %1618 = vmatpush1.bf16.msra.mxu1 %v2256_v0  ;;  %1652 = vmatprep.subr.bf16.mxu0 %v2267_v3 }
  0xbe   : > { %1619 = vmatprep.subr.bf16.mxu1 %v2264_v2 }
  0xc0   : > { %1653 = vmatpush1.bf16.msra.mxu0 %v2265_v5 }
  0xc1   : > { %1620 = vmatpush1.bf16.msra.mxu1 %v2262_v4  ;;  %1654 = vmatprep.subr.bf16.mxu0 %v2273_v6 }
  0xc2   : > { %1621 = vmatprep.subr.bf16.mxu1 %v2270_v41 }
  0xc4   : > { %1655 = vmatpush1.bf16.msra.mxu0 %v2271_v8 }
  0xc5   : > { %1622 = vmatpush2.bf16.msra.mxu1 %v2268_v7  ;;  %1656 = vmatprep.subr.bf16.mxu0 %v2279_v10 }
  0xc6   : > { %1623 = vmatprep.subr.bf16.mxu1 %v2276_v9 }
  0xc8   : > { %1657 = vmatpush1.bf16.msra.mxu0 %v2277_v12  ;;  %v1760_v12 = vsub.s32 0, %v2743_v20 }
  0xc9   : > { %1624 = vmatpush2.bf16.msra.mxu1 %v2274_v11  ;;  %1658 = vmatprep.subr.bf16.mxu0 %v2285_v14  ;;  %v1768_v14 = vsub.s32 2, %v2743_v20 }
  0xca   : > { %1625 = vmatprep.subr.bf16.mxu1 %v2282_v13  ;;  %v1764_v13 = vsub.s32 1, %v2743_v20 }
  0xcc   : > { %1659 = vmatpush1.bf16.msra.mxu0 %v2283_v16  ;;  %v1756_v16 = vld [vmem:[%s557_s11] sm:$0xf] }
  0xcd   : > { %1626 = vmatpush2.bf16.msra.mxu1 %v2280_v15  ;;  %1660 = vmatprep.subr.bf16.mxu0 %v2291_v18  ;;  %v1772_v15 = vsub.s32 3, %v2743_v20  ;;  %v1765_v18 = vrot.slane %v1756_v16, %v1764_v13 }
  0xce   : > { %1627 = vmatprep.subr.bf16.mxu1 %v2288_v17  ;;  %v1761_v17 = vrot.slane %v1756_v16, %v1760_v12 }
  0xd0   : > { %1661 = vmatpush1.bf16.msra.mxu0 %v2289_v21  ;;  %v1773_v21 = vrot.slane %v1756_v16, %v1772_v15 }
  0xd1   : > { %1628 = vmatpush2.bf16.msra.mxu1 %v2286_v19  ;;  %1662 = vmatprep.subr.bf16.mxu0 %v2297_v23  ;;  %v1769_v19 = vrot.slane %v1756_v16, %v1768_v14 }
  0xd2   : > { %1629 = vmatprep.subr.bf16.mxu1 %v2294_v22 }
  0xd4   : > { %1663 = vmatpush2.bf16.msra.mxu0 %v2295_v26  ;;  %v1774_v26 = vcombine.low %v1761_v17, %v1765_v18 }
  0xd5   : > { %1630 = vmatpush2.bf16.msra.mxu1 %v2292_v24  ;;  %1664 = vmatprep.subr.bf16.mxu0 %v2303_v28 }
  0xd6   : > { %1631 = vmatprep.subr.bf16.mxu1 %v2300_v27  ;;  %v1775_v27 = vcombine.low %v1769_v19, %v1773_v21  ;;  %v1782_v20 = vrot.slane %v1774_v26, %v2750_v25 }
  0xd8   : > { %1665 = vmatpush2.bf16.msra.mxu0 %v2301_v32 }
  0xd9   : > { %1632 = vmatpush2.bf16.msra.mxu1 %v2298_v31  ;;  %1666 = vmatprep.subr.bf16.mxu0 %v2309_v34 }
  0xda   : > { %1633 = vmatprep.subr.bf16.mxu1 %v2306_v33 }
  0xdc   : > { %1667 = vmatpush2.bf16.msra.mxu0 %v2307_v38 }
  0xdd   : > { %1634 = vmatpush2.bf16.msra.mxu1 %v2304_v35  ;;  %1668 = vmatprep.subr.bf16.mxu0 %v2315_v42 }
  0xde   : > { %1635 = vmatprep.subr.bf16.mxu1 %v2312_v39  ;;  %v1789_v39 = vrot.slane %v1775_v27, %v2750_v25 }
  0xe0   : > { %1669 = vmatpush2.bf16.msra.mxu0 %v2313_v29 }
  0xe1   : > { %1636 = vmatpush2.bf16.msra.mxu1 %v2310_v43  ;;  %1670 = vmatprep.subr.bf16.mxu0 %v2318_v44 }
  0xe2   : > { %1695 = vmatprep.subr.bf16.mxu1 %v2321_v30 }
  0xe4   : > { %1638 = vmatmul.mubr.bf16.vlgmr.msra.gmra.mxu1 %v2834_v36  ;;  %1671 = vmatpush2.bf16.msra.mxu0 %v2316_v45  ;;  %v2336_v36 = vld [vmem:[%s2745_s5 + $0x30c] ss:$16 sps:$4 sm:$0xff]   ;;  %v1790_v45 = vcombine.low %v1782_v20, %v1789_v39 }
  0xe5   : > { %1696 = vmatpush1.bf16.msra.mxu1 %v2319_v47  ;;  %1672 = vmatprep.subr.bf16.mxu0 %v2324_v48 }
  0xe6   : > { %1697 = vmatprep.subr.bf16.mxu1 %v2327_v49  ;;  %1719 = vmatprep.mubr.bf16.mxu1 %v2381_v46 }
  0xe8   : > { %1673 = vmatpush2.bf16.msra.mxu0 %v2322_v50 }
  0xe9   : > { %1698 = vmatpush1.bf16.msra.mxu1 %v2325_v51  ;;  %1674 = vmatprep.subr.bf16.mxu0 %v2330_v52 }
  0xea   : > { %1699 = vmatprep.subr.bf16.mxu1 %v2333_v53 }
  0xec   : > { %1675 = vmatpush2.bf16.msra.mxu0 %v2328_v40 }
  0xed   : > { %1700 = vmatpush1.bf16.msra.mxu1 %v2331_v54  ;;  %1676 = vmatprep.subr.bf16.mxu0 %v2336_v36 }
  0xee   : > { %1701 = vmatprep.subr.bf16.mxu1 %v2339_v56 }
  0xf0   : > { %1677 = vmatpush2.bf16.msra.mxu0 %v2334_v57 }
  0xf1   : > { %1702 = vmatpush1.bf16.msra.mxu1 %v2337_v58 }
  0xf3   : > { %1679 = vmatmul.mubr.bf16.vlgmr.msra.gmra.mxu0 %v2838_v37 }
  0xf4   : > { %2075 = vmatmul.mubr.msk.bf16.vlgmr.msra.gmra.mxu1 %vm1478_vm0, %v2863_v55 }
 0x163   : > { %v1516_v46 = vpop.f32.mrf.mxu0 }
 0x164   : > { %v1557_v59 = vpop.f32.mrf.mxu1 }
 0x165   : > { %v1558_v60 = vadd.f32 %v1557_v59, %v1516_v46  ;;  %v1518_v61 = vpop.f32.mrf.mxu0 }
 0x166   : > { %v1559_v62 = vpop.f32.mrf.mxu1 }
 0x167   : > { %v1560_v63 = vadd.f32 %v1559_v62, %v1518_v61  ;;  %v1520_v0 = vpop.f32.mrf.mxu0 }
 0x168   : > { %v1561_v1 = vpop.f32.mrf.mxu1 }
 0x169   : > { %v1521_v2 = vpop.f32.mrf.mxu0 }
 0x16a   : > { %v1562_v3 = vpop.f32.mrf.mxu1 }
 0x173   : > { %v1598_v4 = vpop.f32.mrf.mxu0 }
 0x174   : > { %v1599_v5 = vadd.f32 %v1598_v4, %v1558_v60 }
 0x175   : > { %v1600_v41 = vpop.f32.mrf.mxu0 }
 0x176   : > { %v1601_v6 = vadd.f32 %v1600_v41, %v1560_v63 }
 0x177   : > { %v1602_v7 = vpop.f32.mrf.mxu0 }
 0x178   : > { %v1732_v37 = vcombine.low %v1599_v5, %v1601_v6 }
 0x179   : > { %v1603_v8 = vpop.f32.mrf.mxu0 }
 0x17a   : > { %v1740_v44 = vrot.slane %v1732_v37, %v2750_v25 }
 0x1a4   : > { %v1639_v55 = vpop.f32.mrf.mxu1 }
 0x1a6   : > { %v1641_v9 = vpop.f32.mrf.mxu1 }
 0x1a8   : > { %v1643_v10 = vpop.f32.mrf.mxu1 }
 0x1aa   : > { %v1644_v11 = vpop.f32.mrf.mxu1 }
 0x1b3   : > { %v1680_v22 = vpop.f32.mrf.mxu0 }
 0x1b4   : > { %v1721_v23 = vpop.f32.mrf.mxu1  ;;  %v1681_v24 = vadd.f32 %v1680_v22, %v1639_v55 }
 0x1b5   : > { %v1682_v28 = vpop.f32.mrf.mxu0 }
 0x1b6   : > { %v1723_v31 = vpop.f32.mrf.mxu1  ;;  %v1683_v32 = vadd.f32 %v1682_v28, %v1641_v9  ;;  %v1722_v35 = vadd.f32 %v1721_v23, %v1681_v24 }
 0x1b7   : > { %v1684_v33 = vpop.f32.mrf.mxu0 }
 0x1b8   : > { %v1725_v34 = vpop.f32.mrf.mxu1  ;;  %v1724_v38 = vadd.f32 %v1723_v31, %v1683_v32 }
 0x1b9   : > { %v1685_v42 = vpop.f32.mrf.mxu0 }
 0x1ba   : > { %v1726_v43 = vpop.f32.mrf.mxu1  ;;  %v1733_v29 = vcombine.low %v1722_v35, %v1724_v38 }
 0x1bc   : > { %v1747_v30 = vrot.slane %v1733_v29, %v2750_v25 }
 0x1be   : > { %v1748_v47 = vcombine.low %v1740_v44, %v1747_v30 }
 0x1c0   : > { %v1792_v48 = vadd.f32 %v1790_v45, %v1748_v47 }
 0x1c2   : > { %v1793_v49 = vmax.f32 %v1792_v48, 0.0 }
 0x1c4   : > { %1794 = vst [vmem:[%s567_s19] sm:$0xff] %v1793_v49 }
 0x1c5 PF: > { %s13_s16 = sadd.s32 1, %s2378_s16   ;;  %s2973_s12 = smov %s2366_s13 }
 0x1c6   : > { %p10_p10 = scmp.ge.s32.totalorder %s13_s16, 10   ;;  %s2974_s13 = smov %s2437_s20 }
 0x1c7   : > { %s2975_s14 = smov %s2374_s15  ;;  %s2976_s15 = smov %s2978_s17 }
 0x1c8   :  { %12 = sbr.rel (!%p10_p10) target bundleno = 3 (0x3), region = 104 }

// kernel: alexnet_forward.20
= control target key start
LH: loop header
LB: loop body
LE: loop exit
PB: predicated region body
PF: predicated region fallthrough
CT: control target
= control target key end

     0   :  { %s2171_s12 = smov 0   ;;  %s2173_s13 = smov 0   ;;  %s2696_s0 = inlined_call_operand.vmem [shape: f32[2,4096], index: 0, kind: input, shape index: {}]   ;;  %s2697_s1 = inlined_call_operand.vmem [shape: bf16[4096,4096], index: 1, kind: input, shape index: {}]   ;;  %s2698_s2 = inlined_call_operand.vmem [shape: f32[1,4096], index: 2, kind: input, shape index: {}]   ;;  %s2699_s3 = inlined_call_operand.vmem [shape: f32[2,4096], index: 3, kind: output, shape index: {}]  }
   0x1   :  { %s2175_s14 = smov 0   ;;  %s2177_s15 = smov 0  }
   0x2   :  { %s2179_s16 = smov 0   ;;  %s2181_s17 = smov 0  }
   0x3   :  { %s2183_s18 = smov 0  }
   0x4 LB: > { %s25_s19 = sadd.s32 1, %s2139_s16  ;;  %s28_s20 = sadd.s32 1, %s2143_s17  ;;  %s2147_s18 = sphi %s2183_s18, %s13_s18   ;;  %s2143_s17 = sphi %s2181_s17, %s2705_s17   ;;  %s2139_s16 = sphi %s2179_s16, %s2704_s16   ;;  %s2135_s15 = sphi %s2177_s15, %s2703_s15   ;;  %s2131_s14 = sphi %s2175_s14, %s2702_s14   ;;  %s2127_s13 = sphi %s2173_s13, %s2701_s13   ;;  %s2123_s12 = sphi %s2171_s12, %s2700_s12  }
   0x5   : > { %p26_p0 = scmp.ge.s32.totalorder %s25_s19, 8  ;;  %p76_p1 = scmp.ne.s32.totalorder %s2127_s13, %s2123_s12 }
   0x6   : > { %p77_p2 = scmp.eq.s32.totalorder %s2147_s18, 0  ;;  %s69_s24 = sadd.s32 1, %s2127_s13 }
   0x7   : > { %s2707_s19 = smov (%p26_p0, %s25_s19), 0  ;;  %s2709_s20 = smov (!%p26_p0, %s28_s20), %s2143_s17 }
   0x8   : > { %p78_p3 = por %p77_p2, %p76_p1  ;;  %p30_p4 = scmp.ge.s32.totalorder %s2709_s20, 8 }
   0x9   : > { %s64_s21 = ssub.s32 %s2139_s16, %s2707_s19  ;;  %p1696_p6 = scmp.ge.s32.totalorder %s2147_s18, 64 }
   0xa   : > { %s2711_s20 = smov (%p30_p4, %s2709_s20), 0 }
   0xb   : > { %s65_s22 = ssub.s32 %s2143_s17, %s2711_s20  ;;  %156 = sbr.rel (%p1696_p6) target bundleno = 87 (0x57), region = 16 }
   0xc   : > { %s66_s23 = sor.u32 %s65_s22, %s64_s21 }
   0xd   : > { %p67_p5 = scmp.eq.s32.totalorder %s66_s23, 0 }
   0xf   : > { %s2222_s25 = scalar_select %p67_p5, %s2127_s13, %s69_s24  }
  0x10   : > { %172 = sbr.rel (!%p78_p3) target bundleno = 87 (0x57), region = 24  ;;  %s174_s26 = sand.u32 (%p78_p3), 1, %s2127_s13  }
  0x11   : > { %s1699_s27 = sshll.u32 (%p78_p3), %s2143_s17, 2  ;;  %s1697_s28 = sshll.u32 (%p78_p3), %s174_s26, 10 }
  0x12   : > { %s1841_s29 = sshll.u32 (%p78_p3), %s2139_s16, 11  ;;  %s2236_s8 = scalar_lea.vmem (%p78_p3), [#allocation3], %s1697_s28 }
  0x13   : > { %s180_s30 = sadd.s32 (%p78_p3), %s1841_s29, %s1699_s27 }
  0x14   : > { %s1701_s4 = sshll.u32 (%p78_p3), %s180_s30, 2 }
  0x15   : > { %s2231_s7 = scalar_lea.vmem %s2697_s1, %s1701_s4 }
  0x16   : > { %v195_v0 = vld [vmem:[%s2231_s7] sm:$0xff]  ;;  %v197_v1 = vld [vmem:[%s2231_s7 + $0x8] sm:$0xff] }
  0x17   : > { %v199_v2 = vld [vmem:[%s2231_s7 + $0x80] sm:$0xff]  ;;  %196 = vst [vmem:[%s2236_s8] sm:$0xff] %v195_v0  ;;  %198 = vst [vmem:[%s2236_s8 + $0x8] sm:$0xff] %v197_v1  ;;  %v201_v3 = vld [vmem:[%s2231_s7 + $0x88] sm:$0xff] }
  0x18   : > { %200 = vst [vmem:[%s2236_s8 + $0x10] sm:$0xff] %v199_v2  ;;  %v203_v4 = vld [vmem:[%s2231_s7 + $0x100] sm:$0xff]  ;;  %v205_v5 = vld [vmem:[%s2231_s7 + $0x108] sm:$0xff]  ;;  %202 = vst [vmem:[%s2236_s8 + $0x18] sm:$0xff] %v201_v3 }
  0x19   : > { %204 = vst [vmem:[%s2236_s8 + $0x20] sm:$0xff] %v203_v4  ;;  %206 = vst [vmem:[%s2236_s8 + $0x28] sm:$0xff] %v205_v5  ;;  %v207_v6 = vld [vmem:[%s2231_s7 + $0x180] sm:$0xff]  ;;  %v209_v7 = vld [vmem:[%s2231_s7 + $0x188] sm:$0xff] }
  0x1a   : > { %v211_v8 = vld [vmem:[%s2231_s7 + $0x200] sm:$0xff]  ;;  %208 = vst [vmem:[%s2236_s8 + $0x30] sm:$0xff] %v207_v6  ;;  %210 = vst [vmem:[%s2236_s8 + $0x38] sm:$0xff] %v209_v7  ;;  %v213_v9 = vld [vmem:[%s2231_s7 + $0x208] sm:$0xff] }
  0x1b   : > { %212 = vst [vmem:[%s2236_s8 + $0x40] sm:$0xff] %v211_v8  ;;  %v215_v10 = vld [vmem:[%s2231_s7 + $0x280] sm:$0xff]  ;;  %v217_v11 = vld [vmem:[%s2231_s7 + $0x288] sm:$0xff]  ;;  %214 = vst [vmem:[%s2236_s8 + $0x48] sm:$0xff] %v213_v9 }
  0x1c   : > { %216 = vst [vmem:[%s2236_s8 + $0x50] sm:$0xff] %v215_v10  ;;  %218 = vst [vmem:[%s2236_s8 + $0x58] sm:$0xff] %v217_v11  ;;  %v219_v12 = vld [vmem:[%s2231_s7 + $0x300] sm:$0xff]  ;;  %v221_v13 = vld [vmem:[%s2231_s7 + $0x308] sm:$0xff] }
  0x1d   : > { %v223_v14 = vld [vmem:[%s2231_s7 + $0x380] sm:$0xff]  ;;  %220 = vst [vmem:[%s2236_s8 + $0x60] sm:$0xff] %v219_v12  ;;  %222 = vst [vmem:[%s2236_s8 + $0x68] sm:$0xff] %v221_v13  ;;  %v225_v15 = vld [vmem:[%s2231_s7 + $0x388] sm:$0xff] }
  0x1e   : > { %224 = vst [vmem:[%s2236_s8 + $0x70] sm:$0xff] %v223_v14  ;;  %v227_v16 = vld [vmem:[%s2231_s7 + $0x400] sm:$0xff]  ;;  %v229_v17 = vld [vmem:[%s2231_s7 + $0x408] sm:$0xff]  ;;  %226 = vst [vmem:[%s2236_s8 + $0x78] sm:$0xff] %v225_v15 }
  0x1f   : > { %228 = vst [vmem:[%s2236_s8 + $0x80] sm:$0xff] %v227_v16  ;;  %230 = vst [vmem:[%s2236_s8 + $0x88] sm:$0xff] %v229_v17  ;;  %v231_v18 = vld [vmem:[%s2231_s7 + $0x480] sm:$0xff]  ;;  %v233_v19 = vld [vmem:[%s2231_s7 + $0x488] sm:$0xff] }
  0x20   : > { %v235_v20 = vld [vmem:[%s2231_s7 + $0x500] sm:$0xff]  ;;  %232 = vst [vmem:[%s2236_s8 + $0x90] sm:$0xff] %v231_v18  ;;  %234 = vst [vmem:[%s2236_s8 + $0x98] sm:$0xff] %v233_v19  ;;  %v237_v21 = vld [vmem:[%s2231_s7 + $0x508] sm:$0xff] }
  0x21   : > { %236 = vst [vmem:[%s2236_s8 + $0xa0] sm:$0xff] %v235_v20  ;;  %v239_v22 = vld [vmem:[%s2231_s7 + $0x580] sm:$0xff]  ;;  %v241_v23 = vld [vmem:[%s2231_s7 + $0x588] sm:$0xff]  ;;  %238 = vst [vmem:[%s2236_s8 + $0xa8] sm:$0xff] %v237_v21 }
  0x22   : > { %240 = vst [vmem:[%s2236_s8 + $0xb0] sm:$0xff] %v239_v22  ;;  %242 = vst [vmem:[%s2236_s8 + $0xb8] sm:$0xff] %v241_v23  ;;  %v243_v24 = vld [vmem:[%s2231_s7 + $0x600] sm:$0xff]  ;;  %v245_v25 = vld [vmem:[%s2231_s7 + $0x608] sm:$0xff] }
  0x23   : > { %v247_v26 = vld [vmem:[%s2231_s7 + $0x680] sm:$0xff]  ;;  %244 = vst [vmem:[%s2236_s8 + $0xc0] sm:$0xff] %v243_v24  ;;  %246 = vst [vmem:[%s2236_s8 + $0xc8] sm:$0xff] %v245_v25  ;;  %v249_v27 = vld [vmem:[%s2231_s7 + $0x688] sm:$0xff] }
  0x24   : > { %248 = vst [vmem:[%s2236_s8 + $0xd0] sm:$0xff] %v247_v26  ;;  %v251_v28 = vld [vmem:[%s2231_s7 + $0x700] sm:$0xff]  ;;  %v253_v29 = vld [vmem:[%s2231_s7 + $0x708] sm:$0xff]  ;;  %250 = vst [vmem:[%s2236_s8 + $0xd8] sm:$0xff] %v249_v27 }
  0x25   : > { %252 = vst [vmem:[%s2236_s8 + $0xe0] sm:$0xff] %v251_v28  ;;  %254 = vst [vmem:[%s2236_s8 + $0xe8] sm:$0xff] %v253_v29  ;;  %v255_v30 = vld [vmem:[%s2231_s7 + $0x780] sm:$0xff]  ;;  %v257_v31 = vld [vmem:[%s2231_s7 + $0x788] sm:$0xff] }
  0x26   : > { %v259_v32 = vld [vmem:[%s2231_s7 + $0x800] sm:$0xff]  ;;  %256 = vst [vmem:[%s2236_s8 + $0xf0] sm:$0xff] %v255_v30  ;;  %258 = vst [vmem:[%s2236_s8 + $0xf8] sm:$0xff] %v257_v31  ;;  %v261_v33 = vld [vmem:[%s2231_s7 + $0x808] sm:$0xff] }
  0x27   : > { %260 = vst [vmem:[%s2236_s8 + $0x100] sm:$0xff] %v259_v32  ;;  %v263_v34 = vld [vmem:[%s2231_s7 + $0x880] sm:$0xff]  ;;  %v265_v35 = vld [vmem:[%s2231_s7 + $0x888] sm:$0xff]  ;;  %262 = vst [vmem:[%s2236_s8 + $0x108] sm:$0xff] %v261_v33 }
  0x28   : > { %264 = vst [vmem:[%s2236_s8 + $0x110] sm:$0xff] %v263_v34  ;;  %266 = vst [vmem:[%s2236_s8 + $0x118] sm:$0xff] %v265_v35  ;;  %v267_v36 = vld [vmem:[%s2231_s7 + $0x900] sm:$0xff]  ;;  %v269_v37 = vld [vmem:[%s2231_s7 + $0x908] sm:$0xff] }
  0x29   : > { %v271_v38 = vld [vmem:[%s2231_s7 + $0x980] sm:$0xff]  ;;  %268 = vst [vmem:[%s2236_s8 + $0x120] sm:$0xff] %v267_v36  ;;  %270 = vst [vmem:[%s2236_s8 + $0x128] sm:$0xff] %v269_v37  ;;  %v273_v39 = vld [vmem:[%s2231_s7 + $0x988] sm:$0xff] }
  0x2a   : > { %272 = vst [vmem:[%s2236_s8 + $0x130] sm:$0xff] %v271_v38  ;;  %v275_v40 = vld [vmem:[%s2231_s7 + $0xa00] sm:$0xff]  ;;  %v277_v41 = vld [vmem:[%s2231_s7 + $0xa08] sm:$0xff]  ;;  %274 = vst [vmem:[%s2236_s8 + $0x138] sm:$0xff] %v273_v39 }
  0x2b   : > { %276 = vst [vmem:[%s2236_s8 + $0x140] sm:$0xff] %v275_v40  ;;  %278 = vst [vmem:[%s2236_s8 + $0x148] sm:$0xff] %v277_v41  ;;  %v279_v42 = vld [vmem:[%s2231_s7 + $0xa80] sm:$0xff]  ;;  %v281_v43 = vld [vmem:[%s2231_s7 + $0xa88] sm:$0xff] }
  0x2c   : > { %v283_v44 = vld [vmem:[%s2231_s7 + $0xb00] sm:$0xff]  ;;  %280 = vst [vmem:[%s2236_s8 + $0x150] sm:$0xff] %v279_v42  ;;  %282 = vst [vmem:[%s2236_s8 + $0x158] sm:$0xff] %v281_v43  ;;  %v285_v45 = vld [vmem:[%s2231_s7 + $0xb08] sm:$0xff] }
  0x2d   : > { %284 = vst [vmem:[%s2236_s8 + $0x160] sm:$0xff] %v283_v44  ;;  %v287_v46 = vld [vmem:[%s2231_s7 + $0xb80] sm:$0xff]  ;;  %v289_v47 = vld [vmem:[%s2231_s7 + $0xb88] sm:$0xff]  ;;  %286 = vst [vmem:[%s2236_s8 + $0x168] sm:$0xff] %v285_v45 }
  0x2e   : > { %288 = vst [vmem:[%s2236_s8 + $0x170] sm:$0xff] %v287_v46  ;;  %290 = vst [vmem:[%s2236_s8 + $0x178] sm:$0xff] %v289_v47  ;;  %v291_v48 = vld [vmem:[%s2231_s7 + $0xc00] sm:$0xff]  ;;  %v293_v49 = vld [vmem:[%s2231_s7 + $0xc08] sm:$0xff] }
  0x2f   : > { %v295_v50 = vld [vmem:[%s2231_s7 + $0xc80] sm:$0xff]  ;;  %292 = vst [vmem:[%s2236_s8 + $0x180] sm:$0xff] %v291_v48  ;;  %294 = vst [vmem:[%s2236_s8 + $0x188] sm:$0xff] %v293_v49  ;;  %v297_v51 = vld [vmem:[%s2231_s7 + $0xc88] sm:$0xff] }
  0x30   : > { %296 = vst [vmem:[%s2236_s8 + $0x190] sm:$0xff] %v295_v50  ;;  %v299_v52 = vld [vmem:[%s2231_s7 + $0xd00] sm:$0xff]  ;;  %v301_v53 = vld [vmem:[%s2231_s7 + $0xd08] sm:$0xff]  ;;  %298 = vst [vmem:[%s2236_s8 + $0x198] sm:$0xff] %v297_v51 }
  0x31   : > { %300 = vst [vmem:[%s2236_s8 + $0x1a0] sm:$0xff] %v299_v52  ;;  %302 = vst [vmem:[%s2236_s8 + $0x1a8] sm:$0xff] %v301_v53  ;;  %v303_v54 = vld [vmem:[%s2231_s7 + $0xd80] sm:$0xff]  ;;  %v305_v55 = vld [vmem:[%s2231_s7 + $0xd88] sm:$0xff] }
  0x32   : > { %v307_v56 = vld [vmem:[%s2231_s7 + $0xe00] sm:$0xff]  ;;  %304 = vst [vmem:[%s2236_s8 + $0x1b0] sm:$0xff] %v303_v54  ;;  %306 = vst [vmem:[%s2236_s8 + $0x1b8] sm:$0xff] %v305_v55  ;;  %v309_v57 = vld [vmem:[%s2231_s7 + $0xe08] sm:$0xff] }
  0x33   : > { %308 = vst [vmem:[%s2236_s8 + $0x1c0] sm:$0xff] %v307_v56  ;;  %v311_v58 = vld [vmem:[%s2231_s7 + $0xe80] sm:$0xff]  ;;  %v313_v59 = vld [vmem:[%s2231_s7 + $0xe88] sm:$0xff]  ;;  %310 = vst [vmem:[%s2236_s8 + $0x1c8] sm:$0xff] %v309_v57 }
  0x34   : > { %312 = vst [vmem:[%s2236_s8 + $0x1d0] sm:$0xff] %v311_v58  ;;  %314 = vst [vmem:[%s2236_s8 + $0x1d8] sm:$0xff] %v313_v59  ;;  %v315_v60 = vld [vmem:[%s2231_s7 + $0xf00] sm:$0xff]  ;;  %v317_v61 = vld [vmem:[%s2231_s7 + $0xf08] sm:$0xff] }
  0x35   : > { %v319_v62 = vld [vmem:[%s2231_s7 + $0xf80] sm:$0xff]  ;;  %316 = vst [vmem:[%s2236_s8 + $0x1e0] sm:$0xff] %v315_v60  ;;  %318 = vst [vmem:[%s2236_s8 + $0x1e8] sm:$0xff] %v317_v61  ;;  %v321_v63 = vld [vmem:[%s2231_s7 + $0xf88] sm:$0xff] }
  0x36   : > { %320 = vst [vmem:[%s2236_s8 + $0x1f0] sm:$0xff] %v319_v62  ;;  %v323_v0 = vld [vmem:[%s2231_s7 + $0x1000] sm:$0xff]  ;;  %v325_v1 = vld [vmem:[%s2231_s7 + $0x1008] sm:$0xff]  ;;  %322 = vst [vmem:[%s2236_s8 + $0x1f8] sm:$0xff] %v321_v63 }
  0x37   : > { %324 = vst [vmem:[%s2236_s8 + $0x200] sm:$0xff] %v323_v0  ;;  %326 = vst [vmem:[%s2236_s8 + $0x208] sm:$0xff] %v325_v1  ;;  %v327_v2 = vld [vmem:[%s2231_s7 + $0x1080] sm:$0xff]  ;;  %v329_v3 = vld [vmem:[%s2231_s7 + $0x1088] sm:$0xff] }
  0x38   : > { %v331_v4 = vld [vmem:[%s2231_s7 + $0x1100] sm:$0xff]  ;;  %328 = vst [vmem:[%s2236_s8 + $0x210] sm:$0xff] %v327_v2  ;;  %330 = vst [vmem:[%s2236_s8 + $0x218] sm:$0xff] %v329_v3  ;;  %v333_v5 = vld [vmem:[%s2231_s7 + $0x1108] sm:$0xff] }
  0x39   : > { %332 = vst [vmem:[%s2236_s8 + $0x220] sm:$0xff] %v331_v4  ;;  %v335_v6 = vld [vmem:[%s2231_s7 + $0x1180] sm:$0xff]  ;;  %v337_v7 = vld [vmem:[%s2231_s7 + $0x1188] sm:$0xff]  ;;  %334 = vst [vmem:[%s2236_s8 + $0x228] sm:$0xff] %v333_v5 }
  0x3a   : > { %336 = vst [vmem:[%s2236_s8 + $0x230] sm:$0xff] %v335_v6  ;;  %338 = vst [vmem:[%s2236_s8 + $0x238] sm:$0xff] %v337_v7  ;;  %v339_v8 = vld [vmem:[%s2231_s7 + $0x1200] sm:$0xff]  ;;  %v341_v9 = vld [vmem:[%s2231_s7 + $0x1208] sm:$0xff] }
  0x3b   : > { %v343_v10 = vld [vmem:[%s2231_s7 + $0x1280] sm:$0xff]  ;;  %340 = vst [vmem:[%s2236_s8 + $0x240] sm:$0xff] %v339_v8  ;;  %342 = vst [vmem:[%s2236_s8 + $0x248] sm:$0xff] %v341_v9  ;;  %v345_v11 = vld [vmem:[%s2231_s7 + $0x1288] sm:$0xff] }
  0x3c   : > { %344 = vst [vmem:[%s2236_s8 + $0x250] sm:$0xff] %v343_v10  ;;  %v347_v12 = vld [vmem:[%s2231_s7 + $0x1300] sm:$0xff]  ;;  %v349_v13 = vld [vmem:[%s2231_s7 + $0x1308] sm:$0xff]  ;;  %346 = vst [vmem:[%s2236_s8 + $0x258] sm:$0xff] %v345_v11 }
  0x3d   : > { %348 = vst [vmem:[%s2236_s8 + $0x260] sm:$0xff] %v347_v12  ;;  %350 = vst [vmem:[%s2236_s8 + $0x268] sm:$0xff] %v349_v13  ;;  %v351_v14 = vld [vmem:[%s2231_s7 + $0x1380] sm:$0xff]  ;;  %v353_v15 = vld [vmem:[%s2231_s7 + $0x1388] sm:$0xff] }
  0x3e   : > { %v355_v16 = vld [vmem:[%s2231_s7 + $0x1400] sm:$0xff]  ;;  %352 = vst [vmem:[%s2236_s8 + $0x270] sm:$0xff] %v351_v14  ;;  %354 = vst [vmem:[%s2236_s8 + $0x278] sm:$0xff] %v353_v15  ;;  %v357_v17 = vld [vmem:[%s2231_s7 + $0x1408] sm:$0xff] }
  0x3f   : > { %356 = vst [vmem:[%s2236_s8 + $0x280] sm:$0xff] %v355_v16  ;;  %v359_v18 = vld [vmem:[%s2231_s7 + $0x1480] sm:$0xff]  ;;  %v361_v19 = vld [vmem:[%s2231_s7 + $0x1488] sm:$0xff]  ;;  %358 = vst [vmem:[%s2236_s8 + $0x288] sm:$0xff] %v357_v17 }
  0x40   : > { %360 = vst [vmem:[%s2236_s8 + $0x290] sm:$0xff] %v359_v18  ;;  %362 = vst [vmem:[%s2236_s8 + $0x298] sm:$0xff] %v361_v19  ;;  %v363_v20 = vld [vmem:[%s2231_s7 + $0x1500] sm:$0xff]  ;;  %v365_v21 = vld [vmem:[%s2231_s7 + $0x1508] sm:$0xff] }
  0x41   : > { %v367_v22 = vld [vmem:[%s2231_s7 + $0x1580] sm:$0xff]  ;;  %364 = vst [vmem:[%s2236_s8 + $0x2a0] sm:$0xff] %v363_v20  ;;  %366 = vst [vmem:[%s2236_s8 + $0x2a8] sm:$0xff] %v365_v21  ;;  %v369_v23 = vld [vmem:[%s2231_s7 + $0x1588] sm:$0xff] }
  0x42   : > { %368 = vst [vmem:[%s2236_s8 + $0x2b0] sm:$0xff] %v367_v22  ;;  %v371_v24 = vld [vmem:[%s2231_s7 + $0x1600] sm:$0xff]  ;;  %v373_v25 = vld [vmem:[%s2231_s7 + $0x1608] sm:$0xff]  ;;  %370 = vst [vmem:[%s2236_s8 + $0x2b8] sm:$0xff] %v369_v23 }
  0x43   : > { %372 = vst [vmem:[%s2236_s8 + $0x2c0] sm:$0xff] %v371_v24  ;;  %374 = vst [vmem:[%s2236_s8 + $0x2c8] sm:$0xff] %v373_v25  ;;  %v375_v26 = vld [vmem:[%s2231_s7 + $0x1680] sm:$0xff]  ;;  %v377_v27 = vld [vmem:[%s2231_s7 + $0x1688] sm:$0xff] }
  0x44   : > { %v379_v28 = vld [vmem:[%s2231_s7 + $0x1700] sm:$0xff]  ;;  %376 = vst [vmem:[%s2236_s8 + $0x2d0] sm:$0xff] %v375_v26  ;;  %378 = vst [vmem:[%s2236_s8 + $0x2d8] sm:$0xff] %v377_v27  ;;  %v381_v29 = vld [vmem:[%s2231_s7 + $0x1708] sm:$0xff] }
  0x45   : > { %380 = vst [vmem:[%s2236_s8 + $0x2e0] sm:$0xff] %v379_v28  ;;  %v383_v30 = vld [vmem:[%s2231_s7 + $0x1780] sm:$0xff]  ;;  %v385_v31 = vld [vmem:[%s2231_s7 + $0x1788] sm:$0xff]  ;;  %382 = vst [vmem:[%s2236_s8 + $0x2e8] sm:$0xff] %v381_v29 }
  0x46   : > { %384 = vst [vmem:[%s2236_s8 + $0x2f0] sm:$0xff] %v383_v30  ;;  %386 = vst [vmem:[%s2236_s8 + $0x2f8] sm:$0xff] %v385_v31  ;;  %v387_v32 = vld [vmem:[%s2231_s7 + $0x1800] sm:$0xff]  ;;  %v389_v33 = vld [vmem:[%s2231_s7 + $0x1808] sm:$0xff] }
  0x47   : > { %v391_v34 = vld [vmem:[%s2231_s7 + $0x1880] sm:$0xff]  ;;  %388 = vst [vmem:[%s2236_s8 + $0x300] sm:$0xff] %v387_v32  ;;  %390 = vst [vmem:[%s2236_s8 + $0x308] sm:$0xff] %v389_v33  ;;  %v393_v35 = vld [vmem:[%s2231_s7 + $0x1888] sm:$0xff] }
  0x48   : > { %392 = vst [vmem:[%s2236_s8 + $0x310] sm:$0xff] %v391_v34  ;;  %v395_v36 = vld [vmem:[%s2231_s7 + $0x1900] sm:$0xff]  ;;  %v397_v37 = vld [vmem:[%s2231_s7 + $0x1908] sm:$0xff]  ;;  %394 = vst [vmem:[%s2236_s8 + $0x318] sm:$0xff] %v393_v35 }
  0x49   : > { %396 = vst [vmem:[%s2236_s8 + $0x320] sm:$0xff] %v395_v36  ;;  %398 = vst [vmem:[%s2236_s8 + $0x328] sm:$0xff] %v397_v37  ;;  %v399_v38 = vld [vmem:[%s2231_s7 + $0x1980] sm:$0xff]  ;;  %v401_v39 = vld [vmem:[%s2231_s7 + $0x1988] sm:$0xff] }
  0x4a   : > { %v403_v40 = vld [vmem:[%s2231_s7 + $0x1a00] sm:$0xff]  ;;  %400 = vst [vmem:[%s2236_s8 + $0x330] sm:$0xff] %v399_v38  ;;  %402 = vst [vmem:[%s2236_s8 + $0x338] sm:$0xff] %v401_v39  ;;  %v405_v41 = vld [vmem:[%s2231_s7 + $0x1a08] sm:$0xff] }
  0x4b   : > { %404 = vst [vmem:[%s2236_s8 + $0x340] sm:$0xff] %v403_v40  ;;  %v407_v42 = vld [vmem:[%s2231_s7 + $0x1a80] sm:$0xff]  ;;  %v409_v43 = vld [vmem:[%s2231_s7 + $0x1a88] sm:$0xff]  ;;  %406 = vst [vmem:[%s2236_s8 + $0x348] sm:$0xff] %v405_v41 }
  0x4c   : > { %408 = vst [vmem:[%s2236_s8 + $0x350] sm:$0xff] %v407_v42  ;;  %410 = vst [vmem:[%s2236_s8 + $0x358] sm:$0xff] %v409_v43  ;;  %v411_v44 = vld [vmem:[%s2231_s7 + $0x1b00] sm:$0xff]  ;;  %v413_v45 = vld [vmem:[%s2231_s7 + $0x1b08] sm:$0xff] }
  0x4d   : > { %v415_v46 = vld [vmem:[%s2231_s7 + $0x1b80] sm:$0xff]  ;;  %412 = vst [vmem:[%s2236_s8 + $0x360] sm:$0xff] %v411_v44  ;;  %414 = vst [vmem:[%s2236_s8 + $0x368] sm:$0xff] %v413_v45  ;;  %v417_v47 = vld [vmem:[%s2231_s7 + $0x1b88] sm:$0xff] }
  0x4e   : > { %416 = vst [vmem:[%s2236_s8 + $0x370] sm:$0xff] %v415_v46  ;;  %v419_v48 = vld [vmem:[%s2231_s7 + $0x1c00] sm:$0xff]  ;;  %v421_v49 = vld [vmem:[%s2231_s7 + $0x1c08] sm:$0xff]  ;;  %418 = vst [vmem:[%s2236_s8 + $0x378] sm:$0xff] %v417_v47 }
  0x4f   : > { %420 = vst [vmem:[%s2236_s8 + $0x380] sm:$0xff] %v419_v48  ;;  %422 = vst [vmem:[%s2236_s8 + $0x388] sm:$0xff] %v421_v49  ;;  %v423_v50 = vld [vmem:[%s2231_s7 + $0x1c80] sm:$0xff]  ;;  %v425_v51 = vld [vmem:[%s2231_s7 + $0x1c88] sm:$0xff] }
  0x50   : > { %v427_v52 = vld [vmem:[%s2231_s7 + $0x1d00] sm:$0xff]  ;;  %424 = vst [vmem:[%s2236_s8 + $0x390] sm:$0xff] %v423_v50  ;;  %426 = vst [vmem:[%s2236_s8 + $0x398] sm:$0xff] %v425_v51  ;;  %v429_v53 = vld [vmem:[%s2231_s7 + $0x1d08] sm:$0xff] }
  0x51   : > { %428 = vst [vmem:[%s2236_s8 + $0x3a0] sm:$0xff] %v427_v52  ;;  %v431_v54 = vld [vmem:[%s2231_s7 + $0x1d80] sm:$0xff]  ;;  %v433_v55 = vld [vmem:[%s2231_s7 + $0x1d88] sm:$0xff]  ;;  %430 = vst [vmem:[%s2236_s8 + $0x3a8] sm:$0xff] %v429_v53 }
  0x52   : > { %432 = vst [vmem:[%s2236_s8 + $0x3b0] sm:$0xff] %v431_v54  ;;  %434 = vst [vmem:[%s2236_s8 + $0x3b8] sm:$0xff] %v433_v55  ;;  %v435_v56 = vld [vmem:[%s2231_s7 + $0x1e00] sm:$0xff]  ;;  %v437_v57 = vld [vmem:[%s2231_s7 + $0x1e08] sm:$0xff] }
  0x53   : > { %v439_v58 = vld [vmem:[%s2231_s7 + $0x1e80] sm:$0xff]  ;;  %436 = vst [vmem:[%s2236_s8 + $0x3c0] sm:$0xff] %v435_v56  ;;  %438 = vst [vmem:[%s2236_s8 + $0x3c8] sm:$0xff] %v437_v57  ;;  %v441_v59 = vld [vmem:[%s2231_s7 + $0x1e88] sm:$0xff] }
  0x54   : > { %440 = vst [vmem:[%s2236_s8 + $0x3d0] sm:$0xff] %v439_v58  ;;  %v443_v60 = vld [vmem:[%s2231_s7 + $0x1f00] sm:$0xff]  ;;  %v445_v61 = vld [vmem:[%s2231_s7 + $0x1f08] sm:$0xff]  ;;  %442 = vst [vmem:[%s2236_s8 + $0x3d8] sm:$0xff] %v441_v59 }
  0x55   : > { %444 = vst [vmem:[%s2236_s8 + $0x3e0] sm:$0xff] %v443_v60  ;;  %446 = vst [vmem:[%s2236_s8 + $0x3e8] sm:$0xff] %v445_v61  ;;  %v447_v62 = vld [vmem:[%s2231_s7 + $0x1f80] sm:$0xff]  ;;  %v449_v63 = vld [vmem:[%s2231_s7 + $0x1f88] sm:$0xff] }
  0x56   : > { %448 = vst [vmem:[%s2236_s8 + $0x3f0] sm:$0xff] %v447_v62  ;;  %450 = vst [vmem:[%s2236_s8 + $0x3f8] sm:$0xff] %v449_v63 }
  0x57 PF: > { %p1702_p7 = scmp.ge.s32.totalorder %s2147_s18, 1  ;;  %p463_p8 = scmp.lt.s32.totalorder %s2147_s18, 65 }
  0x59   : > { %p464_p9 = pnand %p1702_p7, %p463_p8 }
  0x5a   : > { %s470_s9 = sand.u32 (!%p464_p9), 1, %s2123_s12   ;;  %s1704_s10 = sshll.u32 (!%p464_p9), %s2131_s14, 2 }
  0x5b   : > { %467 = sbr.rel (%p464_p9) target bundleno = 457 (0x1c9), region = 51  ;;  %s1703_s11 = sshll.u32 (!%p464_p9), %s470_s9, 10 }
  0x5c   : > { %p513_p10 = scmp.lt.s32.totalorder (!%p464_p9), %s1704_s10, 31  ;;  %s1706_s21 = sshll.u32 (!%p464_p9), %s2135_s15, 2 }
  0x5d   : > { %p523_p11 = scmp.lt.s32.totalorder (!%p464_p9), %s1706_s21, 31  ;;  %s2513_s5 = scalar_lea.vmem (!%p464_p9), [#allocation3], %s1703_s11 }
  0x5e   : > { %p1709_p12 = scmp.ne.s32.totalorder (!%p464_p9), %s2131_s14, 0 }
  0x60   : > { %s2713_s10 = smov (!%p513_p10, %s1704_s10), 31  ;;  %s2715_s21 = smov (!%p523_p11, %s1706_s21), 31 }
  0x61   : > { %s1705_s22 = sshll.u32 %s2713_s10, 1  ;;  %s525_s12 = scalar_lea.vmem %s2698_s2, %s2715_s21 }
  0x62   : > { %s2499_s26 = scalar_lea.vmem %s2696_s0, %s1705_s22  ;;  %s1708_s29 = sshll.u32 %s2715_s21, 1 }
  0x63   : > { %s2511_s15 = scalar_lea.vmem %s2699_s3, %s1708_s29  ;;  %540 = sbr.rel (%p1709_p12) target bundleno = 106 (0x6a), region = 59 }
  0x68   : > { %v2149_v0 = vmov 0.0  }
  0x69   : > { %541 = vst [vmem:[#allocation2] sm:$0xff] %v2149_v0 }
  0x6a PF: > { %v1900_v1 = vld [vmem:[%s2513_s5 + $0xe4] ss:$16 sps:$4 sm:$0xff]   ;;  %v1904_v3 = vld [vmem:[%s2513_s5 + $0xe0] ss:$16 sps:$4 sm:$0xff]   ;;  %v2150_v37 = vmov 1983009808   ;;  %v676_v39 = vlaneseq }
  0x6b   : > { %v1902_v2 = vld [vmem:[%s2513_s5 + $0x2e4] ss:$16 sps:$4 sm:$0xff]   ;;  %1338 = vmatprep.subr.bf16.mxu0 %v1900_v1  ;;  %v1905_v4 = vld [vmem:[%s2513_s5 + $0x2e0] ss:$16 sps:$4 sm:$0xff]   ;;  %v674_v38 = vunpack.c.l.s4 %v2150_v37  ;;  %v542_v53 = vld [vmem:[%s2499_s26] sm:$0xff]  ;;  %p1838_p13 = scmp.ne.s32.totalorder %s2131_s14, 7 }
  0x6c   : > { %1379 = vmatprep.subr.bf16.mxu1 %v1902_v2  ;;  %v1906_v5 = vld [vmem:[%s2513_s5 + $0xc4] ss:$16 sps:$4 sm:$0xff]   ;;  %1339 = vmatpush1.bf16.msra.mxu0 %v1904_v3  ;;  %v1910_v7 = vld [vmem:[%s2513_s5 + $0xc0] ss:$16 sps:$4 sm:$0xff]   ;;  %v2555_v44 = vshrl.u32 %v676_v39, 7  ;;  %v672_v56 = vcombine.high %v542_v53, %v542_v53 }
  0x6d   : > { %1380 = vmatpush1.bf16.msra.mxu1 %v1905_v4  ;;  %v1908_v6 = vld [vmem:[%s2513_s5 + $0x2c4] ss:$16 sps:$4 sm:$0xff]   ;;  %1340 = vmatprep.subr.bf16.mxu0 %v1906_v5  ;;  %v1911_v8 = vld [vmem:[%s2513_s5 + $0x2c0] ss:$16 sps:$4 sm:$0xff]   ;;  %v675_v43 = vunpack.c.0.s8 %v674_v38  ;;  %v2029_v37 = vld [vmem:[%s2513_s5 + $0x4c] ss:$16 sps:$4 sm:$0xff]  }
  0x6e   : > { %1381 = vmatprep.subr.bf16.mxu1 %v1908_v6  ;;  %v1912_v9 = vld [vmem:[%s2513_s5 + $0xa4] ss:$16 sps:$4 sm:$0xff]   ;;  %v1916_v11 = vld [vmem:[%s2513_s5 + $0xa0] ss:$16 sps:$4 sm:$0xff]   ;;  %v2032_v38 = vld [vmem:[%s2513_s5 + $0x24c] ss:$16 sps:$4 sm:$0xff]  }
  0x6f   : > { %v1914_v10 = vld [vmem:[%s2513_s5 + $0x2a4] ss:$16 sps:$4 sm:$0xff]   ;;  %v1917_v12 = vld [vmem:[%s2513_s5 + $0x2a0] ss:$16 sps:$4 sm:$0xff]   ;;  %v2563_v50 = vsub.s32 %v675_v43, %v2555_v44  ;;  %v2027_v39 = vld [vmem:[%s2513_s5 + $0x48] ss:$16 sps:$4 sm:$0xff]  }
  0x70   : > { %1341 = vmatpush1.bf16.msra.mxu0 %v1910_v7  ;;  %v1918_v13 = vld [vmem:[%s2513_s5 + $0x84] ss:$16 sps:$4 sm:$0xff]   ;;  %v1922_v15 = vld [vmem:[%s2513_s5 + $0x80] ss:$16 sps:$4 sm:$0xff]   ;;  %v2033_v43 = vld [vmem:[%s2513_s5 + $0x28] ss:$16 sps:$4 sm:$0xff]  }
  0x71   : > { %1382 = vmatpush1.bf16.msra.mxu1 %v1911_v8  ;;  %1342 = vmatprep.subr.bf16.mxu0 %v1912_v9  ;;  %v1920_v14 = vld [vmem:[%s2513_s5 + $0x284] ss:$16 sps:$4 sm:$0xff]   ;;  %v1923_v16 = vld [vmem:[%s2513_s5 + $0x280] ss:$16 sps:$4 sm:$0xff]   ;;  %v679_v55 = vrot.slane %v542_v53, %v2563_v50  ;;  %v686_v61 = vrot.slane %v672_v56, %v2563_v50  ;;  %v2045_v53 = vld [vmem:[%s2513_s5 + $0x1e8] ss:$16 sps:$4 sm:$0xff]  }
  0x72   : > { %1383 = vmatprep.subr.bf16.mxu1 %v1914_v10  ;;  %v1924_v17 = vld [vmem:[%s2513_s5 + $0x64] ss:$16 sps:$4 sm:$0xff]   ;;  %v1928_v19 = vld [vmem:[%s2513_s5 + $0x60] ss:$16 sps:$4 sm:$0xff]   ;;  %v2056_v56 = vld [vmem:[%s2513_s5 + $0x3cc] ss:$16 sps:$4 sm:$0xff]  }
  0x73   : > { %v1926_v18 = vld [vmem:[%s2513_s5 + $0x264] ss:$16 sps:$4 sm:$0xff]   ;;  %v1929_v20 = vld [vmem:[%s2513_s5 + $0x260] ss:$16 sps:$4 sm:$0xff]   ;;  %v687_v60 = vcombine.high %v679_v55, %v679_v55  ;;  %v688_v0 = vcombine.high %v686_v61, %v686_v61 }
  0x74   : > { %1343 = vmatpush1.bf16.msra.mxu0 %v1916_v11  ;;  %v1930_v21 = vld [vmem:[%s2513_s5 + $0x44] ss:$16 sps:$4 sm:$0xff]   ;;  %v1934_v23 = vld [vmem:[%s2513_s5 + $0x40] ss:$16 sps:$4 sm:$0xff]  }
  0x75   : > { %1384 = vmatpush1.bf16.msra.mxu1 %v1917_v12  ;;  %1344 = vmatprep.subr.bf16.mxu0 %v1918_v13  ;;  %v1932_v22 = vld [vmem:[%s2513_s5 + $0x244] ss:$16 sps:$4 sm:$0xff]   ;;  %v1935_v24 = vld [vmem:[%s2513_s5 + $0x240] ss:$16 sps:$4 sm:$0xff]   ;;  %v694_v63 = vpack.c.bf16 %v687_v60, %v687_v60  ;;  %v696_v4 = vpack.c.bf16 %v688_v0, %v688_v0  ;;  %v2062_v60 = vld [vmem:[%s2513_s5 + $0x3ac] ss:$16 sps:$4 sm:$0xff]  }
  0x76   : > { %1385 = vmatprep.subr.bf16.mxu1 %v1920_v14  ;;  %v1936_v25 = vld [vmem:[%s2513_s5 + $0x24] ss:$16 sps:$4 sm:$0xff]   ;;  %v1940_v27 = vld [vmem:[%s2513_s5 + $0x20] ss:$16 sps:$4 sm:$0xff]   ;;  %v2068_v0 = vld [vmem:[%s2513_s5 + $0x38c] ss:$16 sps:$4 sm:$0xff]  }
  0x77   : > { %v1938_v26 = vld [vmem:[%s2513_s5 + $0x224] ss:$16 sps:$4 sm:$0xff]   ;;  %v1941_v28 = vld [vmem:[%s2513_s5 + $0x220] ss:$16 sps:$4 sm:$0xff]   ;;  %1370 = vmatprep.mubr.bf16.mxu0 %v694_v63  ;;  %1411 = vmatprep.mubr.bf16.mxu1 %v696_v4 }
  0x78   : > { %1345 = vmatpush1.bf16.msra.mxu0 %v1922_v15  ;;  %v1942_v29 = vld [vmem:[%s2513_s5 + $0x4] ss:$16 sps:$4 sm:$0xff]   ;;  %v1946_v31 = vld [vmem:[%s2513_s5] ss:$16 sps:$4 sm:$0xff]   ;;  %v1999_v15 = vld [vmem:[%s2513_s5 + $0xec] ss:$16 sps:$4 sm:$0xff]  }
  0x79   : > { %1386 = vmatpush1.bf16.msra.mxu1 %v1923_v16  ;;  %1346 = vmatprep.subr.bf16.mxu0 %v1924_v17  ;;  %v1944_v30 = vld [vmem:[%s2513_s5 + $0x204] ss:$16 sps:$4 sm:$0xff]   ;;  %v1947_v32 = vld [vmem:[%s2513_s5 + $0x200] ss:$16 sps:$4 sm:$0xff]   ;;  %v2002_v16 = vld [vmem:[%s2513_s5 + $0x2ec] ss:$16 sps:$4 sm:$0xff]   ;;  %v2590_v17 = vpack.c.bf16 %v679_v55, %v679_v55 }
  0x7a   : > { %1387 = vmatprep.subr.bf16.mxu1 %v1926_v18  ;;  %v1948_v33 = vld [vmem:[%s2513_s5 + $0x1e4] ss:$16 sps:$4 sm:$0xff]   ;;  %v1952_v35 = vld [vmem:[%s2513_s5 + $0x1e0] ss:$16 sps:$4 sm:$0xff]   ;;  %v2592_v18 = vpack.c.bf16 %v686_v61, %v686_v61  ;;  %v2053_v55 = vld [vmem:[%s2513_s5 + $0x1cc] ss:$16 sps:$4 sm:$0xff]  }
  0x7b   : > { %v1950_v34 = vld [vmem:[%s2513_s5 + $0x3e4] ss:$16 sps:$4 sm:$0xff]   ;;  %v1953_v36 = vld [vmem:[%s2513_s5 + $0x3e0] ss:$16 sps:$4 sm:$0xff]   ;;  %v2057_v61 = vld [vmem:[%s2513_s5 + $0x1a8] ss:$16 sps:$4 sm:$0xff]  }
  0x7c   : > { %1347 = vmatpush1.bf16.msra.mxu0 %v1928_v19  ;;  %v1954_v40 = vld [vmem:[%s2513_s5 + $0x1c4] ss:$16 sps:$4 sm:$0xff]   ;;  %v1958_v42 = vld [vmem:[%s2513_s5 + $0x1c0] ss:$16 sps:$4 sm:$0xff]   ;;  %v1997_v19 = vld [vmem:[%s2513_s5 + $0xe8] ss:$16 sps:$4 sm:$0xff]  }
  0x7d   : > { %1388 = vmatpush1.bf16.msra.mxu1 %v1929_v20  ;;  %1348 = vmatprep.subr.bf16.mxu0 %v1930_v21  ;;  %v1956_v41 = vld [vmem:[%s2513_s5 + $0x3c4] ss:$16 sps:$4 sm:$0xff]   ;;  %v1959_v45 = vld [vmem:[%s2513_s5 + $0x3c0] ss:$16 sps:$4 sm:$0xff]   ;;  %v2000_v20 = vld [vmem:[%s2513_s5 + $0x2e8] ss:$16 sps:$4 sm:$0xff]  }
  0x7e   : > { %1389 = vmatprep.subr.bf16.mxu1 %v1932_v22  ;;  %v1960_v46 = vld [vmem:[%s2513_s5 + $0x1a4] ss:$16 sps:$4 sm:$0xff]   ;;  %v1964_v48 = vld [vmem:[%s2513_s5 + $0x1a0] ss:$16 sps:$4 sm:$0xff]   ;;  %v2005_v21 = vld [vmem:[%s2513_s5 + $0xcc] ss:$16 sps:$4 sm:$0xff]  }
  0x7f   : > { %v1962_v47 = vld [vmem:[%s2513_s5 + $0x3a4] ss:$16 sps:$4 sm:$0xff]   ;;  %v1965_v49 = vld [vmem:[%s2513_s5 + $0x3a0] ss:$16 sps:$4 sm:$0xff]   ;;  %v2008_v22 = vld [vmem:[%s2513_s5 + $0x2cc] ss:$16 sps:$4 sm:$0xff]  }
  0x80   : > { %1349 = vmatpush1.bf16.msra.mxu0 %v1934_v23  ;;  %v1966_v51 = vld [vmem:[%s2513_s5 + $0x184] ss:$16 sps:$4 sm:$0xff]   ;;  %v1970_v54 = vld [vmem:[%s2513_s5 + $0x180] ss:$16 sps:$4 sm:$0xff]   ;;  %v2003_v23 = vld [vmem:[%s2513_s5 + $0xc8] ss:$16 sps:$4 sm:$0xff]  }
  0x81   : > { %1390 = vmatpush1.bf16.msra.mxu1 %v1935_v24  ;;  %1350 = vmatprep.subr.bf16.mxu0 %v1936_v25  ;;  %v1968_v52 = vld [vmem:[%s2513_s5 + $0x384] ss:$16 sps:$4 sm:$0xff]   ;;  %v1971_v57 = vld [vmem:[%s2513_s5 + $0x380] ss:$16 sps:$4 sm:$0xff]   ;;  %v2006_v24 = vld [vmem:[%s2513_s5 + $0x2c8] ss:$16 sps:$4 sm:$0xff]  }
  0x82   : > { %1391 = vmatprep.subr.bf16.mxu1 %v1938_v26  ;;  %v1972_v58 = vld [vmem:[%s2513_s5 + $0x164] ss:$16 sps:$4 sm:$0xff]   ;;  %v1976_v62 = vld [vmem:[%s2513_s5 + $0x160] ss:$16 sps:$4 sm:$0xff]   ;;  %v2011_v25 = vld [vmem:[%s2513_s5 + $0xac] ss:$16 sps:$4 sm:$0xff]  }
  0x83   : > { %v1974_v59 = vld [vmem:[%s2513_s5 + $0x364] ss:$16 sps:$4 sm:$0xff]   ;;  %v1977_v1 = vld [vmem:[%s2513_s5 + $0x360] ss:$16 sps:$4 sm:$0xff]   ;;  %v2014_v26 = vld [vmem:[%s2513_s5 + $0x2ac] ss:$16 sps:$4 sm:$0xff]  }
  0x84   : > { %1351 = vmatpush1.bf16.msra.mxu0 %v1940_v27  ;;  %v1978_v2 = vld [vmem:[%s2513_s5 + $0x144] ss:$16 sps:$4 sm:$0xff]   ;;  %v1982_v5 = vld [vmem:[%s2513_s5 + $0x140] ss:$16 sps:$4 sm:$0xff]   ;;  %v2009_v27 = vld [vmem:[%s2513_s5 + $0xa8] ss:$16 sps:$4 sm:$0xff]  }
  0x85   : > { %1392 = vmatpush1.bf16.msra.mxu1 %v1941_v28  ;;  %1352 = vmatprep.subr.bf16.mxu0 %v1942_v29  ;;  %v1980_v3 = vld [vmem:[%s2513_s5 + $0x344] ss:$16 sps:$4 sm:$0xff]   ;;  %v1983_v6 = vld [vmem:[%s2513_s5 + $0x340] ss:$16 sps:$4 sm:$0xff]   ;;  %v2012_v28 = vld [vmem:[%s2513_s5 + $0x2a8] ss:$16 sps:$4 sm:$0xff]  }
  0x86   : > { %1393 = vmatprep.subr.bf16.mxu1 %v1944_v30  ;;  %v1984_v7 = vld [vmem:[%s2513_s5 + $0x124] ss:$16 sps:$4 sm:$0xff]   ;;  %v1988_v9 = vld [vmem:[%s2513_s5 + $0x120] ss:$16 sps:$4 sm:$0xff]   ;;  %v2017_v29 = vld [vmem:[%s2513_s5 + $0x8c] ss:$16 sps:$4 sm:$0xff]  }
  0x87   : > { %v1986_v8 = vld [vmem:[%s2513_s5 + $0x324] ss:$16 sps:$4 sm:$0xff]   ;;  %v1989_v10 = vld [vmem:[%s2513_s5 + $0x320] ss:$16 sps:$4 sm:$0xff]   ;;  %v2020_v30 = vld [vmem:[%s2513_s5 + $0x28c] ss:$16 sps:$4 sm:$0xff]  }
  0x88   : > { %1353 = vmatpush1.bf16.msra.mxu0 %v1946_v31  ;;  %v1990_v11 = vld [vmem:[%s2513_s5 + $0x104] ss:$16 sps:$4 sm:$0xff]   ;;  %v1994_v13 = vld [vmem:[%s2513_s5 + $0x100] ss:$16 sps:$4 sm:$0xff]   ;;  %v2015_v31 = vld [vmem:[%s2513_s5 + $0x88] ss:$16 sps:$4 sm:$0xff]  }
  0x89   : > { %1394 = vmatpush1.bf16.msra.mxu1 %v1947_v32  ;;  %1354 = vmatprep.subr.bf16.mxu0 %v1948_v33  ;;  %v1992_v12 = vld [vmem:[%s2513_s5 + $0x304] ss:$16 sps:$4 sm:$0xff]   ;;  %v1995_v14 = vld [vmem:[%s2513_s5 + $0x300] ss:$16 sps:$4 sm:$0xff]   ;;  %v2018_v32 = vld [vmem:[%s2513_s5 + $0x288] ss:$16 sps:$4 sm:$0xff]  }
  0x8a   : > { %1395 = vmatprep.subr.bf16.mxu1 %v1950_v34  ;;  %v2023_v33 = vld [vmem:[%s2513_s5 + $0x6c] ss:$16 sps:$4 sm:$0xff]  }
  0x8b   : > { %v2026_v34 = vld [vmem:[%s2513_s5 + $0x26c] ss:$16 sps:$4 sm:$0xff]  }
  0x8c   : > { %1355 = vmatpush2.bf16.msra.mxu0 %v1952_v35  ;;  %v2021_v35 = vld [vmem:[%s2513_s5 + $0x68] ss:$16 sps:$4 sm:$0xff]  }
  0x8d   : > { %1396 = vmatpush2.bf16.msra.mxu1 %v1953_v36  ;;  %1356 = vmatprep.subr.bf16.mxu0 %v1954_v40  ;;  %v2024_v36 = vld [vmem:[%s2513_s5 + $0x268] ss:$16 sps:$4 sm:$0xff]  }
  0x8e   : > { %1397 = vmatprep.subr.bf16.mxu1 %v1956_v41  ;;  %v2030_v40 = vld [vmem:[%s2513_s5 + $0x248] ss:$16 sps:$4 sm:$0xff]   ;;  %v2035_v41 = vld [vmem:[%s2513_s5 + $0x2c] ss:$16 sps:$4 sm:$0xff]  }
  0x90   : > { %1357 = vmatpush2.bf16.msra.mxu0 %v1958_v42  ;;  %v2038_v42 = vld [vmem:[%s2513_s5 + $0x22c] ss:$16 sps:$4 sm:$0xff]  }
  0x91   : > { %1398 = vmatpush2.bf16.msra.mxu1 %v1959_v45  ;;  %1358 = vmatprep.subr.bf16.mxu0 %v1960_v46  ;;  %v2036_v45 = vld [vmem:[%s2513_s5 + $0x228] ss:$16 sps:$4 sm:$0xff]   ;;  %v2041_v46 = vld [vmem:[%s2513_s5 + $0xc] ss:$16 sps:$4 sm:$0xff]  }
  0x92   : > { %1399 = vmatprep.subr.bf16.mxu1 %v1962_v47  ;;  %v2044_v47 = vld [vmem:[%s2513_s5 + $0x20c] ss:$16 sps:$4 sm:$0xff]  }
  0x94   : > { %1359 = vmatpush2.bf16.msra.mxu0 %v1964_v48  ;;  %v2039_v48 = vld [vmem:[%s2513_s5 + $0x8] ss:$16 sps:$4 sm:$0xff]  }
  0x95   : > { %1400 = vmatpush2.bf16.msra.mxu1 %v1965_v49  ;;  %1360 = vmatprep.subr.bf16.mxu0 %v1966_v51  ;;  %v2042_v49 = vld [vmem:[%s2513_s5 + $0x208] ss:$16 sps:$4 sm:$0xff]   ;;  %v2047_v51 = vld [vmem:[%s2513_s5 + $0x1ec] ss:$16 sps:$4 sm:$0xff]  }
  0x96   : > { %1401 = vmatprep.subr.bf16.mxu1 %v1968_v52  ;;  %v2050_v52 = vld [vmem:[%s2513_s5 + $0x3ec] ss:$16 sps:$4 sm:$0xff]  }
  0x98   : > { %1361 = vmatpush2.bf16.msra.mxu0 %v1970_v54  ;;  %v2048_v54 = vld [vmem:[%s2513_s5 + $0x3e8] ss:$16 sps:$4 sm:$0xff]  }
  0x99   : > { %1402 = vmatpush2.bf16.msra.mxu1 %v1971_v57  ;;  %1362 = vmatprep.subr.bf16.mxu0 %v1972_v58  ;;  %v2051_v57 = vld [vmem:[%s2513_s5 + $0x1c8] ss:$16 sps:$4 sm:$0xff]  }
  0x9a   : > { %1403 = vmatprep.subr.bf16.mxu1 %v1974_v59  ;;  %v2054_v58 = vld [vmem:[%s2513_s5 + $0x3c8] ss:$16 sps:$4 sm:$0xff]   ;;  %v2059_v59 = vld [vmem:[%s2513_s5 + $0x1ac] ss:$16 sps:$4 sm:$0xff]  }
  0x9c   : > { %1363 = vmatpush2.bf16.msra.mxu0 %v1976_v62  ;;  %v2060_v62 = vld [vmem:[%s2513_s5 + $0x3a8] ss:$16 sps:$4 sm:$0xff]  }
  0x9d   : > { %1404 = vmatpush2.bf16.msra.mxu1 %v1977_v1  ;;  %1364 = vmatprep.subr.bf16.mxu0 %v1978_v2  ;;  %v2063_v1 = vld [vmem:[%s2513_s5 + $0x188] ss:$16 sps:$4 sm:$0xff]  }
  0x9e   : > { %1405 = vmatprep.subr.bf16.mxu1 %v1980_v3  ;;  %v2066_v2 = vld [vmem:[%s2513_s5 + $0x388] ss:$16 sps:$4 sm:$0xff]   ;;  %v2071_v3 = vld [vmem:[%s2513_s5 + $0x16c] ss:$16 sps:$4 sm:$0xff]  }
  0xa0   : > { %1365 = vmatpush2.bf16.msra.mxu0 %v1982_v5  ;;  %v2069_v5 = vld [vmem:[%s2513_s5 + $0x168] ss:$16 sps:$4 sm:$0xff]  }
  0xa1   : > { %1406 = vmatpush2.bf16.msra.mxu1 %v1983_v6  ;;  %1366 = vmatprep.subr.bf16.mxu0 %v1984_v7  ;;  %v2072_v6 = vld [vmem:[%s2513_s5 + $0x368] ss:$16 sps:$4 sm:$0xff]   ;;  %v2077_v7 = vld [vmem:[%s2513_s5 + $0x14c] ss:$16 sps:$4 sm:$0xff]  }
  0xa2   : > { %1407 = vmatprep.subr.bf16.mxu1 %v1986_v8  ;;  %v2080_v8 = vld [vmem:[%s2513_s5 + $0x34c] ss:$16 sps:$4 sm:$0xff]  }
  0xa4   : > { %1367 = vmatpush2.bf16.msra.mxu0 %v1988_v9  ;;  %v2075_v9 = vld [vmem:[%s2513_s5 + $0x148] ss:$16 sps:$4 sm:$0xff]  }
  0xa5   : > { %1408 = vmatpush2.bf16.msra.mxu1 %v1989_v10  ;;  %1368 = vmatprep.subr.bf16.mxu0 %v1990_v11  ;;  %v2078_v10 = vld [vmem:[%s2513_s5 + $0x348] ss:$16 sps:$4 sm:$0xff]   ;;  %v2083_v11 = vld [vmem:[%s2513_s5 + $0x12c] ss:$16 sps:$4 sm:$0xff]  }
  0xa6   : > { %1409 = vmatprep.subr.bf16.mxu1 %v1992_v12  ;;  %v2086_v12 = vld [vmem:[%s2513_s5 + $0x32c] ss:$16 sps:$4 sm:$0xff]  }
  0xa8   : > { %1369 = vmatpush2.bf16.msra.mxu0 %v1994_v13  ;;  %v2081_v13 = vld [vmem:[%s2513_s5 + $0x128] ss:$16 sps:$4 sm:$0xff]  }
  0xa9   : > { %1410 = vmatpush2.bf16.msra.mxu1 %v1995_v14  ;;  %1420 = vmatprep.subr.bf16.mxu0 %v1999_v15  ;;  %v2084_v14 = vld [vmem:[%s2513_s5 + $0x328] ss:$16 sps:$4 sm:$0xff]   ;;  %v2089_v15 = vld [vmem:[%s2513_s5 + $0x10c] ss:$16 sps:$4 sm:$0xff]  }
  0xaa   : > { %1461 = vmatprep.subr.bf16.mxu1 %v2002_v16  ;;  %v2092_v16 = vld [vmem:[%s2513_s5 + $0x30c] ss:$16 sps:$4 sm:$0xff]  }
  0xab   : > { %1371 = vmatmul.mubr.bf16.vlgmr.msra.gmra.mxu0 %v2590_v17 }
  0xac   : > { %1412 = vmatmul.mubr.bf16.vlgmr.msra.gmra.mxu1 %v2592_v18  ;;  %1421 = vmatpush1.bf16.msra.mxu0 %v1997_v19  ;;  %v2087_v19 = vld [vmem:[%s2513_s5 + $0x108] ss:$16 sps:$4 sm:$0xff]  }
  0xad   : > { %1462 = vmatpush1.bf16.msra.mxu1 %v2000_v20  ;;  %1422 = vmatprep.subr.bf16.mxu0 %v2005_v21  ;;  %v2090_v20 = vld [vmem:[%s2513_s5 + $0x308] ss:$16 sps:$4 sm:$0xff]  }
  0xae   : > { %1463 = vmatprep.subr.bf16.mxu1 %v2008_v22  ;;  %1452 = vmatprep.mubr.bf16.mxu0 %v694_v63  ;;  %v2065_v63 = vld [vmem:[%s2513_s5 + $0x18c] ss:$16 sps:$4 sm:$0xff]  }
  0xaf   : > { %1493 = vmatprep.mubr.bf16.mxu1 %v696_v4  ;;  %v2074_v4 = vld [vmem:[%s2513_s5 + $0x36c] ss:$16 sps:$4 sm:$0xff]  }
  0xb0   : > { %1423 = vmatpush1.bf16.msra.mxu0 %v2003_v23 }
  0xb1   : > { %1464 = vmatpush1.bf16.msra.mxu1 %v2006_v24  ;;  %1424 = vmatprep.subr.bf16.mxu0 %v2011_v25 }
  0xb2   : > { %1465 = vmatprep.subr.bf16.mxu1 %v2014_v26 }
  0xb4   : > { %1425 = vmatpush1.bf16.msra.mxu0 %v2009_v27 }
  0xb5   : > { %1466 = vmatpush1.bf16.msra.mxu1 %v2012_v28  ;;  %1426 = vmatprep.subr.bf16.mxu0 %v2017_v29 }
  0xb6   : > { %1467 = vmatprep.subr.bf16.mxu1 %v2020_v30 }
  0xb8   : > { %1427 = vmatpush1.bf16.msra.mxu0 %v2015_v31 }
  0xb9   : > { %1468 = vmatpush1.bf16.msra.mxu1 %v2018_v32  ;;  %1428 = vmatprep.subr.bf16.mxu0 %v2023_v33 }
  0xba   : > { %1469 = vmatprep.subr.bf16.mxu1 %v2026_v34 }
  0xbc   : > { %1429 = vmatpush1.bf16.msra.mxu0 %v2021_v35 }
  0xbd   : > { %1470 = vmatpush1.bf16.msra.mxu1 %v2024_v36  ;;  %1430 = vmatprep.subr.bf16.mxu0 %v2029_v37 }
  0xbe   : > { %1471 = vmatprep.subr.bf16.mxu1 %v2032_v38 }
  0xc0   : > { %1431 = vmatpush1.bf16.msra.mxu0 %v2027_v39 }
  0xc1   : > { %1472 = vmatpush1.bf16.msra.mxu1 %v2030_v40  ;;  %1432 = vmatprep.subr.bf16.mxu0 %v2035_v41 }
  0xc2   : > { %1473 = vmatprep.subr.bf16.mxu1 %v2038_v42 }
  0xc4   : > { %1433 = vmatpush1.bf16.msra.mxu0 %v2033_v43  ;;  %v697_v43 = vld [vmem:[#allocation2] sm:$0xff] }
  0xc5   : > { %1474 = vmatpush1.bf16.msra.mxu1 %v2036_v45  ;;  %1434 = vmatprep.subr.bf16.mxu0 %v2041_v46 }
  0xc6   : > { %1475 = vmatprep.subr.bf16.mxu1 %v2044_v47 }
  0xc8   : > { %1435 = vmatpush1.bf16.msra.mxu0 %v2039_v48 }
  0xc9   : > { %1476 = vmatpush1.bf16.msra.mxu1 %v2042_v49  ;;  %1436 = vmatprep.subr.bf16.mxu0 %v2047_v51 }
  0xca   : > { %1477 = vmatprep.subr.bf16.mxu1 %v2050_v52 }
  0xcc   : > { %1437 = vmatpush2.bf16.msra.mxu0 %v2045_v53 }
  0xcd   : > { %1478 = vmatpush2.bf16.msra.mxu1 %v2048_v54  ;;  %1438 = vmatprep.subr.bf16.mxu0 %v2053_v55 }
  0xce   : > { %1479 = vmatprep.subr.bf16.mxu1 %v2056_v56 }
  0xd0   : > { %1439 = vmatpush2.bf16.msra.mxu0 %v2051_v57 }
  0xd1   : > { %1480 = vmatpush2.bf16.msra.mxu1 %v2054_v58  ;;  %1440 = vmatprep.subr.bf16.mxu0 %v2059_v59 }
  0xd2   : > { %1481 = vmatprep.subr.bf16.mxu1 %v2062_v60 }
  0xd4   : > { %1441 = vmatpush2.bf16.msra.mxu0 %v2057_v61 }
  0xd5   : > { %1482 = vmatpush2.bf16.msra.mxu1 %v2060_v62  ;;  %1442 = vmatprep.subr.bf16.mxu0 %v2065_v63 }
  0xd6   : > { %1483 = vmatprep.subr.bf16.mxu1 %v2068_v0 }
  0xd8   : > { %1443 = vmatpush2.bf16.msra.mxu0 %v2063_v1 }
  0xd9   : > { %1484 = vmatpush2.bf16.msra.mxu1 %v2066_v2  ;;  %1444 = vmatprep.subr.bf16.mxu0 %v2071_v3 }
  0xda   : > { %1485 = vmatprep.subr.bf16.mxu1 %v2074_v4 }
  0xdc   : > { %1445 = vmatpush2.bf16.msra.mxu0 %v2069_v5 }
  0xdd   : > { %1486 = vmatpush2.bf16.msra.mxu1 %v2072_v6  ;;  %1446 = vmatprep.subr.bf16.mxu0 %v2077_v7 }
  0xde   : > { %1487 = vmatprep.subr.bf16.mxu1 %v2080_v8 }
  0xe0   : > { %1447 = vmatpush2.bf16.msra.mxu0 %v2075_v9 }
  0xe1   : > { %1488 = vmatpush2.bf16.msra.mxu1 %v2078_v10  ;;  %1448 = vmatprep.subr.bf16.mxu0 %v2083_v11 }
  0xe2   : > { %1489 = vmatprep.subr.bf16.mxu1 %v2086_v12 }
  0xe4   : > { %1449 = vmatpush2.bf16.msra.mxu0 %v2081_v13 }
  0xe5   : > { %1490 = vmatpush2.bf16.msra.mxu1 %v2084_v14  ;;  %1450 = vmatprep.subr.bf16.mxu0 %v2089_v15 }
  0xe6   : > { %1491 = vmatprep.subr.bf16.mxu1 %v2092_v16 }
  0xe8   : > { %1451 = vmatpush2.bf16.msra.mxu0 %v2087_v19 }
  0xe9   : > { %1492 = vmatpush2.bf16.msra.mxu1 %v2090_v20 }
  0xeb   : > { %1453 = vmatmul.mubr.bf16.vlgmr.msra.gmra.mxu0 %v2590_v17 }
  0xec   : > { %1494 = vmatmul.mubr.bf16.vlgmr.msra.gmra.mxu1 %v2592_v18 }
 0x16b   : > { %v1372_v21 = vpop.f32.mrf.mxu0 }
 0x16c   : > { %v1413_v22 = vpop.f32.mrf.mxu1 }
 0x16d   : > { %v1414_v23 = vadd.f32 %v1413_v22, %v1372_v21  ;;  %v1374_v24 = vpop.f32.mrf.mxu0 }
 0x16e   : > { %v1415_v25 = vpop.f32.mrf.mxu1 }
 0x16f   : > { %v1416_v26 = vadd.f32 %v1415_v25, %v1374_v24  ;;  %v1376_v27 = vpop.f32.mrf.mxu0 }
 0x170   : > { %v1417_v28 = vpop.f32.mrf.mxu1 }
 0x171   : > { %v1506_v29 = vcombine.low %v1414_v23, %v1416_v26  ;;  %v1377_v30 = vpop.f32.mrf.mxu0 }
 0x172   : > { %v1418_v31 = vpop.f32.mrf.mxu1 }
 0x173   : > { %v1514_v41 = vrot.slane %v1506_v29, %v2563_v50 }
 0x1ab   : > { %v1454_v32 = vpop.f32.mrf.mxu0 }
 0x1ac   : > { %v1495_v33 = vpop.f32.mrf.mxu1 }
 0x1ad   : > { %v1456_v34 = vpop.f32.mrf.mxu0  ;;  %v1496_v36 = vadd.f32 %v1495_v33, %v1454_v32 }
 0x1ae   : > { %v1497_v35 = vpop.f32.mrf.mxu1 }
 0x1af   : > { %v1498_v37 = vadd.f32 %v1497_v35, %v1456_v34  ;;  %v1458_v17 = vpop.f32.mrf.mxu0 }
 0x1b0   : > { %v1499_v38 = vpop.f32.mrf.mxu1 }
 0x1b1   : > { %v1507_v18 = vcombine.low %v1496_v36, %v1498_v37  ;;  %v1459_v39 = vpop.f32.mrf.mxu0 }
 0x1b2   : > { %v1500_v40 = vpop.f32.mrf.mxu1 }
 0x1b3   : > { %v1521_v42 = vrot.slane %v1507_v18, %v2563_v50 }
 0x1b5   : > { %v1522_v45 = vcombine.low %v1514_v41, %v1521_v42  ;;  %1529 = sbr.rel (%p1838_p13) target bundleno = 457 (0x1c9), region = 63 }
 0x1b7   : > { %v1524_v46 = vadd.f32 %v1522_v45, %v697_v43 }
 0x1b9   : > { %1525 = vst [vmem:[#allocation2] sm:$0xff] %v1524_v46 }
 0x1ba   : > { %v1531_v47 = vld [vmem:[%s525_s12] sm:$0xf]  ;;  %v1535_v48 = vsub.s32 0, %v2555_v44  ;;  %v1539_v49 = vsub.s32 1, %v2555_v44  ;;  %v1543_v51 = vsub.s32 2, %v2555_v44  ;;  %v1547_v52 = vsub.s32 3, %v2555_v44 }
 0x1bc   : > { %v1536_v53 = vrot.slane %v1531_v47, %v1535_v48  ;;  %v1540_v54 = vrot.slane %v1531_v47, %v1539_v49  ;;  %v1544_v55 = vrot.slane %v1531_v47, %v1543_v51  ;;  %v1548_v56 = vrot.slane %v1531_v47, %v1547_v52 }
 0x1be   : > { %v1549_v57 = vcombine.low %v1536_v53, %v1540_v54  ;;  %v1550_v58 = vcombine.low %v1544_v55, %v1548_v56 }
 0x1c0   : > { %v1557_v59 = vrot.slane %v1549_v57, %v2563_v50  ;;  %v1564_v60 = vrot.slane %v1550_v58, %v2563_v50  ;;  %v1530_v61 = vld [vmem:[#allocation2] sm:$0xff] }
 0x1c2   : > { %v1565_v62 = vcombine.low %v1557_v59, %v1564_v60 }
 0x1c4   : > { %v1567_v63 = vadd.f32 %v1565_v62, %v1530_v61 }
 0x1c6   : > { %v1568_v0 = vmax.f32 %v1567_v63, 0.0 }
 0x1c8   : > { %1569 = vst [vmem:[%s2511_s15] sm:$0xff] %v1568_v0 }
 0x1c9 PF: > { %s13_s18 = sadd.s32 1, %s2147_s18   ;;  %s2700_s12 = smov %s2127_s13 }
 0x1ca   : > { %p10_p0 = scmp.ge.s32.totalorder %s13_s18, 66   ;;  %s2701_s13 = smov %s2222_s25 }
 0x1cb   : > { %s2702_s14 = smov %s2139_s16  ;;  %s2703_s15 = smov %s2143_s17 }
 0x1cc   : > { %s2704_s16 = smov %s2707_s19  ;;  %s2705_s17 = smov %s2711_s20 }
 0x1cd   :  { %12 = sbr.rel (!%p10_p0) target bundleno = 4 (0x4), region = 104 }

// kernel: alexnet_forward.21
= control target key start
LH: loop header
LB: loop body
LE: loop exit
PB: predicated region body
PF: predicated region fallthrough
CT: control target
= control target key end

     0   :  { %8 = vsyncpa [#allocation4], 0  ;;  %s964_s12 = smov 0   ;;  %s966_s13 = smov 0   ;;  %s1061_s0 = inlined_call_operand.vmem [shape: f32[2,4096], index: 0, kind: input, shape index: {}]   ;;  %s1062_s1 = inlined_call_operand.vmem [shape: bf16[4096,10], index: 1, kind: input, shape index: {}]   ;;  %s1063_s2 = inlined_call_operand.vmem [shape: f32[1,10], index: 2, kind: input, shape index: {}]   ;;  %s1064_s3 = inlined_call_operand.hbm [shape: f32[2,10], index: 3, kind: output, shape index: {}]  }
   0x1   :  { %s968_s14 = smov 0  }
   0x2 LB: > { %s731_s15 = sadd.s32 4294967295, %s939_s14   ;;  %s26_s16 = sadd.s32 1, %s935_s13  ;;  %s939_s14 = sphi %s968_s14, %s14_s14   ;;  %s935_s13 = sphi %s966_s13, %s1067_s13   ;;  %s931_s12 = sphi %s964_s12, %s1066_s12  }
   0x3   : > { %p27_p0 = scmp.ge.s32.totalorder %s26_s16, 8  ;;  %p735_p1 = scmp.ge.s32.totalorder %s939_s14, 1 }
   0x4   : > { %p190_p2 = scmp.lt.s32.totalorder %s939_s14, 9 }
   0x5   : > { %s1069_s16 = smov (%p27_p0, %s26_s16), 0 }
   0x6   : > { %p191_p3 = pnand %p735_p1, %p190_p2 }
   0x7   : > { %s736_s17 = sshll.u32 (!%p191_p3), %s931_s12, 2  ;;  %s738_s18 = sshll.u32 (!%p191_p3), %s931_s12, 6 }
   0x8   : > { %194 = sbr.rel (%p191_p3) target bundleno = 285 (0x11d), region = 32  ;;  %p227_p4 = scmp.lt.s32.totalorder (!%p191_p3), %s736_s17, 31 }
   0x9   : > { %p235_p5 = scmp.lt.s32.totalorder (!%p191_p3), %s738_s18, 511  ;;  %p740_p6 = scmp.ne.s32.totalorder (!%p191_p3), %s931_s12, 0 }
   0xd   : > { %s1071_s17 = smov (!%p227_p4, %s736_s17), 31  ;;  %s1073_s18 = smov (!%p235_p5, %s738_s18), 511 }
   0xe   : > { %s737_s19 = sshll.u32 %s1071_s17, 1  ;;  %s739_s23 = sshll.u32 %s1073_s18, 2 }
   0xf   : > { %s990_s22 = scalar_lea.vmem %s1061_s0, %s737_s19  ;;  %s995_s26 = scalar_lea.vmem %s1062_s1, %s739_s23 }
  0x10   : > { %250 = sbr.rel (%p740_p6) target bundleno = 23 (0x17), region = 36 }
  0x15   : > { %vm251_vm0 = vcmask 74752   ;;  %v941_v0 = vmov 0.0  }
  0x16   : > { %252 = vst.msk [vmem:[#allocation2] sm:$0x3] %vm251_vm0, %v941_v0 }
  0x17 PF: > { %v856_v1 = vld [vmem:[%s995_s26 + $0x78] sm:$0xff]   ;;  %v860_v5 = vld [vmem:[%s995_s26 + $0x70] sm:$0xff]   ;;  %v864_v9 = vld [vmem:[%s995_s26 + $0x68] sm:$0xff]   ;;  %v323_v31 = vlaneseq  ;;  %v942_v35 = vmov 1983009808   ;;  %vm618_vm1 = vcmask 74752  }
  0x18   : > { %v857_v2 = vld [vmem:[%s995_s26 + $0xf8] sm:$0xff]   ;;  %779 = vmatprep.subr.bf16.mxu0 %v856_v1  ;;  %v861_v6 = vld [vmem:[%s995_s26 + $0xf0] sm:$0xff]   ;;  %v865_v10 = vld [vmem:[%s995_s26 + $0xe8] sm:$0xff]   ;;  %v321_v36 = vunpack.c.l.s4 %v942_v35  ;;  %p773_p7 = scmp.ne.s32.totalorder %s931_s12, 7 }
  0x19   : > { %v858_v3 = vld [vmem:[%s995_s26 + $0x38] sm:$0xff]   ;;  %801 = vmatprep.subr.bf16.mxu1 %v857_v2  ;;  %v862_v7 = vld [vmem:[%s995_s26 + $0x30] sm:$0xff]   ;;  %v866_v11 = vld [vmem:[%s995_s26 + $0x28] sm:$0xff]   ;;  %v324_v37 = vshrl.u32 %v323_v31, 7 }
  0x1a   : > { %v859_v4 = vld [vmem:[%s995_s26 + $0xb8] sm:$0xff]   ;;  %780 = vmatpush3.bf16.msra.mxu0 %v858_v3  ;;  %v863_v8 = vld [vmem:[%s995_s26 + $0xb0] sm:$0xff]   ;;  %v867_v12 = vld [vmem:[%s995_s26 + $0xa8] sm:$0xff]   ;;  %v322_v38 = vunpack.c.0.s8 %v321_v36 }
  0x1b   : > { %802 = vmatpush3.bf16.msra.mxu1 %v859_v4  ;;  %781 = vmatprep.subr.bf16.mxu0 %v860_v5  ;;  %v868_v13 = vld [vmem:[%s995_s26 + $0x60] sm:$0xff]   ;;  %v872_v17 = vld [vmem:[%s995_s26 + $0x58] sm:$0xff]   ;;  %v876_v21 = vld [vmem:[%s995_s26 + $0x50] sm:$0xff]  }
  0x1c   : > { %803 = vmatprep.subr.bf16.mxu1 %v861_v6  ;;  %v869_v14 = vld [vmem:[%s995_s26 + $0xe0] sm:$0xff]   ;;  %v873_v18 = vld [vmem:[%s995_s26 + $0xd8] sm:$0xff]   ;;  %v877_v22 = vld [vmem:[%s995_s26 + $0xd0] sm:$0xff]   ;;  %v325_v40 = vsub.s32 %v322_v38, %v324_v37 }
  0x1d   : > { %v870_v15 = vld [vmem:[%s995_s26 + $0x20] sm:$0xff]   ;;  %v874_v19 = vld [vmem:[%s995_s26 + $0x18] sm:$0xff]   ;;  %v878_v23 = vld [vmem:[%s995_s26 + $0x10] sm:$0xff]  }
  0x1e   : > { %782 = vmatpush3.bf16.msra.mxu0 %v862_v7  ;;  %v871_v16 = vld [vmem:[%s995_s26 + $0xa0] sm:$0xff]   ;;  %v875_v20 = vld [vmem:[%s995_s26 + $0x98] sm:$0xff]   ;;  %v879_v24 = vld [vmem:[%s995_s26 + $0x90] sm:$0xff]  }
  0x1f   : > { %804 = vmatpush3.bf16.msra.mxu1 %v863_v8  ;;  %783 = vmatprep.subr.bf16.mxu0 %v864_v9  ;;  %v880_v25 = vld [vmem:[%s995_s26 + $0x48] sm:$0xff]   ;;  %v884_v29 = vld [vmem:[%s995_s26 + $0x40] sm:$0xff]  }
  0x20   : > { %805 = vmatprep.subr.bf16.mxu1 %v865_v10  ;;  %v881_v26 = vld [vmem:[%s995_s26 + $0xc8] sm:$0xff]   ;;  %v885_v30 = vld [vmem:[%s995_s26 + $0xc0] sm:$0xff]  }
  0x21   : > { %v882_v27 = vld [vmem:[%s995_s26 + $0x8] sm:$0xff]   ;;  %v886_v32 = vld [vmem:[%s995_s26] sm:$0xff]  }
  0x22   : > { %784 = vmatpush3.bf16.msra.mxu0 %v866_v11  ;;  %v883_v28 = vld [vmem:[%s995_s26 + $0x88] sm:$0xff]   ;;  %v887_v33 = vld [vmem:[%s995_s26 + $0x80] sm:$0xff]  }
  0x23   : > { %806 = vmatpush3.bf16.msra.mxu1 %v867_v12  ;;  %785 = vmatprep.subr.bf16.mxu0 %v868_v13  ;;  %v253_v34 = vld [vmem:[%s990_s22] sm:$0xff] }
  0x24   : > { %807 = vmatprep.subr.bf16.mxu1 %v869_v14  ;;  %v319_v39 = vcombine.high %v253_v34, %v253_v34  ;;  %v326_v41 = vrot.slane %v253_v34, %v325_v40  ;;  %v344_v55 = vld [vmem:[#allocation2] sm:$0x3] }
  0x26   : > { %786 = vmatpush3.bf16.msra.mxu0 %v870_v15  ;;  %v333_v42 = vrot.slane %v319_v39, %v325_v40  ;;  %v334_v43 = vcombine.high %v326_v41, %v326_v41  ;;  %v340_v45 = vpack.c.bf16 %v326_v41, %v326_v41 }
  0x27   : > { %808 = vmatpush3.bf16.msra.mxu1 %v871_v16  ;;  %787 = vmatprep.subr.bf16.mxu0 %v872_v17 }
  0x28   : > { %809 = vmatprep.subr.bf16.mxu1 %v873_v18  ;;  %v335_v44 = vcombine.high %v333_v42, %v333_v42  ;;  %v342_v46 = vpack.c.bf16 %v333_v42, %v333_v42  ;;  %v341_v47 = vpack.c.bf16 %v334_v43, %v334_v43 }
  0x2a   : > { %788 = vmatpush3.bf16.msra.mxu0 %v874_v19  ;;  %v343_v48 = vpack.c.bf16 %v335_v44, %v335_v44  ;;  %569 = vmatprep.mubr.bf16.mxu0 %v341_v47 }
  0x2b   : > { %810 = vmatpush3.bf16.msra.mxu1 %v875_v20  ;;  %789 = vmatprep.subr.bf16.mxu0 %v876_v21 }
  0x2c   : > { %811 = vmatprep.subr.bf16.mxu1 %v877_v22  ;;  %609 = vmatprep.mubr.bf16.mxu1 %v343_v48 }
  0x2e   : > { %790 = vmatpush3.bf16.msra.mxu0 %v878_v23 }
  0x2f   : > { %812 = vmatpush3.bf16.msra.mxu1 %v879_v24  ;;  %791 = vmatprep.subr.bf16.mxu0 %v880_v25 }
  0x30   : > { %813 = vmatprep.subr.bf16.mxu1 %v881_v26 }
  0x32   : > { %792 = vmatpush3.bf16.msra.mxu0 %v882_v27 }
  0x33   : > { %814 = vmatpush3.bf16.msra.mxu1 %v883_v28  ;;  %793 = vmatprep.subr.bf16.mxu0 %v884_v29 }
  0x34   : > { %815 = vmatprep.subr.bf16.mxu1 %v885_v30 }
  0x36   : > { %794 = vmatpush3.bf16.msra.mxu0 %v886_v32 }
  0x37   : > { %816 = vmatpush3.bf16.msra.mxu1 %v887_v33 }
  0x39   : > { %570 = vmatmul.mubr.bf16.vlgmr.msra.gmra.mxu0 %v340_v45 }
  0x3a   : > { %610 = vmatmul.mubr.bf16.vlgmr.msra.gmra.mxu1 %v342_v46 }
  0xf9   : > { %v795_v49 = vpop.f32.mrf.mxu0 }
  0xfa   : > { %v817_v50 = vpop.f32.mrf.mxu1 }
  0xfb   : > { %v796_v51 = vpop.f32.mrf.mxu0 }
  0xfc   : > { %v818_v52 = vpop.f32.mrf.mxu1  ;;  %v797_v53 = vadd.f32 %v796_v51, %v795_v49 }
  0xfd   : > { %v819_v54 = vadd.f32 %v818_v52, %v817_v50  ;;  %v798_v56 = vpop.f32.mrf.mxu0 }
  0xfe   : > { %v820_v57 = vpop.f32.mrf.mxu1 }
  0xff   : > { %v612_v58 = vadd.f32 %v819_v54, %v797_v53  ;;  %v799_v59 = vpop.f32.mrf.mxu0  ;;  %623 = sbr.rel (%p773_p7) target bundleno = 270 (0x10e), region = 40 }
 0x100   : > { %v821_v60 = vpop.f32.mrf.mxu1 }
 0x101   : > { %v617_v61 = vadd.f32 %v612_v58, %v344_v55 }
 0x103   : > { %619 = vst.msk [vmem:[#allocation2] sm:$0x3] %vm618_vm1, %v617_v61 }
 0x104   : > { %v774_v63 = vld [vmem:[%s1063_s2] ss:$0 sm:$0xff] }
 0x10a   : > { %v624_v62 = vld [vmem:[#allocation2] sm:$0x3] }
 0x10b   : > { %v632_v0 = vadd.f32 %v774_v63, %v624_v62 }
 0x10d   : > { %633 = vst.msk [vmem:[#allocation3] sm:$0x3] %vm618_vm1, %v632_v0 }
 0x10e PF: > { %p1037_p8 = scmp.eq.s32.totalorder %s731_s15, 7  ;;  %s943_s30 = smov [#allocation3]  }
 0x10f   : > { %s644_s4 = sshll.u32 %s943_s30, 4  ;;  %s645_s4 = int_to_ptr.vmem [resolvable:$true] %s644_s4 }
 0x110   : > { %s889_s5 = scalar_lea.vmem %s645_s4, 32  ;;  %p896_p12 = scmp.lt.s32.totalorder %s645_s4, %s645_s4 }
 0x111   : > { %p890_p9 = scmp.ne.s32.totalorder %s645_s4, %s889_s5  ;;  %p897_p13 = scmp.lt.s32.totalorder %s889_s5, %s889_s5 }
 0x113   : > { %p891_p10 = pnand %p890_p9, %p1037_p8  ;;  %p898_p0 = por %p897_p13, %p896_p12 }
 0x115   : > { %p892_p11 = pneg %p891_p10 }
 0x117   : > { %p899_p1 = pnand %p898_p0, %p892_p11 }
 0x119   : > { %902 = shalt.err (!%p899_p1)
}
 0x11a   : > { %824 = dma.vmem_to_hbm [thread:$0]  (%p1037_p8), %s645_s4, 32, %s1064_s3, [#allocation4]  }
 0x11b   : > { %926 = dma.done.wait (%p1037_p8), [#allocation4], 32  }
 0x11c   : > { %928 = vsyncadd (%p1037_p8), [#allocation4], 4294967264 }
 0x11d PF: > { %s14_s14 = sadd.s32 1, %s939_s14   ;;  %s1066_s12 = smov %s935_s13 }
 0x11e   : > { %p11_p2 = scmp.ge.s32.totalorder %s14_s14, 10   ;;  %s1067_s13 = smov %s1069_s16 }
 0x120   :  { %13 = sbr.rel (!%p11_p2) target bundleno = 2 (0x2), region = 74 }
 0x125   :  { %657 = vsyncpa [#allocation4], 1 }
 0x126   :  { %659 = vsyncpa [#allocation4 + $0x1], 1 }

</bundles_post_ra>
